<compile_context>
chip_gen: v7x
topology: tpu7x:2x2x1
jax: 0.10.0
libtpu: 0.0.40
codegen_flags: <defaults>
</compile_context>

<pallas_src>
import jax
import jax.numpy as jnp
from jax.experimental import pallas as pl
from jax.experimental.pallas import tpu as pltpu

# --------------------------- model configuration ----------------------------
RATIOS = (2, 2)          # cfg.model.ratios
BOTTLENECK = 4           # cfg.model.bottleneck_dim
NGF = 8                  # cfg.model.ngf
N_RES = 2                # cfg.model.n_residual_layers
N_SPK = 16               # cfg.model.n_speaker_embedding
MULT = 2 ** len(RATIOS)

F32 = jnp.float32
BF16 = jnp.bfloat16

BASE = 8                 # lane offset of time sample 0 inside the act scratch


# ------------------------------ parameter init ------------------------------
def init_params(key, t0):
    """Build the static layer plan plus the three packed parameter slabs."""
    assert all(r == 2 for r in RATIOS)   # TODO(synk): generalize interleave for r != 2
    keys = list(jax.random.split(key, 64))
    kidx = [0]

    def nrm(shape):
        k = keys[kidx[0]]
        kidx[0] += 1
        return jax.random.normal(k, shape, F32) * 0.05

    taps, biases, plan = [], [], []

    def add_tap(mat):                       # mat: (cout, cin) effective weight
        cout, cin = mat.shape
        slot = jnp.zeros((32, 32), F32).at[:cout, :cin].set(mat)
        taps.append(slot)
        return len(taps) - 1

    def add_bias(cout):
        col = jnp.zeros((32,), F32).at[:cout].set(nrm((cout,)))
        biases.append(col)
        return len(biases) - 1

    def conv_params(cin, cout, K):
        w = nrm((cout, cin, K))             # torch Conv1d weight layout
        tap_ids = tuple(add_tap(w[:, :, k]) for k in range(K))
        return tap_ids, add_bias(cout)

    def deconv_params(cin, cout, r):
        # ConvTranspose1d(k=2r, stride=r, padding=r//2+r%2, output_padding=r%2)
        # polyphase: y[r*t+ph] = sum_{k:(ph+p-k)%r==0} W[:,:,k]^T . x[t+(ph+p-k)/r]
        K, p = 2 * r, r // 2 + r % 2
        w = nrm((cin, cout, K))             # torch ConvTranspose1d weight layout
        phases = []
        for ph in range(r):
            ph_taps = []
            for k in range(K):
                if (ph + p - k) % r == 0:
                    ph_taps.append((add_tap(w[:, :, k].T), (ph + p - k) // r))
            phases.append(tuple(ph_taps))
        return tuple(phases), add_bias(cout)

    c0 = MULT * NGF
    t_ids, b_id = conv_params(BOTTLENECK, c0, 7)
    plan.append(dict(kind="conv", cin=BOTTLENECK, cout=c0, K=7, dil=1, pad=3,
                     gelu=False, tanh=False, taps=t_ids, bias=b_id))
    t_ids, b_id = conv_params(c0, c0, 7)
    plan.append(dict(kind="conv", cin=c0, cout=c0, K=7, dil=1, pad=3,
                     gelu=True, tanh=False, taps=t_ids, bias=b_id))
    in_c = c0
    for i, r in enumerate(RATIOS):
        out_c = MULT // 2 ** i * NGF // 2
        phases, b_id = deconv_params(in_c, out_c, r)
        plan.append(dict(kind="deconv", cin=in_c, cout=out_c, r=r,
                         phases=phases, bias=b_id))
        for j in range(N_RES):
            dil = 3 ** j
            blk_t, blk_b = conv_params(out_c, out_c, 3)
            spk_t, spk_b = conv_params(N_SPK, out_c, 1)
            out_t, out_b = conv_params(out_c, out_c, 1)
            sc_t, sc_b = conv_params(out_c, out_c, 1)
            plan.append(dict(kind="res", c=out_c, dil=dil,
                             blk_taps=blk_t, blk_bias=blk_b,
                             spk_tap=spk_t[0], spk_bias=spk_b,
                             out_tap=out_t[0], out_bias=out_b,
                             sc_tap=sc_t[0], sc_bias=sc_b))
        in_c = out_c
    t_ids, b_id = conv_params(in_c, 1, 7)
    plan.append(dict(kind="conv", cin=in_c, cout=1, K=7, dil=1, pad=3,
                     gelu=True, tanh=True, taps=t_ids, bias=b_id))

    w_slab = jnp.stack(taps).astype(BF16)            # (N_TAP, 32, 32)
    b_slab = jnp.stack(biases, axis=1)               # (32, N_LAYER) f32

    # Polyphase -> time interleave constants: E[ph][t, 2t+ph] = 1 (0/1 -> bf16
    # is lossless for the matrix itself).
    max_low = t0
    for r in RATIOS[:-1]:
        max_low *= r
    rows = jnp.arange(max_low)[:, None]
    cols = jnp.arange(2 * max_low)[None, :]
    e_slab = jnp.stack([(cols == 2 * rows + ph).astype(F32) for ph in range(2)]
                       ).astype(BF16)                # (2, max_low, 2*max_low)

    return plan, w_slab, b_slab, e_slab


# -------------------------------- fused kernel -------------------------------
def make_kernel(plan, t0):

    def gelu(x):
        # exact-erf GELU (matches torch.nn.GELU()); A&S 7.1.26, |err| < 1.5e-7.
        a1, a2, a3, a4, a5 = (0.254829592, -0.284496736, 1.421413741,
                              -1.453152027, 1.061405429)
        p = 0.3275911
        z = x * 0.7071067811865476
        s = jnp.where(z >= 0, jnp.float32(1.0), jnp.float32(-1.0))
        az = jnp.abs(z)
        t = 1.0 / (1.0 + p * az)          # exact divide (correctness review)
        poly = ((((a5 * t + a4) * t + a3) * t + a2) * t + a1) * t
        erf = s * (1.0 - poly * jnp.exp(-az * az))
        return 0.5 * x * (1.0 + erf)

    def kernel(x_ref, spk_ref, w_ref, b_ref, e_ref, o_ref, act):
        # act: VMEM scratch (32, BASE + T_out + 8) f32, padded activation home.

        def tap_w(idx, cout, cin):
            return w_ref[idx][0:cout, 0:cin]                 # bf16 (cout, cin)

        def bias_col(idx, cout):
            return b_ref[0:cout, idx:idx + 1]                # f32 (cout, 1)

        def store_padded(g, c, t, pad, reflect):
            """Store g (c,t) at lane BASE and write `pad` border lanes/side."""
            act[0:c, BASE:BASE + t] = g
            for i in range(pad):
                if reflect:                                  # ReflectionPad1d
                    left = g[:, 1 + i:2 + i]
                    right = g[:, t - 2 - i:t - 1 - i]
                else:                                        # zero pad (deconv)
                    left = jnp.zeros((c, 1), F32)
                    right = left
                act[0:c, BASE - 1 - i:BASE - i] = left
                act[0:c, BASE + t + i:BASE + t + i + 1] = right

        def conv_from_scratch(tap_ids, b_id, cin, cout, t, dil, pad):
            acc = None
            for k, tid in enumerate(tap_ids):
                off = BASE - pad + k * dil
                win = act[0:cin, off:off + t].astype(BF16)
                dot = jnp.dot(tap_w(tid, cout, cin), win,
                              preferred_element_type=F32)
                acc = dot if acc is None else acc + dot
            return acc + bias_col(b_id, cout)

        x = x_ref[0].astype(F32)                 # (BOTTLENECK, T0)
        spk = spk_ref[0].astype(BF16)            # (N_SPK, 1)
        t = t0

        # Hoisted speaker projections: 4 tiny dots computed once per grid step.
        spk_cols = []
        for entry in plan:
            if entry["kind"] == "res":
                c = entry["c"]
                s = jnp.dot(tap_w(entry["spk_tap"], c, N_SPK), spk,
                            preferred_element_type=F32)
                spk_cols.append(s + bias_col(entry["spk_bias"], c))
        spk_cols = iter(spk_cols)

        for entry in plan:
            kind = entry["kind"]
            if kind == "conv":
                g = gelu(x) if entry["gelu"] else x
                cin, cout, p = entry["cin"], entry["cout"], entry["pad"]
                store_padded(g, cin, t, p, reflect=True)
                x = conv_from_scratch(entry["taps"], entry["bias"],
                                      cin, cout, t, entry["dil"], p)
                if entry["tanh"]:
                    x = jnp.tanh(x)
            elif kind == "deconv":
                cin, cout, r = entry["cin"], entry["cout"], entry["r"]
                g = gelu(x)
                store_padded(g, cin, t, 1, reflect=False)
                y = None
                for ph, ph_taps in enumerate(entry["phases"]):
                    acc = None
                    for (tid, shift) in ph_taps:
                        win = act[0:cin,
                                  BASE + shift:BASE + shift + t].astype(BF16)
                        dot = jnp.dot(tap_w(tid, cout, cin), win,
                                      preferred_element_type=F32)
                        acc = dot if acc is None else acc + dot
                    e = e_ref[ph][0:t, 0:r * t]              # 0/1 bf16 expand
                    dot = jnp.dot(acc.astype(BF16), e,
                                  preferred_element_type=F32)
                    y = dot if y is None else y + dot
                x = y + bias_col(entry["bias"], cout)
                t = r * t
            else:  # residual layer
                c, dil = entry["c"], entry["dil"]
                g = gelu(x)
                store_padded(g, c, t, dil, reflect=True)
                h = conv_from_scratch(entry["blk_taps"], entry["blk_bias"],
                                      c, c, t, dil, dil)
                h = gelu(h + next(spk_cols))
                h = jnp.dot(tap_w(entry["out_tap"], c, c), h.astype(BF16),
                            preferred_element_type=F32) \
                    + bias_col(entry["out_bias"], c)
                sc = jnp.dot(tap_w(entry["sc_tap"], c, c), x.astype(BF16),
                             preferred_element_type=F32) \
                    + bias_col(entry["sc_bias"], c)
                x = sc + h

        o_ref[0] = x.astype(o_ref.dtype)          # (1, T_out), lane-dense

    return kernel


# ------------------------------ decoder forward ------------------------------
def make_decoder(plan, t0):
    kernel = make_kernel(plan, t0)
    hop = 1
    for r in RATIOS:
        hop *= r
    t_out = t0 * hop
    scratch_w = BASE + t_out + 8

    @jax.jit
    def fwd(w_slab, b_slab, e_slab, x, spk):
        # x: (B, bottleneck_dim, T0) NCL; spk: (B, n_speaker_embedding, 1) NCL
        B = x.shape[0]
        in_specs = [
            pl.BlockSpec((1, BOTTLENECK, t0), lambda i: (i, 0, 0)),
            pl.BlockSpec((1, N_SPK, 1), lambda i: (i, 0, 0)),
            pl.BlockSpec(w_slab.shape, lambda i: (0, 0, 0)),
            pl.BlockSpec(b_slab.shape, lambda i: (0, 0)),
            pl.BlockSpec(e_slab.shape, lambda i: (0, 0, 0)),
        ]
        return pl.pallas_call(
            kernel,
            out_shape=jax.ShapeDtypeStruct((B, 1, t_out), jnp.float32),
            grid_spec=pltpu.PrefetchScalarGridSpec(
                num_scalar_prefetch=0,
                grid=(B,),
                in_specs=in_specs,
                out_specs=pl.BlockSpec((1, 1, t_out), lambda i: (i, 0, 0)),
                scratch_shapes=[pltpu.VMEM((32, scratch_w), jnp.float32)],
            ),
            compiler_params=pltpu.CompilerParams(
                dimension_semantics=("parallel",)),
        )(x, spk, w_slab, b_slab, e_slab)

    return fwd


# ----------------------------------- main ------------------------------------
if __name__ == "__main__":
    key = jax.random.PRNGKey(0)
    kp, kx, ks = jax.random.split(key, 3)

    B, T0 = 2, 32                       # T_out = 32 * prod(RATIOS) = 128 lanes
    plan, w_slab, b_slab, e_slab = init_params(kp, T0)

    x = jax.random.normal(kx, (B, BOTTLENECK, T0), jnp.float32)   # bottleneck
    spk_emb = jax.random.normal(ks, (B, N_SPK, 1), jnp.float32)   # speaker emb

    decoder = make_decoder(plan, T0)
    y = jax.block_until_ready(decoder(w_slab, b_slab, e_slab, x, spk_emb))

    hop = 1
    for r in RATIOS:
        hop *= r
    assert y.shape == (B, 1, T0 * hop), y.shape
    assert bool(jnp.all(jnp.isfinite(y)))
    assert bool(jnp.all(jnp.abs(y) <= 1.0 + 1e-5))   # tanh-bounded waveform
    print("KERNEL_OK")
</pallas_src>

<mosaic_0001>
module attributes {stable_mosaic.version = 11 : i64} {
  func.func @kernel(%arg0: i32, %arg1: memref<1x4x32xf32, #tpu.memory_space<vmem>>, %arg2: memref<1x16x1xf32, #tpu.memory_space<vmem>>, %arg3: memref<53x32x32xbf16, #tpu.memory_space<vmem>>, %arg4: memref<32x21xf32, #tpu.memory_space<vmem>>, %arg5: memref<2x64x128xbf16, #tpu.memory_space<vmem>>, %arg6: memref<1x1x128xf32, #tpu.memory_space<vmem>>, %arg7: memref<32x144xf32, #tpu.memory_space<vmem>>) attributes {dimension_semantics = [#tpu.dimension_semantics<parallel>], iteration_bounds = array<i64: 2>, scalar_prefetch = 0 : i64, scratch_operands = 1 : i64, tpu.core_type = #tpu.core_type<tc>, window_params = [{transform_indices = @transform_0, window_bounds = array<i64: 1, 4, 32>}, {transform_indices = @transform_1, window_bounds = array<i64: 1, 16, 1>}, {pipeline_mode = #tpu.pipeline_mode<synchronous>, transform_indices = @transform_2, window_bounds = array<i64: 53, 32, 32>}, {pipeline_mode = #tpu.pipeline_mode<synchronous>, transform_indices = @transform_3, window_bounds = array<i64: 32, 21>}, {pipeline_mode = #tpu.pipeline_mode<synchronous>, transform_indices = @transform_4, window_bounds = array<i64: 2, 64, 128>}, {transform_indices = @transform_5, window_bounds = array<i64: 1, 1, 128>}]} {
    %c0 = arith.constant 0 : index
    %c0_0 = arith.constant 0 : index
    %c0_1 = arith.constant 0 : index
    %0 = vector.load %arg1[%c0, %c0_0, %c0_1] : memref<1x4x32xf32, #tpu.memory_space<vmem>>, vector<1x4x32xf32>
    %1 = vector.shape_cast %0 : vector<1x4x32xf32> to vector<4x32xf32>
    %c0_2 = arith.constant 0 : index
    %c0_3 = arith.constant 0 : index
    %c0_4 = arith.constant 0 : index
    %2 = vector.load %arg2[%c0_2, %c0_3, %c0_4] : memref<1x16x1xf32, #tpu.memory_space<vmem>>, vector<1x16x1xf32>
    %3 = vector.shape_cast %2 : vector<1x16x1xf32> to vector<16x1xf32>
    %4 = arith.truncf %3 : vector<16x1xf32> to vector<16x1xbf16>
    %c21 = arith.constant 21 : index
    %c0_5 = arith.constant 0 : index
    %c0_6 = arith.constant 0 : index
    %5 = vector.load %arg3[%c21, %c0_5, %c0_6] : memref<53x32x32xbf16, #tpu.memory_space<vmem>>, vector<1x32x32xbf16>
    %6 = vector.shape_cast %5 : vector<1x32x32xbf16> to vector<32x32xbf16>
    %7 = vector.extract_strided_slice %6 {offsets = [0, 0], sizes = [16, 16], strides = [1, 1]} : vector<32x32xbf16> to vector<16x16xbf16>
    %cst = arith.constant dense<0.000000e+00> : vector<16x1xf32>
    %8 = tpu.matmul %7, %4, %cst {dimension_numbers = #tpu.dot_dimension_numbers<[1], [0], [0], [1], [0, 0, 1, 1], [], []>} : vector<16x16xbf16>, vector<16x1xbf16>, vector<16x1xf32> -> vector<16x1xf32>
    %c0_7 = arith.constant 0 : index
    %c4 = arith.constant 4 : index
    %9 = vector.load %arg4[%c0_7, %c4] : memref<32x21xf32, #tpu.memory_space<vmem>>, vector<16x1xf32>
    %10 = arith.addf %8, %9 : vector<16x1xf32>
    %c27 = arith.constant 27 : index
    %c0_8 = arith.constant 0 : index
    %c0_9 = arith.constant 0 : index
    %11 = vector.load %arg3[%c27, %c0_8, %c0_9] : memref<53x32x32xbf16, #tpu.memory_space<vmem>>, vector<1x32x32xbf16>
    %12 = vector.shape_cast %11 : vector<1x32x32xbf16> to vector<32x32xbf16>
    %13 = vector.extract_strided_slice %12 {offsets = [0, 0], sizes = [16, 16], strides = [1, 1]} : vector<32x32xbf16> to vector<16x16xbf16>
    %cst_10 = arith.constant dense<0.000000e+00> : vector<16x1xf32>
    %14 = tpu.matmul %13, %4, %cst_10 {dimension_numbers = #tpu.dot_dimension_numbers<[1], [0], [0], [1], [0, 0, 1, 1], [], []>} : vector<16x16xbf16>, vector<16x1xbf16>, vector<16x1xf32> -> vector<16x1xf32>
    %c0_11 = arith.constant 0 : index
    %c8 = arith.constant 8 : index
    %15 = vector.load %arg4[%c0_11, %c8] : memref<32x21xf32, #tpu.memory_space<vmem>>, vector<16x1xf32>
    %16 = arith.addf %14, %15 : vector<16x1xf32>
    %c37 = arith.constant 37 : index
    %c0_12 = arith.constant 0 : index
    %c0_13 = arith.constant 0 : index
    %17 = vector.load %arg3[%c37, %c0_12, %c0_13] : memref<53x32x32xbf16, #tpu.memory_space<vmem>>, vector<1x32x32xbf16>
    %18 = vector.shape_cast %17 : vector<1x32x32xbf16> to vector<32x32xbf16>
    %19 = vector.extract_strided_slice %18 {offsets = [0, 0], sizes = [8, 16], strides = [1, 1]} : vector<32x32xbf16> to vector<8x16xbf16>
    %cst_14 = arith.constant dense<0.000000e+00> : vector<8x1xf32>
    %20 = tpu.matmul %19, %4, %cst_14 {dimension_numbers = #tpu.dot_dimension_numbers<[1], [0], [0], [1], [0, 0, 1, 1], [], []>} : vector<8x16xbf16>, vector<16x1xbf16>, vector<8x1xf32> -> vector<8x1xf32>
    %c0_15 = arith.constant 0 : index
    %c13 = arith.constant 13 : index
    %21 = vector.load %arg4[%c0_15, %c13] : memref<32x21xf32, #tpu.memory_space<vmem>>, vector<8x1xf32>
    %22 = arith.addf %20, %21 : vector<8x1xf32>
    %c43 = arith.constant 43 : index
    %c0_16 = arith.constant 0 : index
    %c0_17 = arith.constant 0 : index
    %23 = vector.load %arg3[%c43, %c0_16, %c0_17] : memref<53x32x32xbf16, #tpu.memory_space<vmem>>, vector<1x32x32xbf16>
    %24 = vector.shape_cast %23 : vector<1x32x32xbf16> to vector<32x32xbf16>
    %25 = vector.extract_strided_slice %24 {offsets = [0, 0], sizes = [8, 16], strides = [1, 1]} : vector<32x32xbf16> to vector<8x16xbf16>
    %cst_18 = arith.constant dense<0.000000e+00> : vector<8x1xf32>
    %26 = tpu.matmul %25, %4, %cst_18 {dimension_numbers = #tpu.dot_dimension_numbers<[1], [0], [0], [1], [0, 0, 1, 1], [], []>} : vector<8x16xbf16>, vector<16x1xbf16>, vector<8x1xf32> -> vector<8x1xf32>
    %c0_19 = arith.constant 0 : index
    %c17 = arith.constant 17 : index
    %27 = vector.load %arg4[%c0_19, %c17] : memref<32x21xf32, #tpu.memory_space<vmem>>, vector<8x1xf32>
    %28 = arith.addf %26, %27 : vector<8x1xf32>
    %c0_20 = arith.constant 0 : index
    %c8_21 = arith.constant 8 : index
    %29 = vector.load %arg7[%c0_20, %c8_21] : memref<32x144xf32, #tpu.memory_space<vmem>>, vector<4x32xf32>
    tpu.vector_store %arg7[%c0_20, %c8_21], %1 {strides = array<i32>} : memref<32x144xf32, #tpu.memory_space<vmem>>, vector<4x32xf32>,
    %30 = vector.extract_strided_slice %1 {offsets = [0, 1], sizes = [4, 1], strides = [1, 1]} : vector<4x32xf32> to vector<4x1xf32>
    %31 = vector.extract_strided_slice %1 {offsets = [0, 30], sizes = [4, 1], strides = [1, 1]} : vector<4x32xf32> to vector<4x1xf32>
    %c0_22 = arith.constant 0 : index
    %c7 = arith.constant 7 : index
    %32 = vector.load %arg7[%c0_22, %c7] : memref<32x144xf32, #tpu.memory_space<vmem>>, vector<4x1xf32>
    tpu.vector_store %arg7[%c0_22, %c7], %30 {strides = array<i32>} : memref<32x144xf32, #tpu.memory_space<vmem>>, vector<4x1xf32>,
    %c0_23 = arith.constant 0 : index
    %c40 = arith.constant 40 : index
    %33 = vector.load %arg7[%c0_23, %c40] : memref<32x144xf32, #tpu.memory_space<vmem>>, vector<4x1xf32>
    tpu.vector_store %arg7[%c0_23, %c40], %31 {strides = array<i32>} : memref<32x144xf32, #tpu.memory_space<vmem>>, vector<4x1xf32>,
    %34 = vector.extract_strided_slice %1 {offsets = [0, 2], sizes = [4, 1], strides = [1, 1]} : vector<4x32xf32> to vector<4x1xf32>
    %35 = vector.extract_strided_slice %1 {offsets = [0, 29], sizes = [4, 1], strides = [1, 1]} : vector<4x32xf32> to vector<4x1xf32>
    %c0_24 = arith.constant 0 : index
    %c6 = arith.constant 6 : index
    %36 = vector.load %arg7[%c0_24, %c6] : memref<32x144xf32, #tpu.memory_space<vmem>>, vector<4x1xf32>
    tpu.vector_store %arg7[%c0_24, %c6], %34 {strides = array<i32>} : memref<32x144xf32, #tpu.memory_space<vmem>>, vector<4x1xf32>,
    %c0_25 = arith.constant 0 : index
    %c41 = arith.constant 41 : index
    %37 = vector.load %arg7[%c0_25, %c41] : memref<32x144xf32, #tpu.memory_space<vmem>>, vector<4x1xf32>
    tpu.vector_store %arg7[%c0_25, %c41], %35 {strides = array<i32>} : memref<32x144xf32, #tpu.memory_space<vmem>>, vector<4x1xf32>,
    %38 = vector.extract_strided_slice %1 {offsets = [0, 3], sizes = [4, 1], strides = [1, 1]} : vector<4x32xf32> to vector<4x1xf32>
    %39 = vector.extract_strided_slice %1 {offsets = [0, 28], sizes = [4, 1], strides = [1, 1]} : vector<4x32xf32> to vector<4x1xf32>
    %c0_26 = arith.constant 0 : index
    %c5 = arith.constant 5 : index
    %40 = vector.load %arg7[%c0_26, %c5] : memref<32x144xf32, #tpu.memory_space<vmem>>, vector<4x1xf32>
    tpu.vector_store %arg7[%c0_26, %c5], %38 {strides = array<i32>} : memref<32x144xf32, #tpu.memory_space<vmem>>, vector<4x1xf32>,
    %c0_27 = arith.constant 0 : index
    %c42 = arith.constant 42 : index
    %41 = vector.load %arg7[%c0_27, %c42] : memref<32x144xf32, #tpu.memory_space<vmem>>, vector<4x1xf32>
    tpu.vector_store %arg7[%c0_27, %c42], %39 {strides = array<i32>} : memref<32x144xf32, #tpu.memory_space<vmem>>, vector<4x1xf32>,
    %c0_28 = arith.constant 0 : index
    %c5_29 = arith.constant 5 : index
    %42 = vector.load %arg7[%c0_28, %c5_29] : memref<32x144xf32, #tpu.memory_space<vmem>>, vector<4x32xf32>
    %43 = arith.truncf %42 : vector<4x32xf32> to vector<4x32xbf16>
    %c0_30 = arith.constant 0 : index
    %c0_31 = arith.constant 0 : index
    %c0_32 = arith.constant 0 : index
    %44 = vector.load %arg3[%c0_30, %c0_31, %c0_32] : memref<53x32x32xbf16, #tpu.memory_space<vmem>>, vector<1x32x32xbf16>
    %45 = vector.shape_cast %44 : vector<1x32x32xbf16> to vector<32x32xbf16>
    %46 = vector.extract_strided_slice %45 {offsets = [0, 0], sizes = [32, 4], strides = [1, 1]} : vector<32x32xbf16> to vector<32x4xbf16>
    %cst_33 = arith.constant dense<0.000000e+00> : vector<32x32xf32>
    %47 = tpu.matmul %46, %43, %cst_33 {dimension_numbers = #tpu.dot_dimension_numbers<[1], [0], [0], [1], [0, 0, 1, 1], [], []>} : vector<32x4xbf16>, vector<4x32xbf16>, vector<32x32xf32> -> vector<32x32xf32>
    %c0_34 = arith.constant 0 : index
    %c6_35 = arith.constant 6 : index
    %48 = vector.load %arg7[%c0_34, %c6_35] : memref<32x144xf32, #tpu.memory_space<vmem>>, vector<4x32xf32>
    %49 = arith.truncf %48 : vector<4x32xf32> to vector<4x32xbf16>
    %c1 = arith.constant 1 : index
    %c0_36 = arith.constant 0 : index
    %c0_37 = arith.constant 0 : index
    %50 = vector.load %arg3[%c1, %c0_36, %c0_37] : memref<53x32x32xbf16, #tpu.memory_space<vmem>>, vector<1x32x32xbf16>
    %51 = vector.shape_cast %50 : vector<1x32x32xbf16> to vector<32x32xbf16>
    %52 = vector.extract_strided_slice %51 {offsets = [0, 0], sizes = [32, 4], strides = [1, 1]} : vector<32x32xbf16> to vector<32x4xbf16>
    %cst_38 = arith.constant dense<0.000000e+00> : vector<32x32xf32>
    %53 = tpu.matmul %52, %49, %cst_38 {dimension_numbers = #tpu.dot_dimension_numbers<[1], [0], [0], [1], [0, 0, 1, 1], [], []>} : vector<32x4xbf16>, vector<4x32xbf16>, vector<32x32xf32> -> vector<32x32xf32>
    %54 = arith.addf %47, %53 : vector<32x32xf32>
    %c0_39 = arith.constant 0 : index
    %c7_40 = arith.constant 7 : index
    %55 = vector.load %arg7[%c0_39, %c7_40] : memref<32x144xf32, #tpu.memory_space<vmem>>, vector<4x32xf32>
    %56 = arith.truncf %55 : vector<4x32xf32> to vector<4x32xbf16>
    %c2 = arith.constant 2 : index
    %c0_41 = arith.constant 0 : index
    %c0_42 = arith.constant 0 : index
    %57 = vector.load %arg3[%c2, %c0_41, %c0_42] : memref<53x32x32xbf16, #tpu.memory_space<vmem>>, vector<1x32x32xbf16>
    %58 = vector.shape_cast %57 : vector<1x32x32xbf16> to vector<32x32xbf16>
    %59 = vector.extract_strided_slice %58 {offsets = [0, 0], sizes = [32, 4], strides = [1, 1]} : vector<32x32xbf16> to vector<32x4xbf16>
    %cst_43 = arith.constant dense<0.000000e+00> : vector<32x32xf32>
    %60 = tpu.matmul %59, %56, %cst_43 {dimension_numbers = #tpu.dot_dimension_numbers<[1], [0], [0], [1], [0, 0, 1, 1], [], []>} : vector<32x4xbf16>, vector<4x32xbf16>, vector<32x32xf32> -> vector<32x32xf32>
    %61 = arith.addf %54, %60 : vector<32x32xf32>
    %c0_44 = arith.constant 0 : index
    %c8_45 = arith.constant 8 : index
    %62 = vector.load %arg7[%c0_44, %c8_45] : memref<32x144xf32, #tpu.memory_space<vmem>>, vector<4x32xf32>
    %63 = arith.truncf %62 : vector<4x32xf32> to vector<4x32xbf16>
    %c3 = arith.constant 3 : index
    %c0_46 = arith.constant 0 : index
    %c0_47 = arith.constant 0 : index
    %64 = vector.load %arg3[%c3, %c0_46, %c0_47] : memref<53x32x32xbf16, #tpu.memory_space<vmem>>, vector<1x32x32xbf16>
    %65 = vector.shape_cast %64 : vector<1x32x32xbf16> to vector<32x32xbf16>
    %66 = vector.extract_strided_slice %65 {offsets = [0, 0], sizes = [32, 4], strides = [1, 1]} : vector<32x32xbf16> to vector<32x4xbf16>
    %cst_48 = arith.constant dense<0.000000e+00> : vector<32x32xf32>
    %67 = tpu.matmul %66, %63, %cst_48 {dimension_numbers = #tpu.dot_dimension_numbers<[1], [0], [0], [1], [0, 0, 1, 1], [], []>} : vector<32x4xbf16>, vector<4x32xbf16>, vector<32x32xf32> -> vector<32x32xf32>
    %68 = arith.addf %61, %67 : vector<32x32xf32>
    %c0_49 = arith.constant 0 : index
    %c9 = arith.constant 9 : index
    %69 = vector.load %arg7[%c0_49, %c9] : memref<32x144xf32, #tpu.memory_space<vmem>>, vector<4x32xf32>
    %70 = arith.truncf %69 : vector<4x32xf32> to vector<4x32xbf16>
    %c4_50 = arith.constant 4 : index
    %c0_51 = arith.constant 0 : index
    %c0_52 = arith.constant 0 : index
    %71 = vector.load %arg3[%c4_50, %c0_51, %c0_52] : memref<53x32x32xbf16, #tpu.memory_space<vmem>>, vector<1x32x32xbf16>
    %72 = vector.shape_cast %71 : vector<1x32x32xbf16> to vector<32x32xbf16>
    %73 = vector.extract_strided_slice %72 {offsets = [0, 0], sizes = [32, 4], strides = [1, 1]} : vector<32x32xbf16> to vector<32x4xbf16>
    %cst_53 = arith.constant dense<0.000000e+00> : vector<32x32xf32>
    %74 = tpu.matmul %73, %70, %cst_53 {dimension_numbers = #tpu.dot_dimension_numbers<[1], [0], [0], [1], [0, 0, 1, 1], [], []>} : vector<32x4xbf16>, vector<4x32xbf16>, vector<32x32xf32> -> vector<32x32xf32>
    %75 = arith.addf %68, %74 : vector<32x32xf32>
    %c0_54 = arith.constant 0 : index
    %c10 = arith.constant 10 : index
    %76 = vector.load %arg7[%c0_54, %c10] : memref<32x144xf32, #tpu.memory_space<vmem>>, vector<4x32xf32>
    %77 = arith.truncf %76 : vector<4x32xf32> to vector<4x32xbf16>
    %c5_55 = arith.constant 5 : index
    %c0_56 = arith.constant 0 : index
    %c0_57 = arith.constant 0 : index
    %78 = vector.load %arg3[%c5_55, %c0_56, %c0_57] : memref<53x32x32xbf16, #tpu.memory_space<vmem>>, vector<1x32x32xbf16>
    %79 = vector.shape_cast %78 : vector<1x32x32xbf16> to vector<32x32xbf16>
    %80 = vector.extract_strided_slice %79 {offsets = [0, 0], sizes = [32, 4], strides = [1, 1]} : vector<32x32xbf16> to vector<32x4xbf16>
    %cst_58 = arith.constant dense<0.000000e+00> : vector<32x32xf32>
    %81 = tpu.matmul %80, %77, %cst_58 {dimension_numbers = #tpu.dot_dimension_numbers<[1], [0], [0], [1], [0, 0, 1, 1], [], []>} : vector<32x4xbf16>, vector<4x32xbf16>, vector<32x32xf32> -> vector<32x32xf32>
    %82 = arith.addf %75, %81 : vector<32x32xf32>
    %c0_59 = arith.constant 0 : index
    %c11 = arith.constant 11 : index
    %83 = vector.load %arg7[%c0_59, %c11] : memref<32x144xf32, #tpu.memory_space<vmem>>, vector<4x32xf32>
    %84 = arith.truncf %83 : vector<4x32xf32> to vector<4x32xbf16>
    %c6_60 = arith.constant 6 : index
    %c0_61 = arith.constant 0 : index
    %c0_62 = arith.constant 0 : index
    %85 = vector.load %arg3[%c6_60, %c0_61, %c0_62] : memref<53x32x32xbf16, #tpu.memory_space<vmem>>, vector<1x32x32xbf16>
    %86 = vector.shape_cast %85 : vector<1x32x32xbf16> to vector<32x32xbf16>
    %87 = vector.extract_strided_slice %86 {offsets = [0, 0], sizes = [32, 4], strides = [1, 1]} : vector<32x32xbf16> to vector<32x4xbf16>
    %cst_63 = arith.constant dense<0.000000e+00> : vector<32x32xf32>
    %88 = tpu.matmul %87, %84, %cst_63 {dimension_numbers = #tpu.dot_dimension_numbers<[1], [0], [0], [1], [0, 0, 1, 1], [], []>} : vector<32x4xbf16>, vector<4x32xbf16>, vector<32x32xf32> -> vector<32x32xf32>
    %89 = arith.addf %82, %88 : vector<32x32xf32>
    %c0_64 = arith.constant 0 : index
    %c0_65 = arith.constant 0 : index
    %90 = vector.load %arg4[%c0_64, %c0_65] : memref<32x21xf32, #tpu.memory_space<vmem>>, vector<32x1xf32>
    %91 = vector.broadcast %90 : vector<32x1xf32> to vector<32x32xf32>
    %92 = arith.addf %89, %91 : vector<32x32xf32>
    %cst_66 = arith.constant 0.707106769 : f32
    %93 = vector.broadcast %cst_66 : f32 to vector<32x32xf32>
    %94 = arith.mulf %92, %93 : vector<32x32xf32>
    %cst_67 = arith.constant 0.000000e+00 : f32
    %95 = vector.broadcast %cst_67 : f32 to vector<32x32xf32>
    %96 = arith.cmpf oge, %94, %95 : vector<32x32xf32>
    %cst_68 = arith.constant 1.000000e+00 : f32
    %cst_69 = arith.constant -1.000000e+00 : f32
    %97 = vector.broadcast %cst_68 : f32 to vector<32x32xf32>
    %98 = vector.broadcast %cst_69 : f32 to vector<32x32xf32>
    %99 = arith.select %96, %97, %98 : vector<32x32xi1>, vector<32x32xf32>
    %100 = math.absf %94 : vector<32x32xf32>
    %cst_70 = arith.constant 0.327591091 : f32
    %101 = vector.broadcast %cst_70 : f32 to vector<32x32xf32>
    %102 = arith.mulf %101, %100 : vector<32x32xf32>
    %cst_71 = arith.constant 1.000000e+00 : f32
    %103 = vector.broadcast %cst_71 : f32 to vector<32x32xf32>
    %104 = arith.addf %103, %102 : vector<32x32xf32>
    %cst_72 = arith.constant 1.000000e+00 : f32
    %105 = vector.broadcast %cst_72 : f32 to vector<32x32xf32>
    %106 = arith.divf %105, %104 : vector<32x32xf32>
    %cst_73 = arith.constant 1.06140542 : f32
    %107 = vector.broadcast %cst_73 : f32 to vector<32x32xf32>
    %108 = arith.mulf %107, %106 : vector<32x32xf32>
    %cst_74 = arith.constant -1.45315206 : f32
    %109 = vector.broadcast %cst_74 : f32 to vector<32x32xf32>
    %110 = arith.addf %108, %109 : vector<32x32xf32>
    %111 = arith.mulf %110, %106 : vector<32x32xf32>
    %cst_75 = arith.constant 1.42141378 : f32
    %112 = vector.broadcast %cst_75 : f32 to vector<32x32xf32>
    %113 = arith.addf %111, %112 : vector<32x32xf32>
    %114 = arith.mulf %113, %106 : vector<32x32xf32>
    %cst_76 = arith.constant -0.284496725 : f32
    %115 = vector.broadcast %cst_76 : f32 to vector<32x32xf32>
    %116 = arith.addf %114, %115 : vector<32x32xf32>
    %117 = arith.mulf %116, %106 : vector<32x32xf32>
    %cst_77 = arith.constant 0.254829586 : f32
    %118 = vector.broadcast %cst_77 : f32 to vector<32x32xf32>
    %119 = arith.addf %117, %118 : vector<32x32xf32>
    %120 = arith.mulf %119, %106 : vector<32x32xf32>
    %cst_78 = arith.constant 0.000000e+00 : f32
    %121 = vector.broadcast %cst_78 : f32 to vector<32x32xf32>
    %122 = arith.subf %121, %100 : vector<32x32xf32>
    %123 = arith.mulf %122, %100 : vector<32x32xf32>
    %124 = math.exp %123 : vector<32x32xf32>
    %125 = arith.mulf %120, %124 : vector<32x32xf32>
    %cst_79 = arith.constant 1.000000e+00 : f32
    %126 = vector.broadcast %cst_79 : f32 to vector<32x32xf32>
    %127 = arith.subf %126, %125 : vector<32x32xf32>
    %128 = arith.mulf %99, %127 : vector<32x32xf32>
    %cst_80 = arith.constant 5.000000e-01 : f32
    %129 = vector.broadcast %cst_80 : f32 to vector<32x32xf32>
    %130 = arith.mulf %129, %92 : vector<32x32xf32>
    %cst_81 = arith.constant 1.000000e+00 : f32
    %131 = vector.broadcast %cst_81 : f32 to vector<32x32xf32>
    %132 = arith.addf %131, %128 : vector<32x32xf32>
    %133 = arith.mulf %130, %132 : vector<32x32xf32>
    %c0_82 = arith.constant 0 : index
    %c8_83 = arith.constant 8 : index
    %134 = vector.load %arg7[%c0_82, %c8_83] : memref<32x144xf32, #tpu.memory_space<vmem>>, vector<32x32xf32>
    tpu.vector_store %arg7[%c0_82, %c8_83], %133 {strides = array<i32>} : memref<32x144xf32, #tpu.memory_space<vmem>>, vector<32x32xf32>,
    %135 = vector.extract_strided_slice %133 {offsets = [0, 1], sizes = [32, 1], strides = [1, 1]} : vector<32x32xf32> to vector<32x1xf32>
    %136 = vector.extract_strided_slice %133 {offsets = [0, 30], sizes = [32, 1], strides = [1, 1]} : vector<32x32xf32> to vector<32x1xf32>
    %c0_84 = arith.constant 0 : index
    %c7_85 = arith.constant 7 : index
    %137 = vector.load %arg7[%c0_84, %c7_85] : memref<32x144xf32, #tpu.memory_space<vmem>>, vector<32x1xf32>
    tpu.vector_store %arg7[%c0_84, %c7_85], %135 {strides = array<i32>} : memref<32x144xf32, #tpu.memory_space<vmem>>, vector<32x1xf32>,
    %c0_86 = arith.constant 0 : index
    %c40_87 = arith.constant 40 : index
    %138 = vector.load %arg7[%c0_86, %c40_87] : memref<32x144xf32, #tpu.memory_space<vmem>>, vector<32x1xf32>
    tpu.vector_store %arg7[%c0_86, %c40_87], %136 {strides = array<i32>} : memref<32x144xf32, #tpu.memory_space<vmem>>, vector<32x1xf32>,
    %139 = vector.extract_strided_slice %133 {offsets = [0, 2], sizes = [32, 1], strides = [1, 1]} : vector<32x32xf32> to vector<32x1xf32>
    %140 = vector.extract_strided_slice %133 {offsets = [0, 29], sizes = [32, 1], strides = [1, 1]} : vector<32x32xf32> to vector<32x1xf32>
    %c0_88 = arith.constant 0 : index
    %c6_89 = arith.constant 6 : index
    %141 = vector.load %arg7[%c0_88, %c6_89] : memref<32x144xf32, #tpu.memory_space<vmem>>, vector<32x1xf32>
    tpu.vector_store %arg7[%c0_88, %c6_89], %139 {strides = array<i32>} : memref<32x144xf32, #tpu.memory_space<vmem>>, vector<32x1xf32>,
    %c0_90 = arith.constant 0 : index
    %c41_91 = arith.constant 41 : index
    %142 = vector.load %arg7[%c0_90, %c41_91] : memref<32x144xf32, #tpu.memory_space<vmem>>, vector<32x1xf32>
    tpu.vector_store %arg7[%c0_90, %c41_91], %140 {strides = array<i32>} : memref<32x144xf32, #tpu.memory_space<vmem>>, vector<32x1xf32>,
    %143 = vector.extract_strided_slice %133 {offsets = [0, 3], sizes = [32, 1], strides = [1, 1]} : vector<32x32xf32> to vector<32x1xf32>
    %144 = vector.extract_strided_slice %133 {offsets = [0, 28], sizes = [32, 1], strides = [1, 1]} : vector<32x32xf32> to vector<32x1xf32>
    %c0_92 = arith.constant 0 : index
    %c5_93 = arith.constant 5 : index
    %145 = vector.load %arg7[%c0_92, %c5_93] : memref<32x144xf32, #tpu.memory_space<vmem>>, vector<32x1xf32>
    tpu.vector_store %arg7[%c0_92, %c5_93], %143 {strides = array<i32>} : memref<32x144xf32, #tpu.memory_space<vmem>>, vector<32x1xf32>,
    %c0_94 = arith.constant 0 : index
    %c42_95 = arith.constant 42 : index
    %146 = vector.load %arg7[%c0_94, %c42_95] : memref<32x144xf32, #tpu.memory_space<vmem>>, vector<32x1xf32>
    tpu.vector_store %arg7[%c0_94, %c42_95], %144 {strides = array<i32>} : memref<32x144xf32, #tpu.memory_space<vmem>>, vector<32x1xf32>,
    %c0_96 = arith.constant 0 : index
    %c5_97 = arith.constant 5 : index
    %147 = vector.load %arg7[%c0_96, %c5_97] : memref<32x144xf32, #tpu.memory_space<vmem>>, vector<32x32xf32>
    %148 = arith.truncf %147 : vector<32x32xf32> to vector<32x32xbf16>
    %c7_98 = arith.constant 7 : index
    %c0_99 = arith.constant 0 : index
    %c0_100 = arith.constant 0 : index
    %149 = vector.load %arg3[%c7_98, %c0_99, %c0_100] : memref<53x32x32xbf16, #tpu.memory_space<vmem>>, vector<1x32x32xbf16>
    %150 = vector.shape_cast %149 : vector<1x32x32xbf16> to vector<32x32xbf16>
    %cst_101 = arith.constant dense<0.000000e+00> : vector<32x32xf32>
    %151 = tpu.matmul %150, %148, %cst_101 {dimension_numbers = #tpu.dot_dimension_numbers<[1], [0], [0], [1], [0, 0, 1, 1], [], []>} : vector<32x32xbf16>, vector<32x32xbf16>, vector<32x32xf32> -> vector<32x32xf32>
    %c0_102 = arith.constant 0 : index
    %c6_103 = arith.constant 6 : index
    %152 = vector.load %arg7[%c0_102, %c6_103] : memref<32x144xf32, #tpu.memory_space<vmem>>, vector<32x32xf32>
    %153 = arith.truncf %152 : vector<32x32xf32> to vector<32x32xbf16>
    %c8_104 = arith.constant 8 : index
    %c0_105 = arith.constant 0 : index
    %c0_106 = arith.constant 0 : index
    %154 = vector.load %arg3[%c8_104, %c0_105, %c0_106] : memref<53x32x32xbf16, #tpu.memory_space<vmem>>, vector<1x32x32xbf16>
    %155 = vector.shape_cast %154 : vector<1x32x32xbf16> to vector<32x32xbf16>
    %cst_107 = arith.constant dense<0.000000e+00> : vector<32x32xf32>
    %156 = tpu.matmul %155, %153, %cst_107 {dimension_numbers = #tpu.dot_dimension_numbers<[1], [0], [0], [1], [0, 0, 1, 1], [], []>} : vector<32x32xbf16>, vector<32x32xbf16>, vector<32x32xf32> -> vector<32x32xf32>
    %157 = arith.addf %151, %156 : vector<32x32xf32>
    %c0_108 = arith.constant 0 : index
    %c7_109 = arith.constant 7 : index
    %158 = vector.load %arg7[%c0_108, %c7_109] : memref<32x144xf32, #tpu.memory_space<vmem>>, vector<32x32xf32>
    %159 = arith.truncf %158 : vector<32x32xf32> to vector<32x32xbf16>
    %c9_110 = arith.constant 9 : index
    %c0_111 = arith.constant 0 : index
    %c0_112 = arith.constant 0 : index
    %160 = vector.load %arg3[%c9_110, %c0_111, %c0_112] : memref<53x32x32xbf16, #tpu.memory_space<vmem>>, vector<1x32x32xbf16>
    %161 = vector.shape_cast %160 : vector<1x32x32xbf16> to vector<32x32xbf16>
    %cst_113 = arith.constant dense<0.000000e+00> : vector<32x32xf32>
    %162 = tpu.matmul %161, %159, %cst_113 {dimension_numbers = #tpu.dot_dimension_numbers<[1], [0], [0], [1], [0, 0, 1, 1], [], []>} : vector<32x32xbf16>, vector<32x32xbf16>, vector<32x32xf32> -> vector<32x32xf32>
    %163 = arith.addf %157, %162 : vector<32x32xf32>
    %c0_114 = arith.constant 0 : index
    %c8_115 = arith.constant 8 : index
    %164 = vector.load %arg7[%c0_114, %c8_115] : memref<32x144xf32, #tpu.memory_space<vmem>>, vector<32x32xf32>
    %165 = arith.truncf %164 : vector<32x32xf32> to vector<32x32xbf16>
    %c10_116 = arith.constant 10 : index
    %c0_117 = arith.constant 0 : index
    %c0_118 = arith.constant 0 : index
    %166 = vector.load %arg3[%c10_116, %c0_117, %c0_118] : memref<53x32x32xbf16, #tpu.memory_space<vmem>>, vector<1x32x32xbf16>
    %167 = vector.shape_cast %166 : vector<1x32x32xbf16> to vector<32x32xbf16>
    %cst_119 = arith.constant dense<0.000000e+00> : vector<32x32xf32>
    %168 = tpu.matmul %167, %165, %cst_119 {dimension_numbers = #tpu.dot_dimension_numbers<[1], [0], [0], [1], [0, 0, 1, 1], [], []>} : vector<32x32xbf16>, vector<32x32xbf16>, vector<32x32xf32> -> vector<32x32xf32>
    %169 = arith.addf %163, %168 : vector<32x32xf32>
    %c0_120 = arith.constant 0 : index
    %c9_121 = arith.constant 9 : index
    %170 = vector.load %arg7[%c0_120, %c9_121] : memref<32x144xf32, #tpu.memory_space<vmem>>, vector<32x32xf32>
    %171 = arith.truncf %170 : vector<32x32xf32> to vector<32x32xbf16>
    %c11_122 = arith.constant 11 : index
    %c0_123 = arith.constant 0 : index
    %c0_124 = arith.constant 0 : index
    %172 = vector.load %arg3[%c11_122, %c0_123, %c0_124] : memref<53x32x32xbf16, #tpu.memory_space<vmem>>, vector<1x32x32xbf16>
    %173 = vector.shape_cast %172 : vector<1x32x32xbf16> to vector<32x32xbf16>
    %cst_125 = arith.constant dense<0.000000e+00> : vector<32x32xf32>
    %174 = tpu.matmul %173, %171, %cst_125 {dimension_numbers = #tpu.dot_dimension_numbers<[1], [0], [0], [1], [0, 0, 1, 1], [], []>} : vector<32x32xbf16>, vector<32x32xbf16>, vector<32x32xf32> -> vector<32x32xf32>
    %175 = arith.addf %169, %174 : vector<32x32xf32>
    %c0_126 = arith.constant 0 : index
    %c10_127 = arith.constant 10 : index
    %176 = vector.load %arg7[%c0_126, %c10_127] : memref<32x144xf32, #tpu.memory_space<vmem>>, vector<32x32xf32>
    %177 = arith.truncf %176 : vector<32x32xf32> to vector<32x32xbf16>
    %c12 = arith.constant 12 : index
    %c0_128 = arith.constant 0 : index
    %c0_129 = arith.constant 0 : index
    %178 = vector.load %arg3[%c12, %c0_128, %c0_129] : memref<53x32x32xbf16, #tpu.memory_space<vmem>>, vector<1x32x32xbf16>
    %179 = vector.shape_cast %178 : vector<1x32x32xbf16> to vector<32x32xbf16>
    %cst_130 = arith.constant dense<0.000000e+00> : vector<32x32xf32>
    %180 = tpu.matmul %179, %177, %cst_130 {dimension_numbers = #tpu.dot_dimension_numbers<[1], [0], [0], [1], [0, 0, 1, 1], [], []>} : vector<32x32xbf16>, vector<32x32xbf16>, vector<32x32xf32> -> vector<32x32xf32>
    %181 = arith.addf %175, %180 : vector<32x32xf32>
    %c0_131 = arith.constant 0 : index
    %c11_132 = arith.constant 11 : index
    %182 = vector.load %arg7[%c0_131, %c11_132] : memref<32x144xf32, #tpu.memory_space<vmem>>, vector<32x32xf32>
    %183 = arith.truncf %182 : vector<32x32xf32> to vector<32x32xbf16>
    %c13_133 = arith.constant 13 : index
    %c0_134 = arith.constant 0 : index
    %c0_135 = arith.constant 0 : index
    %184 = vector.load %arg3[%c13_133, %c0_134, %c0_135] : memref<53x32x32xbf16, #tpu.memory_space<vmem>>, vector<1x32x32xbf16>
    %185 = vector.shape_cast %184 : vector<1x32x32xbf16> to vector<32x32xbf16>
    %cst_136 = arith.constant dense<0.000000e+00> : vector<32x32xf32>
    %186 = tpu.matmul %185, %183, %cst_136 {dimension_numbers = #tpu.dot_dimension_numbers<[1], [0], [0], [1], [0, 0, 1, 1], [], []>} : vector<32x32xbf16>, vector<32x32xbf16>, vector<32x32xf32> -> vector<32x32xf32>
    %187 = arith.addf %181, %186 : vector<32x32xf32>
    %c0_137 = arith.constant 0 : index
    %c1_138 = arith.constant 1 : index
    %188 = vector.load %arg4[%c0_137, %c1_138] : memref<32x21xf32, #tpu.memory_space<vmem>>, vector<32x1xf32>
    %189 = vector.broadcast %188 : vector<32x1xf32> to vector<32x32xf32>
    %190 = arith.addf %187, %189 : vector<32x32xf32>
    %cst_139 = arith.constant 0.707106769 : f32
    %191 = vector.broadcast %cst_139 : f32 to vector<32x32xf32>
    %192 = arith.mulf %190, %191 : vector<32x32xf32>
    %cst_140 = arith.constant 0.000000e+00 : f32
    %193 = vector.broadcast %cst_140 : f32 to vector<32x32xf32>
    %194 = arith.cmpf oge, %192, %193 : vector<32x32xf32>
    %cst_141 = arith.constant 1.000000e+00 : f32
    %cst_142 = arith.constant -1.000000e+00 : f32
    %195 = vector.broadcast %cst_141 : f32 to vector<32x32xf32>
    %196 = vector.broadcast %cst_142 : f32 to vector<32x32xf32>
    %197 = arith.select %194, %195, %196 : vector<32x32xi1>, vector<32x32xf32>
    %198 = math.absf %192 : vector<32x32xf32>
    %cst_143 = arith.constant 0.327591091 : f32
    %199 = vector.broadcast %cst_143 : f32 to vector<32x32xf32>
    %200 = arith.mulf %199, %198 : vector<32x32xf32>
    %cst_144 = arith.constant 1.000000e+00 : f32
    %201 = vector.broadcast %cst_144 : f32 to vector<32x32xf32>
    %202 = arith.addf %201, %200 : vector<32x32xf32>
    %cst_145 = arith.constant 1.000000e+00 : f32
    %203 = vector.broadcast %cst_145 : f32 to vector<32x32xf32>
    %204 = arith.divf %203, %202 : vector<32x32xf32>
    %cst_146 = arith.constant 1.06140542 : f32
    %205 = vector.broadcast %cst_146 : f32 to vector<32x32xf32>
    %206 = arith.mulf %205, %204 : vector<32x32xf32>
    %cst_147 = arith.constant -1.45315206 : f32
    %207 = vector.broadcast %cst_147 : f32 to vector<32x32xf32>
    %208 = arith.addf %206, %207 : vector<32x32xf32>
    %209 = arith.mulf %208, %204 : vector<32x32xf32>
    %cst_148 = arith.constant 1.42141378 : f32
    %210 = vector.broadcast %cst_148 : f32 to vector<32x32xf32>
    %211 = arith.addf %209, %210 : vector<32x32xf32>
    %212 = arith.mulf %211, %204 : vector<32x32xf32>
    %cst_149 = arith.constant -0.284496725 : f32
    %213 = vector.broadcast %cst_149 : f32 to vector<32x32xf32>
    %214 = arith.addf %212, %213 : vector<32x32xf32>
    %215 = arith.mulf %214, %204 : vector<32x32xf32>
    %cst_150 = arith.constant 0.254829586 : f32
    %216 = vector.broadcast %cst_150 : f32 to vector<32x32xf32>
    %217 = arith.addf %215, %216 : vector<32x32xf32>
    %218 = arith.mulf %217, %204 : vector<32x32xf32>
    %cst_151 = arith.constant 0.000000e+00 : f32
    %219 = vector.broadcast %cst_151 : f32 to vector<32x32xf32>
    %220 = arith.subf %219, %198 : vector<32x32xf32>
    %221 = arith.mulf %220, %198 : vector<32x32xf32>
    %222 = math.exp %221 : vector<32x32xf32>
    %223 = arith.mulf %218, %222 : vector<32x32xf32>
    %cst_152 = arith.constant 1.000000e+00 : f32
    %224 = vector.broadcast %cst_152 : f32 to vector<32x32xf32>
    %225 = arith.subf %224, %223 : vector<32x32xf32>
    %226 = arith.mulf %197, %225 : vector<32x32xf32>
    %cst_153 = arith.constant 5.000000e-01 : f32
    %227 = vector.broadcast %cst_153 : f32 to vector<32x32xf32>
    %228 = arith.mulf %227, %190 : vector<32x32xf32>
    %cst_154 = arith.constant 1.000000e+00 : f32
    %229 = vector.broadcast %cst_154 : f32 to vector<32x32xf32>
    %230 = arith.addf %229, %226 : vector<32x32xf32>
    %231 = arith.mulf %228, %230 : vector<32x32xf32>
    %c0_155 = arith.constant 0 : index
    %c8_156 = arith.constant 8 : index
    %232 = vector.load %arg7[%c0_155, %c8_156] : memref<32x144xf32, #tpu.memory_space<vmem>>, vector<32x32xf32>
    tpu.vector_store %arg7[%c0_155, %c8_156], %231 {strides = array<i32>} : memref<32x144xf32, #tpu.memory_space<vmem>>, vector<32x32xf32>,
    %cst_157 = arith.constant 0.000000e+00 : f32
    %233 = vector.broadcast %cst_157 : f32 to vector<32x1xf32>
    %c0_158 = arith.constant 0 : index
    %c7_159 = arith.constant 7 : index
    %234 = vector.load %arg7[%c0_158, %c7_159] : memref<32x144xf32, #tpu.memory_space<vmem>>, vector<32x1xf32>
    tpu.vector_store %arg7[%c0_158, %c7_159], %233 {strides = array<i32>} : memref<32x144xf32, #tpu.memory_space<vmem>>, vector<32x1xf32>,
    %c0_160 = arith.constant 0 : index
    %c40_161 = arith.constant 40 : index
    %235 = vector.load %arg7[%c0_160, %c40_161] : memref<32x144xf32, #tpu.memory_space<vmem>>, vector<32x1xf32>
    tpu.vector_store %arg7[%c0_160, %c40_161], %233 {strides = array<i32>} : memref<32x144xf32, #tpu.memory_space<vmem>>, vector<32x1xf32>,
    %c0_162 = arith.constant 0 : index
    %c8_163 = arith.constant 8 : index
    %236 = vector.load %arg7[%c0_162, %c8_163] : memref<32x144xf32, #tpu.memory_space<vmem>>, vector<32x32xf32>
    %237 = arith.truncf %236 : vector<32x32xf32> to vector<32x32xbf16>
    %c14 = arith.constant 14 : index
    %c0_164 = arith.constant 0 : index
    %c0_165 = arith.constant 0 : index
    %238 = vector.load %arg3[%c14, %c0_164, %c0_165] : memref<53x32x32xbf16, #tpu.memory_space<vmem>>, vector<1x32x32xbf16>
    %239 = vector.shape_cast %238 : vector<1x32x32xbf16> to vector<32x32xbf16>
    %240 = vector.extract_strided_slice %239 {offsets = [0, 0], sizes = [16, 32], strides = [1, 1]} : vector<32x32xbf16> to vector<16x32xbf16>
    %cst_166 = arith.constant dense<0.000000e+00> : vector<16x32xf32>
    %241 = tpu.matmul %240, %237, %cst_166 {dimension_numbers = #tpu.dot_dimension_numbers<[1], [0], [0], [1], [0, 0, 1, 1], [], []>} : vector<16x32xbf16>, vector<32x32xbf16>, vector<16x32xf32> -> vector<16x32xf32>
    %c0_167 = arith.constant 0 : index
    %c7_168 = arith.constant 7 : index
    %242 = vector.load %arg7[%c0_167, %c7_168] : memref<32x144xf32, #tpu.memory_space<vmem>>, vector<32x32xf32>
    %243 = arith.truncf %242 : vector<32x32xf32> to vector<32x32xbf16>
    %c15 = arith.constant 15 : index
    %c0_169 = arith.constant 0 : index
    %c0_170 = arith.constant 0 : index
    %244 = vector.load %arg3[%c15, %c0_169, %c0_170] : memref<53x32x32xbf16, #tpu.memory_space<vmem>>, vector<1x32x32xbf16>
    %245 = vector.shape_cast %244 : vector<1x32x32xbf16> to vector<32x32xbf16>
    %246 = vector.extract_strided_slice %245 {offsets = [0, 0], sizes = [16, 32], strides = [1, 1]} : vector<32x32xbf16> to vector<16x32xbf16>
    %cst_171 = arith.constant dense<0.000000e+00> : vector<16x32xf32>
    %247 = tpu.matmul %246, %243, %cst_171 {dimension_numbers = #tpu.dot_dimension_numbers<[1], [0], [0], [1], [0, 0, 1, 1], [], []>} : vector<16x32xbf16>, vector<32x32xbf16>, vector<16x32xf32> -> vector<16x32xf32>
    %248 = arith.addf %241, %247 : vector<16x32xf32>
    %c0_172 = arith.constant 0 : index
    %c0_173 = arith.constant 0 : index
    %c0_174 = arith.constant 0 : index
    %249 = vector.load %arg5[%c0_172, %c0_173, %c0_174] : memref<2x64x128xbf16, #tpu.memory_space<vmem>>, vector<1x64x128xbf16>
    %250 = vector.shape_cast %249 : vector<1x64x128xbf16> to vector<64x128xbf16>
    %251 = vector.extract_strided_slice %250 {offsets = [0, 0], sizes = [32, 64], strides = [1, 1]} : vector<64x128xbf16> to vector<32x64xbf16>
    %252 = arith.truncf %248 : vector<16x32xf32> to vector<16x32xbf16>
    %cst_175 = arith.constant dense<0.000000e+00> : vector<16x64xf32>
    %253 = tpu.matmul %252, %251, %cst_175 {dimension_numbers = #tpu.dot_dimension_numbers<[1], [0], [0], [1], [0, 0, 1, 1], [], []>} : vector<16x32xbf16>, vector<32x64xbf16>, vector<16x64xf32> -> vector<16x64xf32>
    %c0_176 = arith.constant 0 : index
    %c9_177 = arith.constant 9 : index
    %254 = vector.load %arg7[%c0_176, %c9_177] : memref<32x144xf32, #tpu.memory_space<vmem>>, vector<32x32xf32>
    %255 = arith.truncf %254 : vector<32x32xf32> to vector<32x32xbf16>
    %c16 = arith.constant 16 : index
    %c0_178 = arith.constant 0 : index
    %c0_179 = arith.constant 0 : index
    %256 = vector.load %arg3[%c16, %c0_178, %c0_179] : memref<53x32x32xbf16, #tpu.memory_space<vmem>>, vector<1x32x32xbf16>
    %257 = vector.shape_cast %256 : vector<1x32x32xbf16> to vector<32x32xbf16>
    %258 = vector.extract_strided_slice %257 {offsets = [0, 0], sizes = [16, 32], strides = [1, 1]} : vector<32x32xbf16> to vector<16x32xbf16>
    %cst_180 = arith.constant dense<0.000000e+00> : vector<16x32xf32>
    %259 = tpu.matmul %258, %255, %cst_180 {dimension_numbers = #tpu.dot_dimension_numbers<[1], [0], [0], [1], [0, 0, 1, 1], [], []>} : vector<16x32xbf16>, vector<32x32xbf16>, vector<16x32xf32> -> vector<16x32xf32>
    %c0_181 = arith.constant 0 : index
    %c8_182 = arith.constant 8 : index
    %260 = vector.load %arg7[%c0_181, %c8_182] : memref<32x144xf32, #tpu.memory_space<vmem>>, vector<32x32xf32>
    %261 = arith.truncf %260 : vector<32x32xf32> to vector<32x32xbf16>
    %c17_183 = arith.constant 17 : index
    %c0_184 = arith.constant 0 : index
    %c0_185 = arith.constant 0 : index
    %262 = vector.load %arg3[%c17_183, %c0_184, %c0_185] : memref<53x32x32xbf16, #tpu.memory_space<vmem>>, vector<1x32x32xbf16>
    %263 = vector.shape_cast %262 : vector<1x32x32xbf16> to vector<32x32xbf16>
    %264 = vector.extract_strided_slice %263 {offsets = [0, 0], sizes = [16, 32], strides = [1, 1]} : vector<32x32xbf16> to vector<16x32xbf16>
    %cst_186 = arith.constant dense<0.000000e+00> : vector<16x32xf32>
    %265 = tpu.matmul %264, %261, %cst_186 {dimension_numbers = #tpu.dot_dimension_numbers<[1], [0], [0], [1], [0, 0, 1, 1], [], []>} : vector<16x32xbf16>, vector<32x32xbf16>, vector<16x32xf32> -> vector<16x32xf32>
    %266 = arith.addf %259, %265 : vector<16x32xf32>
    %c1_187 = arith.constant 1 : index
    %c0_188 = arith.constant 0 : index
    %c0_189 = arith.constant 0 : index
    %267 = vector.load %arg5[%c1_187, %c0_188, %c0_189] : memref<2x64x128xbf16, #tpu.memory_space<vmem>>, vector<1x64x128xbf16>
    %268 = vector.shape_cast %267 : vector<1x64x128xbf16> to vector<64x128xbf16>
    %269 = vector.extract_strided_slice %268 {offsets = [0, 0], sizes = [32, 64], strides = [1, 1]} : vector<64x128xbf16> to vector<32x64xbf16>
    %270 = arith.truncf %266 : vector<16x32xf32> to vector<16x32xbf16>
    %cst_190 = arith.constant dense<0.000000e+00> : vector<16x64xf32>
    %271 = tpu.matmul %270, %269, %cst_190 {dimension_numbers = #tpu.dot_dimension_numbers<[1], [0], [0], [1], [0, 0, 1, 1], [], []>} : vector<16x32xbf16>, vector<32x64xbf16>, vector<16x64xf32> -> vector<16x64xf32>
    %272 = arith.addf %253, %271 : vector<16x64xf32>
    %c0_191 = arith.constant 0 : index
    %c2_192 = arith.constant 2 : index
    %273 = vector.load %arg4[%c0_191, %c2_192] : memref<32x21xf32, #tpu.memory_space<vmem>>, vector<16x1xf32>
    %274 = vector.broadcast %273 : vector<16x1xf32> to vector<16x64xf32>
    %275 = arith.addf %272, %274 : vector<16x64xf32>
    %cst_193 = arith.constant 0.707106769 : f32
    %276 = vector.broadcast %cst_193 : f32 to vector<16x64xf32>
    %277 = arith.mulf %275, %276 : vector<16x64xf32>
    %cst_194 = arith.constant 0.000000e+00 : f32
    %278 = vector.broadcast %cst_194 : f32 to vector<16x64xf32>
    %279 = arith.cmpf oge, %277, %278 : vector<16x64xf32>
    %cst_195 = arith.constant 1.000000e+00 : f32
    %cst_196 = arith.constant -1.000000e+00 : f32
    %280 = vector.broadcast %cst_195 : f32 to vector<16x64xf32>
    %281 = vector.broadcast %cst_196 : f32 to vector<16x64xf32>
    %282 = arith.select %279, %280, %281 : vector<16x64xi1>, vector<16x64xf32>
    %283 = math.absf %277 : vector<16x64xf32>
    %cst_197 = arith.constant 0.327591091 : f32
    %284 = vector.broadcast %cst_197 : f32 to vector<16x64xf32>
    %285 = arith.mulf %284, %283 : vector<16x64xf32>
    %cst_198 = arith.constant 1.000000e+00 : f32
    %286 = vector.broadcast %cst_198 : f32 to vector<16x64xf32>
    %287 = arith.addf %286, %285 : vector<16x64xf32>
    %cst_199 = arith.constant 1.000000e+00 : f32
    %288 = vector.broadcast %cst_199 : f32 to vector<16x64xf32>
    %289 = arith.divf %288, %287 : vector<16x64xf32>
    %cst_200 = arith.constant 1.06140542 : f32
    %290 = vector.broadcast %cst_200 : f32 to vector<16x64xf32>
    %291 = arith.mulf %290, %289 : vector<16x64xf32>
    %cst_201 = arith.constant -1.45315206 : f32
    %292 = vector.broadcast %cst_201 : f32 to vector<16x64xf32>
    %293 = arith.addf %291, %292 : vector<16x64xf32>
    %294 = arith.mulf %293, %289 : vector<16x64xf32>
    %cst_202 = arith.constant 1.42141378 : f32
    %295 = vector.broadcast %cst_202 : f32 to vector<16x64xf32>
    %296 = arith.addf %294, %295 : vector<16x64xf32>
    %297 = arith.mulf %296, %289 : vector<16x64xf32>
    %cst_203 = arith.constant -0.284496725 : f32
    %298 = vector.broadcast %cst_203 : f32 to vector<16x64xf32>
    %299 = arith.addf %297, %298 : vector<16x64xf32>
    %300 = arith.mulf %299, %289 : vector<16x64xf32>
    %cst_204 = arith.constant 0.254829586 : f32
    %301 = vector.broadcast %cst_204 : f32 to vector<16x64xf32>
    %302 = arith.addf %300, %301 : vector<16x64xf32>
    %303 = arith.mulf %302, %289 : vector<16x64xf32>
    %cst_205 = arith.constant 0.000000e+00 : f32
    %304 = vector.broadcast %cst_205 : f32 to vector<16x64xf32>
    %305 = arith.subf %304, %283 : vector<16x64xf32>
    %306 = arith.mulf %305, %283 : vector<16x64xf32>
    %307 = math.exp %306 : vector<16x64xf32>
    %308 = arith.mulf %303, %307 : vector<16x64xf32>
    %cst_206 = arith.constant 1.000000e+00 : f32
    %309 = vector.broadcast %cst_206 : f32 to vector<16x64xf32>
    %310 = arith.subf %309, %308 : vector<16x64xf32>
    %311 = arith.mulf %282, %310 : vector<16x64xf32>
    %cst_207 = arith.constant 5.000000e-01 : f32
    %312 = vector.broadcast %cst_207 : f32 to vector<16x64xf32>
    %313 = arith.mulf %312, %275 : vector<16x64xf32>
    %cst_208 = arith.constant 1.000000e+00 : f32
    %314 = vector.broadcast %cst_208 : f32 to vector<16x64xf32>
    %315 = arith.addf %314, %311 : vector<16x64xf32>
    %316 = arith.mulf %313, %315 : vector<16x64xf32>
    %c0_209 = arith.constant 0 : index
    %c8_210 = arith.constant 8 : index
    %317 = vector.load %arg7[%c0_209, %c8_210] : memref<32x144xf32, #tpu.memory_space<vmem>>, vector<16x64xf32>
    tpu.vector_store %arg7[%c0_209, %c8_210], %316 {strides = array<i32>} : memref<32x144xf32, #tpu.memory_space<vmem>>, vector<16x64xf32>,
    %318 = vector.extract_strided_slice %316 {offsets = [0, 1], sizes = [16, 1], strides = [1, 1]} : vector<16x64xf32> to vector<16x1xf32>
    %319 = vector.extract_strided_slice %316 {offsets = [0, 62], sizes = [16, 1], strides = [1, 1]} : vector<16x64xf32> to vector<16x1xf32>
    %c0_211 = arith.constant 0 : index
    %c7_212 = arith.constant 7 : index
    %320 = vector.load %arg7[%c0_211, %c7_212] : memref<32x144xf32, #tpu.memory_space<vmem>>, vector<16x1xf32>
    tpu.vector_store %arg7[%c0_211, %c7_212], %318 {strides = array<i32>} : memref<32x144xf32, #tpu.memory_space<vmem>>, vector<16x1xf32>,
    %c0_213 = arith.constant 0 : index
    %c72 = arith.constant 72 : index
    %321 = vector.load %arg7[%c0_213, %c72] : memref<32x144xf32, #tpu.memory_space<vmem>>, vector<16x1xf32>
    tpu.vector_store %arg7[%c0_213, %c72], %319 {strides = array<i32>} : memref<32x144xf32, #tpu.memory_space<vmem>>, vector<16x1xf32>,
    %c0_214 = arith.constant 0 : index
    %c7_215 = arith.constant 7 : index
    %322 = vector.load %arg7[%c0_214, %c7_215] : memref<32x144xf32, #tpu.memory_space<vmem>>, vector<16x64xf32>
    %323 = arith.truncf %322 : vector<16x64xf32> to vector<16x64xbf16>
    %c18 = arith.constant 18 : index
    %c0_216 = arith.constant 0 : index
    %c0_217 = arith.constant 0 : index
    %324 = vector.load %arg3[%c18, %c0_216, %c0_217] : memref<53x32x32xbf16, #tpu.memory_space<vmem>>, vector<1x32x32xbf16>
    %325 = vector.shape_cast %324 : vector<1x32x32xbf16> to vector<32x32xbf16>
    %326 = vector.extract_strided_slice %325 {offsets = [0, 0], sizes = [16, 16], strides = [1, 1]} : vector<32x32xbf16> to vector<16x16xbf16>
    %cst_218 = arith.constant dense<0.000000e+00> : vector<16x64xf32>
    %327 = tpu.matmul %326, %323, %cst_218 {dimension_numbers = #tpu.dot_dimension_numbers<[1], [0], [0], [1], [0, 0, 1, 1], [], []>} : vector<16x16xbf16>, vector<16x64xbf16>, vector<16x64xf32> -> vector<16x64xf32>
    %c0_219 = arith.constant 0 : index
    %c8_220 = arith.constant 8 : index
    %328 = vector.load %arg7[%c0_219, %c8_220] : memref<32x144xf32, #tpu.memory_space<vmem>>, vector<16x64xf32>
    %329 = arith.truncf %328 : vector<16x64xf32> to vector<16x64xbf16>
    %c19 = arith.constant 19 : index
    %c0_221 = arith.constant 0 : index
    %c0_222 = arith.constant 0 : index
    %330 = vector.load %arg3[%c19, %c0_221, %c0_222] : memref<53x32x32xbf16, #tpu.memory_space<vmem>>, vector<1x32x32xbf16>
    %331 = vector.shape_cast %330 : vector<1x32x32xbf16> to vector<32x32xbf16>
    %332 = vector.extract_strided_slice %331 {offsets = [0, 0], sizes = [16, 16], strides = [1, 1]} : vector<32x32xbf16> to vector<16x16xbf16>
    %cst_223 = arith.constant dense<0.000000e+00> : vector<16x64xf32>
    %333 = tpu.matmul %332, %329, %cst_223 {dimension_numbers = #tpu.dot_dimension_numbers<[1], [0], [0], [1], [0, 0, 1, 1], [], []>} : vector<16x16xbf16>, vector<16x64xbf16>, vector<16x64xf32> -> vector<16x64xf32>
    %334 = arith.addf %327, %333 : vector<16x64xf32>
    %c0_224 = arith.constant 0 : index
    %c9_225 = arith.constant 9 : index
    %335 = vector.load %arg7[%c0_224, %c9_225] : memref<32x144xf32, #tpu.memory_space<vmem>>, vector<16x64xf32>
    %336 = arith.truncf %335 : vector<16x64xf32> to vector<16x64xbf16>
    %c20 = arith.constant 20 : index
    %c0_226 = arith.constant 0 : index
    %c0_227 = arith.constant 0 : index
    %337 = vector.load %arg3[%c20, %c0_226, %c0_227] : memref<53x32x32xbf16, #tpu.memory_space<vmem>>, vector<1x32x32xbf16>
    %338 = vector.shape_cast %337 : vector<1x32x32xbf16> to vector<32x32xbf16>
    %339 = vector.extract_strided_slice %338 {offsets = [0, 0], sizes = [16, 16], strides = [1, 1]} : vector<32x32xbf16> to vector<16x16xbf16>
    %cst_228 = arith.constant dense<0.000000e+00> : vector<16x64xf32>
    %340 = tpu.matmul %339, %336, %cst_228 {dimension_numbers = #tpu.dot_dimension_numbers<[1], [0], [0], [1], [0, 0, 1, 1], [], []>} : vector<16x16xbf16>, vector<16x64xbf16>, vector<16x64xf32> -> vector<16x64xf32>
    %341 = arith.addf %334, %340 : vector<16x64xf32>
    %c0_229 = arith.constant 0 : index
    %c3_230 = arith.constant 3 : index
    %342 = vector.load %arg4[%c0_229, %c3_230] : memref<32x21xf32, #tpu.memory_space<vmem>>, vector<16x1xf32>
    %343 = vector.broadcast %342 : vector<16x1xf32> to vector<16x64xf32>
    %344 = arith.addf %341, %343 : vector<16x64xf32>
    %345 = vector.broadcast %10 : vector<16x1xf32> to vector<16x64xf32>
    %346 = arith.addf %344, %345 : vector<16x64xf32>
    %cst_231 = arith.constant 0.707106769 : f32
    %347 = vector.broadcast %cst_231 : f32 to vector<16x64xf32>
    %348 = arith.mulf %346, %347 : vector<16x64xf32>
    %cst_232 = arith.constant 0.000000e+00 : f32
    %349 = vector.broadcast %cst_232 : f32 to vector<16x64xf32>
    %350 = arith.cmpf oge, %348, %349 : vector<16x64xf32>
    %cst_233 = arith.constant 1.000000e+00 : f32
    %cst_234 = arith.constant -1.000000e+00 : f32
    %351 = vector.broadcast %cst_233 : f32 to vector<16x64xf32>
    %352 = vector.broadcast %cst_234 : f32 to vector<16x64xf32>
    %353 = arith.select %350, %351, %352 : vector<16x64xi1>, vector<16x64xf32>
    %354 = math.absf %348 : vector<16x64xf32>
    %cst_235 = arith.constant 0.327591091 : f32
    %355 = vector.broadcast %cst_235 : f32 to vector<16x64xf32>
    %356 = arith.mulf %355, %354 : vector<16x64xf32>
    %cst_236 = arith.constant 1.000000e+00 : f32
    %357 = vector.broadcast %cst_236 : f32 to vector<16x64xf32>
    %358 = arith.addf %357, %356 : vector<16x64xf32>
    %cst_237 = arith.constant 1.000000e+00 : f32
    %359 = vector.broadcast %cst_237 : f32 to vector<16x64xf32>
    %360 = arith.divf %359, %358 : vector<16x64xf32>
    %cst_238 = arith.constant 1.06140542 : f32
    %361 = vector.broadcast %cst_238 : f32 to vector<16x64xf32>
    %362 = arith.mulf %361, %360 : vector<16x64xf32>
    %cst_239 = arith.constant -1.45315206 : f32
    %363 = vector.broadcast %cst_239 : f32 to vector<16x64xf32>
    %364 = arith.addf %362, %363 : vector<16x64xf32>
    %365 = arith.mulf %364, %360 : vector<16x64xf32>
    %cst_240 = arith.constant 1.42141378 : f32
    %366 = vector.broadcast %cst_240 : f32 to vector<16x64xf32>
    %367 = arith.addf %365, %366 : vector<16x64xf32>
    %368 = arith.mulf %367, %360 : vector<16x64xf32>
    %cst_241 = arith.constant -0.284496725 : f32
    %369 = vector.broadcast %cst_241 : f32 to vector<16x64xf32>
    %370 = arith.addf %368, %369 : vector<16x64xf32>
    %371 = arith.mulf %370, %360 : vector<16x64xf32>
    %cst_242 = arith.constant 0.254829586 : f32
    %372 = vector.broadcast %cst_242 : f32 to vector<16x64xf32>
    %373 = arith.addf %371, %372 : vector<16x64xf32>
    %374 = arith.mulf %373, %360 : vector<16x64xf32>
    %cst_243 = arith.constant 0.000000e+00 : f32
    %375 = vector.broadcast %cst_243 : f32 to vector<16x64xf32>
    %376 = arith.subf %375, %354 : vector<16x64xf32>
    %377 = arith.mulf %376, %354 : vector<16x64xf32>
    %378 = math.exp %377 : vector<16x64xf32>
    %379 = arith.mulf %374, %378 : vector<16x64xf32>
    %cst_244 = arith.constant 1.000000e+00 : f32
    %380 = vector.broadcast %cst_244 : f32 to vector<16x64xf32>
    %381 = arith.subf %380, %379 : vector<16x64xf32>
    %382 = arith.mulf %353, %381 : vector<16x64xf32>
    %cst_245 = arith.constant 5.000000e-01 : f32
    %383 = vector.broadcast %cst_245 : f32 to vector<16x64xf32>
    %384 = arith.mulf %383, %346 : vector<16x64xf32>
    %cst_246 = arith.constant 1.000000e+00 : f32
    %385 = vector.broadcast %cst_246 : f32 to vector<16x64xf32>
    %386 = arith.addf %385, %382 : vector<16x64xf32>
    %387 = arith.mulf %384, %386 : vector<16x64xf32>
    %c22 = arith.constant 22 : index
    %c0_247 = arith.constant 0 : index
    %c0_248 = arith.constant 0 : index
    %388 = vector.load %arg3[%c22, %c0_247, %c0_248] : memref<53x32x32xbf16, #tpu.memory_space<vmem>>, vector<1x32x32xbf16>
    %389 = vector.shape_cast %388 : vector<1x32x32xbf16> to vector<32x32xbf16>
    %390 = vector.extract_strided_slice %389 {offsets = [0, 0], sizes = [16, 16], strides = [1, 1]} : vector<32x32xbf16> to vector<16x16xbf16>
    %391 = arith.truncf %387 : vector<16x64xf32> to vector<16x64xbf16>
    %cst_249 = arith.constant dense<0.000000e+00> : vector<16x64xf32>
    %392 = tpu.matmul %390, %391, %cst_249 {dimension_numbers = #tpu.dot_dimension_numbers<[1], [0], [0], [1], [0, 0, 1, 1], [], []>} : vector<16x16xbf16>, vector<16x64xbf16>, vector<16x64xf32> -> vector<16x64xf32>
    %c0_250 = arith.constant 0 : index
    %c5_251 = arith.constant 5 : index
    %393 = vector.load %arg4[%c0_250, %c5_251] : memref<32x21xf32, #tpu.memory_space<vmem>>, vector<16x1xf32>
    %394 = vector.broadcast %393 : vector<16x1xf32> to vector<16x64xf32>
    %395 = arith.addf %392, %394 : vector<16x64xf32>
    %c23 = arith.constant 23 : index
    %c0_252 = arith.constant 0 : index
    %c0_253 = arith.constant 0 : index
    %396 = vector.load %arg3[%c23, %c0_252, %c0_253] : memref<53x32x32xbf16, #tpu.memory_space<vmem>>, vector<1x32x32xbf16>
    %397 = vector.shape_cast %396 : vector<1x32x32xbf16> to vector<32x32xbf16>
    %398 = vector.extract_strided_slice %397 {offsets = [0, 0], sizes = [16, 16], strides = [1, 1]} : vector<32x32xbf16> to vector<16x16xbf16>
    %399 = arith.truncf %275 : vector<16x64xf32> to vector<16x64xbf16>
    %cst_254 = arith.constant dense<0.000000e+00> : vector<16x64xf32>
    %400 = tpu.matmul %398, %399, %cst_254 {dimension_numbers = #tpu.dot_dimension_numbers<[1], [0], [0], [1], [0, 0, 1, 1], [], []>} : vector<16x16xbf16>, vector<16x64xbf16>, vector<16x64xf32> -> vector<16x64xf32>
    %c0_255 = arith.constant 0 : index
    %c6_256 = arith.constant 6 : index
    %401 = vector.load %arg4[%c0_255, %c6_256] : memref<32x21xf32, #tpu.memory_space<vmem>>, vector<16x1xf32>
    %402 = vector.broadcast %401 : vector<16x1xf32> to vector<16x64xf32>
    %403 = arith.addf %400, %402 : vector<16x64xf32>
    %404 = arith.addf %403, %395 : vector<16x64xf32>
    %cst_257 = arith.constant 0.707106769 : f32
    %405 = vector.broadcast %cst_257 : f32 to vector<16x64xf32>
    %406 = arith.mulf %404, %405 : vector<16x64xf32>
    %cst_258 = arith.constant 0.000000e+00 : f32
    %407 = vector.broadcast %cst_258 : f32 to vector<16x64xf32>
    %408 = arith.cmpf oge, %406, %407 : vector<16x64xf32>
    %cst_259 = arith.constant 1.000000e+00 : f32
    %cst_260 = arith.constant -1.000000e+00 : f32
    %409 = vector.broadcast %cst_259 : f32 to vector<16x64xf32>
    %410 = vector.broadcast %cst_260 : f32 to vector<16x64xf32>
    %411 = arith.select %408, %409, %410 : vector<16x64xi1>, vector<16x64xf32>
    %412 = math.absf %406 : vector<16x64xf32>
    %cst_261 = arith.constant 0.327591091 : f32
    %413 = vector.broadcast %cst_261 : f32 to vector<16x64xf32>
    %414 = arith.mulf %413, %412 : vector<16x64xf32>
    %cst_262 = arith.constant 1.000000e+00 : f32
    %415 = vector.broadcast %cst_262 : f32 to vector<16x64xf32>
    %416 = arith.addf %415, %414 : vector<16x64xf32>
    %cst_263 = arith.constant 1.000000e+00 : f32
    %417 = vector.broadcast %cst_263 : f32 to vector<16x64xf32>
    %418 = arith.divf %417, %416 : vector<16x64xf32>
    %cst_264 = arith.constant 1.06140542 : f32
    %419 = vector.broadcast %cst_264 : f32 to vector<16x64xf32>
    %420 = arith.mulf %419, %418 : vector<16x64xf32>
    %cst_265 = arith.constant -1.45315206 : f32
    %421 = vector.broadcast %cst_265 : f32 to vector<16x64xf32>
    %422 = arith.addf %420, %421 : vector<16x64xf32>
    %423 = arith.mulf %422, %418 : vector<16x64xf32>
    %cst_266 = arith.constant 1.42141378 : f32
    %424 = vector.broadcast %cst_266 : f32 to vector<16x64xf32>
    %425 = arith.addf %423, %424 : vector<16x64xf32>
    %426 = arith.mulf %425, %418 : vector<16x64xf32>
    %cst_267 = arith.constant -0.284496725 : f32
    %427 = vector.broadcast %cst_267 : f32 to vector<16x64xf32>
    %428 = arith.addf %426, %427 : vector<16x64xf32>
    %429 = arith.mulf %428, %418 : vector<16x64xf32>
    %cst_268 = arith.constant 0.254829586 : f32
    %430 = vector.broadcast %cst_268 : f32 to vector<16x64xf32>
    %431 = arith.addf %429, %430 : vector<16x64xf32>
    %432 = arith.mulf %431, %418 : vector<16x64xf32>
    %cst_269 = arith.constant 0.000000e+00 : f32
    %433 = vector.broadcast %cst_269 : f32 to vector<16x64xf32>
    %434 = arith.subf %433, %412 : vector<16x64xf32>
    %435 = arith.mulf %434, %412 : vector<16x64xf32>
    %436 = math.exp %435 : vector<16x64xf32>
    %437 = arith.mulf %432, %436 : vector<16x64xf32>
    %cst_270 = arith.constant 1.000000e+00 : f32
    %438 = vector.broadcast %cst_270 : f32 to vector<16x64xf32>
    %439 = arith.subf %438, %437 : vector<16x64xf32>
    %440 = arith.mulf %411, %439 : vector<16x64xf32>
    %cst_271 = arith.constant 5.000000e-01 : f32
    %441 = vector.broadcast %cst_271 : f32 to vector<16x64xf32>
    %442 = arith.mulf %441, %404 : vector<16x64xf32>
    %cst_272 = arith.constant 1.000000e+00 : f32
    %443 = vector.broadcast %cst_272 : f32 to vector<16x64xf32>
    %444 = arith.addf %443, %440 : vector<16x64xf32>
    %445 = arith.mulf %442, %444 : vector<16x64xf32>
    %c0_273 = arith.constant 0 : index
    %c8_274 = arith.constant 8 : index
    %446 = vector.load %arg7[%c0_273, %c8_274] : memref<32x144xf32, #tpu.memory_space<vmem>>, vector<16x64xf32>
    tpu.vector_store %arg7[%c0_273, %c8_274], %445 {strides = array<i32>} : memref<32x144xf32, #tpu.memory_space<vmem>>, vector<16x64xf32>,
    %447 = vector.extract_strided_slice %445 {offsets = [0, 1], sizes = [16, 1], strides = [1, 1]} : vector<16x64xf32> to vector<16x1xf32>
    %448 = vector.extract_strided_slice %445 {offsets = [0, 62], sizes = [16, 1], strides = [1, 1]} : vector<16x64xf32> to vector<16x1xf32>
    %c0_275 = arith.constant 0 : index
    %c7_276 = arith.constant 7 : index
    %449 = vector.load %arg7[%c0_275, %c7_276] : memref<32x144xf32, #tpu.memory_space<vmem>>, vector<16x1xf32>
    tpu.vector_store %arg7[%c0_275, %c7_276], %447 {strides = array<i32>} : memref<32x144xf32, #tpu.memory_space<vmem>>, vector<16x1xf32>,
    %c0_277 = arith.constant 0 : index
    %c72_278 = arith.constant 72 : index
    %450 = vector.load %arg7[%c0_277, %c72_278] : memref<32x144xf32, #tpu.memory_space<vmem>>, vector<16x1xf32>
    tpu.vector_store %arg7[%c0_277, %c72_278], %448 {strides = array<i32>} : memref<32x144xf32, #tpu.memory_space<vmem>>, vector<16x1xf32>,
    %451 = vector.extract_strided_slice %445 {offsets = [0, 2], sizes = [16, 1], strides = [1, 1]} : vector<16x64xf32> to vector<16x1xf32>
    %452 = vector.extract_strided_slice %445 {offsets = [0, 61], sizes = [16, 1], strides = [1, 1]} : vector<16x64xf32> to vector<16x1xf32>
    %c0_279 = arith.constant 0 : index
    %c6_280 = arith.constant 6 : index
    %453 = vector.load %arg7[%c0_279, %c6_280] : memref<32x144xf32, #tpu.memory_space<vmem>>, vector<16x1xf32>
    tpu.vector_store %arg7[%c0_279, %c6_280], %451 {strides = array<i32>} : memref<32x144xf32, #tpu.memory_space<vmem>>, vector<16x1xf32>,
    %c0_281 = arith.constant 0 : index
    %c73 = arith.constant 73 : index
    %454 = vector.load %arg7[%c0_281, %c73] : memref<32x144xf32, #tpu.memory_space<vmem>>, vector<16x1xf32>
    tpu.vector_store %arg7[%c0_281, %c73], %452 {strides = array<i32>} : memref<32x144xf32, #tpu.memory_space<vmem>>, vector<16x1xf32>,
    %455 = vector.extract_strided_slice %445 {offsets = [0, 3], sizes = [16, 1], strides = [1, 1]} : vector<16x64xf32> to vector<16x1xf32>
    %456 = vector.extract_strided_slice %445 {offsets = [0, 60], sizes = [16, 1], strides = [1, 1]} : vector<16x64xf32> to vector<16x1xf32>
    %c0_282 = arith.constant 0 : index
    %c5_283 = arith.constant 5 : index
    %457 = vector.load %arg7[%c0_282, %c5_283] : memref<32x144xf32, #tpu.memory_space<vmem>>, vector<16x1xf32>
    tpu.vector_store %arg7[%c0_282, %c5_283], %455 {strides = array<i32>} : memref<32x144xf32, #tpu.memory_space<vmem>>, vector<16x1xf32>,
    %c0_284 = arith.constant 0 : index
    %c74 = arith.constant 74 : index
    %458 = vector.load %arg7[%c0_284, %c74] : memref<32x144xf32, #tpu.memory_space<vmem>>, vector<16x1xf32>
    tpu.vector_store %arg7[%c0_284, %c74], %456 {strides = array<i32>} : memref<32x144xf32, #tpu.memory_space<vmem>>, vector<16x1xf32>,
    %c0_285 = arith.constant 0 : index
    %c5_286 = arith.constant 5 : index
    %459 = vector.load %arg7[%c0_285, %c5_286] : memref<32x144xf32, #tpu.memory_space<vmem>>, vector<16x64xf32>
    %460 = arith.truncf %459 : vector<16x64xf32> to vector<16x64xbf16>
    %c24 = arith.constant 24 : index
    %c0_287 = arith.constant 0 : index
    %c0_288 = arith.constant 0 : index
    %461 = vector.load %arg3[%c24, %c0_287, %c0_288] : memref<53x32x32xbf16, #tpu.memory_space<vmem>>, vector<1x32x32xbf16>
    %462 = vector.shape_cast %461 : vector<1x32x32xbf16> to vector<32x32xbf16>
    %463 = vector.extract_strided_slice %462 {offsets = [0, 0], sizes = [16, 16], strides = [1, 1]} : vector<32x32xbf16> to vector<16x16xbf16>
    %cst_289 = arith.constant dense<0.000000e+00> : vector<16x64xf32>
    %464 = tpu.matmul %463, %460, %cst_289 {dimension_numbers = #tpu.dot_dimension_numbers<[1], [0], [0], [1], [0, 0, 1, 1], [], []>} : vector<16x16xbf16>, vector<16x64xbf16>, vector<16x64xf32> -> vector<16x64xf32>
    %c0_290 = arith.constant 0 : index
    %c8_291 = arith.constant 8 : index
    %465 = vector.load %arg7[%c0_290, %c8_291] : memref<32x144xf32, #tpu.memory_space<vmem>>, vector<16x64xf32>
    %466 = arith.truncf %465 : vector<16x64xf32> to vector<16x64xbf16>
    %c25 = arith.constant 25 : index
    %c0_292 = arith.constant 0 : index
    %c0_293 = arith.constant 0 : index
    %467 = vector.load %arg3[%c25, %c0_292, %c0_293] : memref<53x32x32xbf16, #tpu.memory_space<vmem>>, vector<1x32x32xbf16>
    %468 = vector.shape_cast %467 : vector<1x32x32xbf16> to vector<32x32xbf16>
    %469 = vector.extract_strided_slice %468 {offsets = [0, 0], sizes = [16, 16], strides = [1, 1]} : vector<32x32xbf16> to vector<16x16xbf16>
    %cst_294 = arith.constant dense<0.000000e+00> : vector<16x64xf32>
    %470 = tpu.matmul %469, %466, %cst_294 {dimension_numbers = #tpu.dot_dimension_numbers<[1], [0], [0], [1], [0, 0, 1, 1], [], []>} : vector<16x16xbf16>, vector<16x64xbf16>, vector<16x64xf32> -> vector<16x64xf32>
    %471 = arith.addf %464, %470 : vector<16x64xf32>
    %c0_295 = arith.constant 0 : index
    %c11_296 = arith.constant 11 : index
    %472 = vector.load %arg7[%c0_295, %c11_296] : memref<32x144xf32, #tpu.memory_space<vmem>>, vector<16x64xf32>
    %473 = arith.truncf %472 : vector<16x64xf32> to vector<16x64xbf16>
    %c26 = arith.constant 26 : index
    %c0_297 = arith.constant 0 : index
    %c0_298 = arith.constant 0 : index
    %474 = vector.load %arg3[%c26, %c0_297, %c0_298] : memref<53x32x32xbf16, #tpu.memory_space<vmem>>, vector<1x32x32xbf16>
    %475 = vector.shape_cast %474 : vector<1x32x32xbf16> to vector<32x32xbf16>
    %476 = vector.extract_strided_slice %475 {offsets = [0, 0], sizes = [16, 16], strides = [1, 1]} : vector<32x32xbf16> to vector<16x16xbf16>
    %cst_299 = arith.constant dense<0.000000e+00> : vector<16x64xf32>
    %477 = tpu.matmul %476, %473, %cst_299 {dimension_numbers = #tpu.dot_dimension_numbers<[1], [0], [0], [1], [0, 0, 1, 1], [], []>} : vector<16x16xbf16>, vector<16x64xbf16>, vector<16x64xf32> -> vector<16x64xf32>
    %478 = arith.addf %471, %477 : vector<16x64xf32>
    %c0_300 = arith.constant 0 : index
    %c7_301 = arith.constant 7 : index
    %479 = vector.load %arg4[%c0_300, %c7_301] : memref<32x21xf32, #tpu.memory_space<vmem>>, vector<16x1xf32>
    %480 = vector.broadcast %479 : vector<16x1xf32> to vector<16x64xf32>
    %481 = arith.addf %478, %480 : vector<16x64xf32>
    %482 = vector.broadcast %16 : vector<16x1xf32> to vector<16x64xf32>
    %483 = arith.addf %481, %482 : vector<16x64xf32>
    %cst_302 = arith.constant 0.707106769 : f32
    %484 = vector.broadcast %cst_302 : f32 to vector<16x64xf32>
    %485 = arith.mulf %483, %484 : vector<16x64xf32>
    %cst_303 = arith.constant 0.000000e+00 : f32
    %486 = vector.broadcast %cst_303 : f32 to vector<16x64xf32>
    %487 = arith.cmpf oge, %485, %486 : vector<16x64xf32>
    %cst_304 = arith.constant 1.000000e+00 : f32
    %cst_305 = arith.constant -1.000000e+00 : f32
    %488 = vector.broadcast %cst_304 : f32 to vector<16x64xf32>
    %489 = vector.broadcast %cst_305 : f32 to vector<16x64xf32>
    %490 = arith.select %487, %488, %489 : vector<16x64xi1>, vector<16x64xf32>
    %491 = math.absf %485 : vector<16x64xf32>
    %cst_306 = arith.constant 0.327591091 : f32
    %492 = vector.broadcast %cst_306 : f32 to vector<16x64xf32>
    %493 = arith.mulf %492, %491 : vector<16x64xf32>
    %cst_307 = arith.constant 1.000000e+00 : f32
    %494 = vector.broadcast %cst_307 : f32 to vector<16x64xf32>
    %495 = arith.addf %494, %493 : vector<16x64xf32>
    %cst_308 = arith.constant 1.000000e+00 : f32
    %496 = vector.broadcast %cst_308 : f32 to vector<16x64xf32>
    %497 = arith.divf %496, %495 : vector<16x64xf32>
    %cst_309 = arith.constant 1.06140542 : f32
    %498 = vector.broadcast %cst_309 : f32 to vector<16x64xf32>
    %499 = arith.mulf %498, %497 : vector<16x64xf32>
    %cst_310 = arith.constant -1.45315206 : f32
    %500 = vector.broadcast %cst_310 : f32 to vector<16x64xf32>
    %501 = arith.addf %499, %500 : vector<16x64xf32>
    %502 = arith.mulf %501, %497 : vector<16x64xf32>
    %cst_311 = arith.constant 1.42141378 : f32
    %503 = vector.broadcast %cst_311 : f32 to vector<16x64xf32>
    %504 = arith.addf %502, %503 : vector<16x64xf32>
    %505 = arith.mulf %504, %497 : vector<16x64xf32>
    %cst_312 = arith.constant -0.284496725 : f32
    %506 = vector.broadcast %cst_312 : f32 to vector<16x64xf32>
    %507 = arith.addf %505, %506 : vector<16x64xf32>
    %508 = arith.mulf %507, %497 : vector<16x64xf32>
    %cst_313 = arith.constant 0.254829586 : f32
    %509 = vector.broadcast %cst_313 : f32 to vector<16x64xf32>
    %510 = arith.addf %508, %509 : vector<16x64xf32>
    %511 = arith.mulf %510, %497 : vector<16x64xf32>
    %cst_314 = arith.constant 0.000000e+00 : f32
    %512 = vector.broadcast %cst_314 : f32 to vector<16x64xf32>
    %513 = arith.subf %512, %491 : vector<16x64xf32>
    %514 = arith.mulf %513, %491 : vector<16x64xf32>
    %515 = math.exp %514 : vector<16x64xf32>
    %516 = arith.mulf %511, %515 : vector<16x64xf32>
    %cst_315 = arith.constant 1.000000e+00 : f32
    %517 = vector.broadcast %cst_315 : f32 to vector<16x64xf32>
    %518 = arith.subf %517, %516 : vector<16x64xf32>
    %519 = arith.mulf %490, %518 : vector<16x64xf32>
    %cst_316 = arith.constant 5.000000e-01 : f32
    %520 = vector.broadcast %cst_316 : f32 to vector<16x64xf32>
    %521 = arith.mulf %520, %483 : vector<16x64xf32>
    %cst_317 = arith.constant 1.000000e+00 : f32
    %522 = vector.broadcast %cst_317 : f32 to vector<16x64xf32>
    %523 = arith.addf %522, %519 : vector<16x64xf32>
    %524 = arith.mulf %521, %523 : vector<16x64xf32>
    %c28 = arith.constant 28 : index
    %c0_318 = arith.constant 0 : index
    %c0_319 = arith.constant 0 : index
    %525 = vector.load %arg3[%c28, %c0_318, %c0_319] : memref<53x32x32xbf16, #tpu.memory_space<vmem>>, vector<1x32x32xbf16>
    %526 = vector.shape_cast %525 : vector<1x32x32xbf16> to vector<32x32xbf16>
    %527 = vector.extract_strided_slice %526 {offsets = [0, 0], sizes = [16, 16], strides = [1, 1]} : vector<32x32xbf16> to vector<16x16xbf16>
    %528 = arith.truncf %524 : vector<16x64xf32> to vector<16x64xbf16>
    %cst_320 = arith.constant dense<0.000000e+00> : vector<16x64xf32>
    %529 = tpu.matmul %527, %528, %cst_320 {dimension_numbers = #tpu.dot_dimension_numbers<[1], [0], [0], [1], [0, 0, 1, 1], [], []>} : vector<16x16xbf16>, vector<16x64xbf16>, vector<16x64xf32> -> vector<16x64xf32>
    %c0_321 = arith.constant 0 : index
    %c9_322 = arith.constant 9 : index
    %530 = vector.load %arg4[%c0_321, %c9_322] : memref<32x21xf32, #tpu.memory_space<vmem>>, vector<16x1xf32>
    %531 = vector.broadcast %530 : vector<16x1xf32> to vector<16x64xf32>
    %532 = arith.addf %529, %531 : vector<16x64xf32>
    %c29 = arith.constant 29 : index
    %c0_323 = arith.constant 0 : index
    %c0_324 = arith.constant 0 : index
    %533 = vector.load %arg3[%c29, %c0_323, %c0_324] : memref<53x32x32xbf16, #tpu.memory_space<vmem>>, vector<1x32x32xbf16>
    %534 = vector.shape_cast %533 : vector<1x32x32xbf16> to vector<32x32xbf16>
    %535 = vector.extract_strided_slice %534 {offsets = [0, 0], sizes = [16, 16], strides = [1, 1]} : vector<32x32xbf16> to vector<16x16xbf16>
    %536 = arith.truncf %404 : vector<16x64xf32> to vector<16x64xbf16>
    %cst_325 = arith.constant dense<0.000000e+00> : vector<16x64xf32>
    %537 = tpu.matmul %535, %536, %cst_325 {dimension_numbers = #tpu.dot_dimension_numbers<[1], [0], [0], [1], [0, 0, 1, 1], [], []>} : vector<16x16xbf16>, vector<16x64xbf16>, vector<16x64xf32> -> vector<16x64xf32>
    %c0_326 = arith.constant 0 : index
    %c10_327 = arith.constant 10 : index
    %538 = vector.load %arg4[%c0_326, %c10_327] : memref<32x21xf32, #tpu.memory_space<vmem>>, vector<16x1xf32>
    %539 = vector.broadcast %538 : vector<16x1xf32> to vector<16x64xf32>
    %540 = arith.addf %537, %539 : vector<16x64xf32>
    %541 = arith.addf %540, %532 : vector<16x64xf32>
    %cst_328 = arith.constant 0.707106769 : f32
    %542 = vector.broadcast %cst_328 : f32 to vector<16x64xf32>
    %543 = arith.mulf %541, %542 : vector<16x64xf32>
    %cst_329 = arith.constant 0.000000e+00 : f32
    %544 = vector.broadcast %cst_329 : f32 to vector<16x64xf32>
    %545 = arith.cmpf oge, %543, %544 : vector<16x64xf32>
    %cst_330 = arith.constant 1.000000e+00 : f32
    %cst_331 = arith.constant -1.000000e+00 : f32
    %546 = vector.broadcast %cst_330 : f32 to vector<16x64xf32>
    %547 = vector.broadcast %cst_331 : f32 to vector<16x64xf32>
    %548 = arith.select %545, %546, %547 : vector<16x64xi1>, vector<16x64xf32>
    %549 = math.absf %543 : vector<16x64xf32>
    %cst_332 = arith.constant 0.327591091 : f32
    %550 = vector.broadcast %cst_332 : f32 to vector<16x64xf32>
    %551 = arith.mulf %550, %549 : vector<16x64xf32>
    %cst_333 = arith.constant 1.000000e+00 : f32
    %552 = vector.broadcast %cst_333 : f32 to vector<16x64xf32>
    %553 = arith.addf %552, %551 : vector<16x64xf32>
    %cst_334 = arith.constant 1.000000e+00 : f32
    %554 = vector.broadcast %cst_334 : f32 to vector<16x64xf32>
    %555 = arith.divf %554, %553 : vector<16x64xf32>
    %cst_335 = arith.constant 1.06140542 : f32
    %556 = vector.broadcast %cst_335 : f32 to vector<16x64xf32>
    %557 = arith.mulf %556, %555 : vector<16x64xf32>
    %cst_336 = arith.constant -1.45315206 : f32
    %558 = vector.broadcast %cst_336 : f32 to vector<16x64xf32>
    %559 = arith.addf %557, %558 : vector<16x64xf32>
    %560 = arith.mulf %559, %555 : vector<16x64xf32>
    %cst_337 = arith.constant 1.42141378 : f32
    %561 = vector.broadcast %cst_337 : f32 to vector<16x64xf32>
    %562 = arith.addf %560, %561 : vector<16x64xf32>
    %563 = arith.mulf %562, %555 : vector<16x64xf32>
    %cst_338 = arith.constant -0.284496725 : f32
    %564 = vector.broadcast %cst_338 : f32 to vector<16x64xf32>
    %565 = arith.addf %563, %564 : vector<16x64xf32>
    %566 = arith.mulf %565, %555 : vector<16x64xf32>
    %cst_339 = arith.constant 0.254829586 : f32
    %567 = vector.broadcast %cst_339 : f32 to vector<16x64xf32>
    %568 = arith.addf %566, %567 : vector<16x64xf32>
    %569 = arith.mulf %568, %555 : vector<16x64xf32>
    %cst_340 = arith.constant 0.000000e+00 : f32
    %570 = vector.broadcast %cst_340 : f32 to vector<16x64xf32>
    %571 = arith.subf %570, %549 : vector<16x64xf32>
    %572 = arith.mulf %571, %549 : vector<16x64xf32>
    %573 = math.exp %572 : vector<16x64xf32>
    %574 = arith.mulf %569, %573 : vector<16x64xf32>
    %cst_341 = arith.constant 1.000000e+00 : f32
    %575 = vector.broadcast %cst_341 : f32 to vector<16x64xf32>
    %576 = arith.subf %575, %574 : vector<16x64xf32>
    %577 = arith.mulf %548, %576 : vector<16x64xf32>
    %cst_342 = arith.constant 5.000000e-01 : f32
    %578 = vector.broadcast %cst_342 : f32 to vector<16x64xf32>
    %579 = arith.mulf %578, %541 : vector<16x64xf32>
    %cst_343 = arith.constant 1.000000e+00 : f32
    %580 = vector.broadcast %cst_343 : f32 to vector<16x64xf32>
    %581 = arith.addf %580, %577 : vector<16x64xf32>
    %582 = arith.mulf %579, %581 : vector<16x64xf32>
    %c0_344 = arith.constant 0 : index
    %c8_345 = arith.constant 8 : index
    %583 = vector.load %arg7[%c0_344, %c8_345] : memref<32x144xf32, #tpu.memory_space<vmem>>, vector<16x64xf32>
    tpu.vector_store %arg7[%c0_344, %c8_345], %582 {strides = array<i32>} : memref<32x144xf32, #tpu.memory_space<vmem>>, vector<16x64xf32>,
    %cst_346 = arith.constant 0.000000e+00 : f32
    %584 = vector.broadcast %cst_346 : f32 to vector<16x1xf32>
    %c0_347 = arith.constant 0 : index
    %c7_348 = arith.constant 7 : index
    %585 = vector.load %arg7[%c0_347, %c7_348] : memref<32x144xf32, #tpu.memory_space<vmem>>, vector<16x1xf32>
    tpu.vector_store %arg7[%c0_347, %c7_348], %584 {strides = array<i32>} : memref<32x144xf32, #tpu.memory_space<vmem>>, vector<16x1xf32>,
    %c0_349 = arith.constant 0 : index
    %c72_350 = arith.constant 72 : index
    %586 = vector.load %arg7[%c0_349, %c72_350] : memref<32x144xf32, #tpu.memory_space<vmem>>, vector<16x1xf32>
    tpu.vector_store %arg7[%c0_349, %c72_350], %584 {strides = array<i32>} : memref<32x144xf32, #tpu.memory_space<vmem>>, vector<16x1xf32>,
    %c0_351 = arith.constant 0 : index
    %c8_352 = arith.constant 8 : index
    %587 = vector.load %arg7[%c0_351, %c8_352] : memref<32x144xf32, #tpu.memory_space<vmem>>, vector<16x64xf32>
    %588 = arith.truncf %587 : vector<16x64xf32> to vector<16x64xbf16>
    %c30 = arith.constant 30 : index
    %c0_353 = arith.constant 0 : index
    %c0_354 = arith.constant 0 : index
    %589 = vector.load %arg3[%c30, %c0_353, %c0_354] : memref<53x32x32xbf16, #tpu.memory_space<vmem>>, vector<1x32x32xbf16>
    %590 = vector.shape_cast %589 : vector<1x32x32xbf16> to vector<32x32xbf16>
    %591 = vector.extract_strided_slice %590 {offsets = [0, 0], sizes = [8, 16], strides = [1, 1]} : vector<32x32xbf16> to vector<8x16xbf16>
    %cst_355 = arith.constant dense<0.000000e+00> : vector<8x64xf32>
    %592 = tpu.matmul %591, %588, %cst_355 {dimension_numbers = #tpu.dot_dimension_numbers<[1], [0], [0], [1], [0, 0, 1, 1], [], []>} : vector<8x16xbf16>, vector<16x64xbf16>, vector<8x64xf32> -> vector<8x64xf32>
    %c0_356 = arith.constant 0 : index
    %c7_357 = arith.constant 7 : index
    %593 = vector.load %arg7[%c0_356, %c7_357] : memref<32x144xf32, #tpu.memory_space<vmem>>, vector<16x64xf32>
    %594 = arith.truncf %593 : vector<16x64xf32> to vector<16x64xbf16>
    %c31 = arith.constant 31 : index
    %c0_358 = arith.constant 0 : index
    %c0_359 = arith.constant 0 : index
    %595 = vector.load %arg3[%c31, %c0_358, %c0_359] : memref<53x32x32xbf16, #tpu.memory_space<vmem>>, vector<1x32x32xbf16>
    %596 = vector.shape_cast %595 : vector<1x32x32xbf16> to vector<32x32xbf16>
    %597 = vector.extract_strided_slice %596 {offsets = [0, 0], sizes = [8, 16], strides = [1, 1]} : vector<32x32xbf16> to vector<8x16xbf16>
    %cst_360 = arith.constant dense<0.000000e+00> : vector<8x64xf32>
    %598 = tpu.matmul %597, %594, %cst_360 {dimension_numbers = #tpu.dot_dimension_numbers<[1], [0], [0], [1], [0, 0, 1, 1], [], []>} : vector<8x16xbf16>, vector<16x64xbf16>, vector<8x64xf32> -> vector<8x64xf32>
    %599 = arith.addf %592, %598 : vector<8x64xf32>
    %c0_361 = arith.constant 0 : index
    %c0_362 = arith.constant 0 : index
    %c0_363 = arith.constant 0 : index
    %600 = vector.load %arg5[%c0_361, %c0_362, %c0_363] : memref<2x64x128xbf16, #tpu.memory_space<vmem>>, vector<1x64x128xbf16>
    %601 = vector.shape_cast %600 : vector<1x64x128xbf16> to vector<64x128xbf16>
    %602 = arith.truncf %599 : vector<8x64xf32> to vector<8x64xbf16>
    %cst_364 = arith.constant dense<0.000000e+00> : vector<8x128xf32>
    %603 = tpu.matmul %602, %601, %cst_364 {dimension_numbers = #tpu.dot_dimension_numbers<[1], [0], [0], [1], [0, 0, 1, 1], [], []>} : vector<8x64xbf16>, vector<64x128xbf16>, vector<8x128xf32> -> vector<8x128xf32>
    %c0_365 = arith.constant 0 : index
    %c9_366 = arith.constant 9 : index
    %604 = vector.load %arg7[%c0_365, %c9_366] : memref<32x144xf32, #tpu.memory_space<vmem>>, vector<16x64xf32>
    %605 = arith.truncf %604 : vector<16x64xf32> to vector<16x64xbf16>
    %c32 = arith.constant 32 : index
    %c0_367 = arith.constant 0 : index
    %c0_368 = arith.constant 0 : index
    %606 = vector.load %arg3[%c32, %c0_367, %c0_368] : memref<53x32x32xbf16, #tpu.memory_space<vmem>>, vector<1x32x32xbf16>
    %607 = vector.shape_cast %606 : vector<1x32x32xbf16> to vector<32x32xbf16>
    %608 = vector.extract_strided_slice %607 {offsets = [0, 0], sizes = [8, 16], strides = [1, 1]} : vector<32x32xbf16> to vector<8x16xbf16>
    %cst_369 = arith.constant dense<0.000000e+00> : vector<8x64xf32>
    %609 = tpu.matmul %608, %605, %cst_369 {dimension_numbers = #tpu.dot_dimension_numbers<[1], [0], [0], [1], [0, 0, 1, 1], [], []>} : vector<8x16xbf16>, vector<16x64xbf16>, vector<8x64xf32> -> vector<8x64xf32>
    %c0_370 = arith.constant 0 : index
    %c8_371 = arith.constant 8 : index
    %610 = vector.load %arg7[%c0_370, %c8_371] : memref<32x144xf32, #tpu.memory_space<vmem>>, vector<16x64xf32>
    %611 = arith.truncf %610 : vector<16x64xf32> to vector<16x64xbf16>
    %c33 = arith.constant 33 : index
    %c0_372 = arith.constant 0 : index
    %c0_373 = arith.constant 0 : index
    %612 = vector.load %arg3[%c33, %c0_372, %c0_373] : memref<53x32x32xbf16, #tpu.memory_space<vmem>>, vector<1x32x32xbf16>
    %613 = vector.shape_cast %612 : vector<1x32x32xbf16> to vector<32x32xbf16>
    %614 = vector.extract_strided_slice %613 {offsets = [0, 0], sizes = [8, 16], strides = [1, 1]} : vector<32x32xbf16> to vector<8x16xbf16>
    %cst_374 = arith.constant dense<0.000000e+00> : vector<8x64xf32>
    %615 = tpu.matmul %614, %611, %cst_374 {dimension_numbers = #tpu.dot_dimension_numbers<[1], [0], [0], [1], [0, 0, 1, 1], [], []>} : vector<8x16xbf16>, vector<16x64xbf16>, vector<8x64xf32> -> vector<8x64xf32>
    %616 = arith.addf %609, %615 : vector<8x64xf32>
    %c1_375 = arith.constant 1 : index
    %c0_376 = arith.constant 0 : index
    %c0_377 = arith.constant 0 : index
    %617 = vector.load %arg5[%c1_375, %c0_376, %c0_377] : memref<2x64x128xbf16, #tpu.memory_space<vmem>>, vector<1x64x128xbf16>
    %618 = vector.shape_cast %617 : vector<1x64x128xbf16> to vector<64x128xbf16>
    %619 = arith.truncf %616 : vector<8x64xf32> to vector<8x64xbf16>
    %cst_378 = arith.constant dense<0.000000e+00> : vector<8x128xf32>
    %620 = tpu.matmul %619, %618, %cst_378 {dimension_numbers = #tpu.dot_dimension_numbers<[1], [0], [0], [1], [0, 0, 1, 1], [], []>} : vector<8x64xbf16>, vector<64x128xbf16>, vector<8x128xf32> -> vector<8x128xf32>
    %621 = arith.addf %603, %620 : vector<8x128xf32>
    %c0_379 = arith.constant 0 : index
    %c11_380 = arith.constant 11 : index
    %622 = vector.load %arg4[%c0_379, %c11_380] : memref<32x21xf32, #tpu.memory_space<vmem>>, vector<8x1xf32>
    %623 = vector.broadcast %622 : vector<8x1xf32> to vector<8x128xf32>
    %624 = arith.addf %621, %623 : vector<8x128xf32>
    %cst_381 = arith.constant 0.707106769 : f32
    %625 = vector.broadcast %cst_381 : f32 to vector<8x128xf32>
    %626 = arith.mulf %624, %625 : vector<8x128xf32>
    %cst_382 = arith.constant 0.000000e+00 : f32
    %627 = vector.broadcast %cst_382 : f32 to vector<8x128xf32>
    %628 = arith.cmpf oge, %626, %627 : vector<8x128xf32>
    %cst_383 = arith.constant 1.000000e+00 : f32
    %cst_384 = arith.constant -1.000000e+00 : f32
    %629 = vector.broadcast %cst_383 : f32 to vector<8x128xf32>
    %630 = vector.broadcast %cst_384 : f32 to vector<8x128xf32>
    %631 = arith.select %628, %629, %630 : vector<8x128xi1>, vector<8x128xf32>
    %632 = math.absf %626 : vector<8x128xf32>
    %cst_385 = arith.constant 0.327591091 : f32
    %633 = vector.broadcast %cst_385 : f32 to vector<8x128xf32>
    %634 = arith.mulf %633, %632 : vector<8x128xf32>
    %cst_386 = arith.constant 1.000000e+00 : f32
    %635 = vector.broadcast %cst_386 : f32 to vector<8x128xf32>
    %636 = arith.addf %635, %634 : vector<8x128xf32>
    %cst_387 = arith.constant 1.000000e+00 : f32
    %637 = vector.broadcast %cst_387 : f32 to vector<8x128xf32>
    %638 = arith.divf %637, %636 : vector<8x128xf32>
    %cst_388 = arith.constant 1.06140542 : f32
    %639 = vector.broadcast %cst_388 : f32 to vector<8x128xf32>
    %640 = arith.mulf %639, %638 : vector<8x128xf32>
    %cst_389 = arith.constant -1.45315206 : f32
    %641 = vector.broadcast %cst_389 : f32 to vector<8x128xf32>
    %642 = arith.addf %640, %641 : vector<8x128xf32>
    %643 = arith.mulf %642, %638 : vector<8x128xf32>
    %cst_390 = arith.constant 1.42141378 : f32
    %644 = vector.broadcast %cst_390 : f32 to vector<8x128xf32>
    %645 = arith.addf %643, %644 : vector<8x128xf32>
    %646 = arith.mulf %645, %638 : vector<8x128xf32>
    %cst_391 = arith.constant -0.284496725 : f32
    %647 = vector.broadcast %cst_391 : f32 to vector<8x128xf32>
    %648 = arith.addf %646, %647 : vector<8x128xf32>
    %649 = arith.mulf %648, %638 : vector<8x128xf32>
    %cst_392 = arith.constant 0.254829586 : f32
    %650 = vector.broadcast %cst_392 : f32 to vector<8x128xf32>
    %651 = arith.addf %649, %650 : vector<8x128xf32>
    %652 = arith.mulf %651, %638 : vector<8x128xf32>
    %cst_393 = arith.constant 0.000000e+00 : f32
    %653 = vector.broadcast %cst_393 : f32 to vector<8x128xf32>
    %654 = arith.subf %653, %632 : vector<8x128xf32>
    %655 = arith.mulf %654, %632 : vector<8x128xf32>
    %656 = math.exp %655 : vector<8x128xf32>
    %657 = arith.mulf %652, %656 : vector<8x128xf32>
    %cst_394 = arith.constant 1.000000e+00 : f32
    %658 = vector.broadcast %cst_394 : f32 to vector<8x128xf32>
    %659 = arith.subf %658, %657 : vector<8x128xf32>
    %660 = arith.mulf %631, %659 : vector<8x128xf32>
    %cst_395 = arith.constant 5.000000e-01 : f32
    %661 = vector.broadcast %cst_395 : f32 to vector<8x128xf32>
    %662 = arith.mulf %661, %624 : vector<8x128xf32>
    %cst_396 = arith.constant 1.000000e+00 : f32
    %663 = vector.broadcast %cst_396 : f32 to vector<8x128xf32>
    %664 = arith.addf %663, %660 : vector<8x128xf32>
    %665 = arith.mulf %662, %664 : vector<8x128xf32>
    %c0_397 = arith.constant 0 : index
    %c8_398 = arith.constant 8 : index
    %666 = vector.load %arg7[%c0_397, %c8_398] : memref<32x144xf32, #tpu.memory_space<vmem>>, vector<8x128xf32>
    tpu.vector_store %arg7[%c0_397, %c8_398], %665 {strides = array<i32>} : memref<32x144xf32, #tpu.memory_space<vmem>>, vector<8x128xf32>,
    %667 = vector.extract_strided_slice %665 {offsets = [0, 1], sizes = [8, 1], strides = [1, 1]} : vector<8x128xf32> to vector<8x1xf32>
    %668 = vector.extract_strided_slice %665 {offsets = [0, 126], sizes = [8, 1], strides = [1, 1]} : vector<8x128xf32> to vector<8x1xf32>
    %c0_399 = arith.constant 0 : index
    %c7_400 = arith.constant 7 : index
    %669 = vector.load %arg7[%c0_399, %c7_400] : memref<32x144xf32, #tpu.memory_space<vmem>>, vector<8x1xf32>
    tpu.vector_store %arg7[%c0_399, %c7_400], %667 {strides = array<i32>} : memref<32x144xf32, #tpu.memory_space<vmem>>, vector<8x1xf32>,
    %c0_401 = arith.constant 0 : index
    %c136 = arith.constant 136 : index
    %670 = vector.load %arg7[%c0_401, %c136] : memref<32x144xf32, #tpu.memory_space<vmem>>, vector<8x1xf32>
    tpu.vector_store %arg7[%c0_401, %c136], %668 {strides = array<i32>} : memref<32x144xf32, #tpu.memory_space<vmem>>, vector<8x1xf32>,
    %c0_402 = arith.constant 0 : index
    %c7_403 = arith.constant 7 : index
    %671 = vector.load %arg7[%c0_402, %c7_403] : memref<32x144xf32, #tpu.memory_space<vmem>>, vector<8x128xf32>
    %672 = arith.truncf %671 : vector<8x128xf32> to vector<8x128xbf16>
    %c34 = arith.constant 34 : index
    %c0_404 = arith.constant 0 : index
    %c0_405 = arith.constant 0 : index
    %673 = vector.load %arg3[%c34, %c0_404, %c0_405] : memref<53x32x32xbf16, #tpu.memory_space<vmem>>, vector<1x32x32xbf16>
    %674 = vector.shape_cast %673 : vector<1x32x32xbf16> to vector<32x32xbf16>
    %675 = vector.extract_strided_slice %674 {offsets = [0, 0], sizes = [8, 8], strides = [1, 1]} : vector<32x32xbf16> to vector<8x8xbf16>
    %cst_406 = arith.constant dense<0.000000e+00> : vector<8x128xf32>
    %676 = tpu.matmul %675, %672, %cst_406 {dimension_numbers = #tpu.dot_dimension_numbers<[1], [0], [0], [1], [0, 0, 1, 1], [], []>} : vector<8x8xbf16>, vector<8x128xbf16>, vector<8x128xf32> -> vector<8x128xf32>
    %c0_407 = arith.constant 0 : index
    %c8_408 = arith.constant 8 : index
    %677 = vector.load %arg7[%c0_407, %c8_408] : memref<32x144xf32, #tpu.memory_space<vmem>>, vector<8x128xf32>
    %678 = arith.truncf %677 : vector<8x128xf32> to vector<8x128xbf16>
    %c35 = arith.constant 35 : index
    %c0_409 = arith.constant 0 : index
    %c0_410 = arith.constant 0 : index
    %679 = vector.load %arg3[%c35, %c0_409, %c0_410] : memref<53x32x32xbf16, #tpu.memory_space<vmem>>, vector<1x32x32xbf16>
    %680 = vector.shape_cast %679 : vector<1x32x32xbf16> to vector<32x32xbf16>
    %681 = vector.extract_strided_slice %680 {offsets = [0, 0], sizes = [8, 8], strides = [1, 1]} : vector<32x32xbf16> to vector<8x8xbf16>
    %cst_411 = arith.constant dense<0.000000e+00> : vector<8x128xf32>
    %682 = tpu.matmul %681, %678, %cst_411 {dimension_numbers = #tpu.dot_dimension_numbers<[1], [0], [0], [1], [0, 0, 1, 1], [], []>} : vector<8x8xbf16>, vector<8x128xbf16>, vector<8x128xf32> -> vector<8x128xf32>
    %683 = arith.addf %676, %682 : vector<8x128xf32>
    %c0_412 = arith.constant 0 : index
    %c9_413 = arith.constant 9 : index
    %684 = vector.load %arg7[%c0_412, %c9_413] : memref<32x144xf32, #tpu.memory_space<vmem>>, vector<8x128xf32>
    %685 = arith.truncf %684 : vector<8x128xf32> to vector<8x128xbf16>
    %c36 = arith.constant 36 : index
    %c0_414 = arith.constant 0 : index
    %c0_415 = arith.constant 0 : index
    %686 = vector.load %arg3[%c36, %c0_414, %c0_415] : memref<53x32x32xbf16, #tpu.memory_space<vmem>>, vector<1x32x32xbf16>
    %687 = vector.shape_cast %686 : vector<1x32x32xbf16> to vector<32x32xbf16>
    %688 = vector.extract_strided_slice %687 {offsets = [0, 0], sizes = [8, 8], strides = [1, 1]} : vector<32x32xbf16> to vector<8x8xbf16>
    %cst_416 = arith.constant dense<0.000000e+00> : vector<8x128xf32>
    %689 = tpu.matmul %688, %685, %cst_416 {dimension_numbers = #tpu.dot_dimension_numbers<[1], [0], [0], [1], [0, 0, 1, 1], [], []>} : vector<8x8xbf16>, vector<8x128xbf16>, vector<8x128xf32> -> vector<8x128xf32>
    %690 = arith.addf %683, %689 : vector<8x128xf32>
    %c0_417 = arith.constant 0 : index
    %c12_418 = arith.constant 12 : index
    %691 = vector.load %arg4[%c0_417, %c12_418] : memref<32x21xf32, #tpu.memory_space<vmem>>, vector<8x1xf32>
    %692 = vector.broadcast %691 : vector<8x1xf32> to vector<8x128xf32>
    %693 = arith.addf %690, %692 : vector<8x128xf32>
    %694 = vector.broadcast %22 : vector<8x1xf32> to vector<8x128xf32>
    %695 = arith.addf %693, %694 : vector<8x128xf32>
    %cst_419 = arith.constant 0.707106769 : f32
    %696 = vector.broadcast %cst_419 : f32 to vector<8x128xf32>
    %697 = arith.mulf %695, %696 : vector<8x128xf32>
    %cst_420 = arith.constant 0.000000e+00 : f32
    %698 = vector.broadcast %cst_420 : f32 to vector<8x128xf32>
    %699 = arith.cmpf oge, %697, %698 : vector<8x128xf32>
    %cst_421 = arith.constant 1.000000e+00 : f32
    %cst_422 = arith.constant -1.000000e+00 : f32
    %700 = vector.broadcast %cst_421 : f32 to vector<8x128xf32>
    %701 = vector.broadcast %cst_422 : f32 to vector<8x128xf32>
    %702 = arith.select %699, %700, %701 : vector<8x128xi1>, vector<8x128xf32>
    %703 = math.absf %697 : vector<8x128xf32>
    %cst_423 = arith.constant 0.327591091 : f32
    %704 = vector.broadcast %cst_423 : f32 to vector<8x128xf32>
    %705 = arith.mulf %704, %703 : vector<8x128xf32>
    %cst_424 = arith.constant 1.000000e+00 : f32
    %706 = vector.broadcast %cst_424 : f32 to vector<8x128xf32>
    %707 = arith.addf %706, %705 : vector<8x128xf32>
    %cst_425 = arith.constant 1.000000e+00 : f32
    %708 = vector.broadcast %cst_425 : f32 to vector<8x128xf32>
    %709 = arith.divf %708, %707 : vector<8x128xf32>
    %cst_426 = arith.constant 1.06140542 : f32
    %710 = vector.broadcast %cst_426 : f32 to vector<8x128xf32>
    %711 = arith.mulf %710, %709 : vector<8x128xf32>
    %cst_427 = arith.constant -1.45315206 : f32
    %712 = vector.broadcast %cst_427 : f32 to vector<8x128xf32>
    %713 = arith.addf %711, %712 : vector<8x128xf32>
    %714 = arith.mulf %713, %709 : vector<8x128xf32>
    %cst_428 = arith.constant 1.42141378 : f32
    %715 = vector.broadcast %cst_428 : f32 to vector<8x128xf32>
    %716 = arith.addf %714, %715 : vector<8x128xf32>
    %717 = arith.mulf %716, %709 : vector<8x128xf32>
    %cst_429 = arith.constant -0.284496725 : f32
    %718 = vector.broadcast %cst_429 : f32 to vector<8x128xf32>
    %719 = arith.addf %717, %718 : vector<8x128xf32>
    %720 = arith.mulf %719, %709 : vector<8x128xf32>
    %cst_430 = arith.constant 0.254829586 : f32
    %721 = vector.broadcast %cst_430 : f32 to vector<8x128xf32>
    %722 = arith.addf %720, %721 : vector<8x128xf32>
    %723 = arith.mulf %722, %709 : vector<8x128xf32>
    %cst_431 = arith.constant 0.000000e+00 : f32
    %724 = vector.broadcast %cst_431 : f32 to vector<8x128xf32>
    %725 = arith.subf %724, %703 : vector<8x128xf32>
    %726 = arith.mulf %725, %703 : vector<8x128xf32>
    %727 = math.exp %726 : vector<8x128xf32>
    %728 = arith.mulf %723, %727 : vector<8x128xf32>
    %cst_432 = arith.constant 1.000000e+00 : f32
    %729 = vector.broadcast %cst_432 : f32 to vector<8x128xf32>
    %730 = arith.subf %729, %728 : vector<8x128xf32>
    %731 = arith.mulf %702, %730 : vector<8x128xf32>
    %cst_433 = arith.constant 5.000000e-01 : f32
    %732 = vector.broadcast %cst_433 : f32 to vector<8x128xf32>
    %733 = arith.mulf %732, %695 : vector<8x128xf32>
    %cst_434 = arith.constant 1.000000e+00 : f32
    %734 = vector.broadcast %cst_434 : f32 to vector<8x128xf32>
    %735 = arith.addf %734, %731 : vector<8x128xf32>
    %736 = arith.mulf %733, %735 : vector<8x128xf32>
    %c38 = arith.constant 38 : index
    %c0_435 = arith.constant 0 : index
    %c0_436 = arith.constant 0 : index
    %737 = vector.load %arg3[%c38, %c0_435, %c0_436] : memref<53x32x32xbf16, #tpu.memory_space<vmem>>, vector<1x32x32xbf16>
    %738 = vector.shape_cast %737 : vector<1x32x32xbf16> to vector<32x32xbf16>
    %739 = vector.extract_strided_slice %738 {offsets = [0, 0], sizes = [8, 8], strides = [1, 1]} : vector<32x32xbf16> to vector<8x8xbf16>
    %740 = arith.truncf %736 : vector<8x128xf32> to vector<8x128xbf16>
    %cst_437 = arith.constant dense<0.000000e+00> : vector<8x128xf32>
    %741 = tpu.matmul %739, %740, %cst_437 {dimension_numbers = #tpu.dot_dimension_numbers<[1], [0], [0], [1], [0, 0, 1, 1], [], []>} : vector<8x8xbf16>, vector<8x128xbf16>, vector<8x128xf32> -> vector<8x128xf32>
    %c0_438 = arith.constant 0 : index
    %c14_439 = arith.constant 14 : index
    %742 = vector.load %arg4[%c0_438, %c14_439] : memref<32x21xf32, #tpu.memory_space<vmem>>, vector<8x1xf32>
    %743 = vector.broadcast %742 : vector<8x1xf32> to vector<8x128xf32>
    %744 = arith.addf %741, %743 : vector<8x128xf32>
    %c39 = arith.constant 39 : index
    %c0_440 = arith.constant 0 : index
    %c0_441 = arith.constant 0 : index
    %745 = vector.load %arg3[%c39, %c0_440, %c0_441] : memref<53x32x32xbf16, #tpu.memory_space<vmem>>, vector<1x32x32xbf16>
    %746 = vector.shape_cast %745 : vector<1x32x32xbf16> to vector<32x32xbf16>
    %747 = vector.extract_strided_slice %746 {offsets = [0, 0], sizes = [8, 8], strides = [1, 1]} : vector<32x32xbf16> to vector<8x8xbf16>
    %748 = arith.truncf %624 : vector<8x128xf32> to vector<8x128xbf16>
    %cst_442 = arith.constant dense<0.000000e+00> : vector<8x128xf32>
    %749 = tpu.matmul %747, %748, %cst_442 {dimension_numbers = #tpu.dot_dimension_numbers<[1], [0], [0], [1], [0, 0, 1, 1], [], []>} : vector<8x8xbf16>, vector<8x128xbf16>, vector<8x128xf32> -> vector<8x128xf32>
    %c0_443 = arith.constant 0 : index
    %c15_444 = arith.constant 15 : index
    %750 = vector.load %arg4[%c0_443, %c15_444] : memref<32x21xf32, #tpu.memory_space<vmem>>, vector<8x1xf32>
    %751 = vector.broadcast %750 : vector<8x1xf32> to vector<8x128xf32>
    %752 = arith.addf %749, %751 : vector<8x128xf32>
    %753 = arith.addf %752, %744 : vector<8x128xf32>
    %cst_445 = arith.constant 0.707106769 : f32
    %754 = vector.broadcast %cst_445 : f32 to vector<8x128xf32>
    %755 = arith.mulf %753, %754 : vector<8x128xf32>
    %cst_446 = arith.constant 0.000000e+00 : f32
    %756 = vector.broadcast %cst_446 : f32 to vector<8x128xf32>
    %757 = arith.cmpf oge, %755, %756 : vector<8x128xf32>
    %cst_447 = arith.constant 1.000000e+00 : f32
    %cst_448 = arith.constant -1.000000e+00 : f32
    %758 = vector.broadcast %cst_447 : f32 to vector<8x128xf32>
    %759 = vector.broadcast %cst_448 : f32 to vector<8x128xf32>
    %760 = arith.select %757, %758, %759 : vector<8x128xi1>, vector<8x128xf32>
    %761 = math.absf %755 : vector<8x128xf32>
    %cst_449 = arith.constant 0.327591091 : f32
    %762 = vector.broadcast %cst_449 : f32 to vector<8x128xf32>
    %763 = arith.mulf %762, %761 : vector<8x128xf32>
    %cst_450 = arith.constant 1.000000e+00 : f32
    %764 = vector.broadcast %cst_450 : f32 to vector<8x128xf32>
    %765 = arith.addf %764, %763 : vector<8x128xf32>
    %cst_451 = arith.constant 1.000000e+00 : f32
    %766 = vector.broadcast %cst_451 : f32 to vector<8x128xf32>
    %767 = arith.divf %766, %765 : vector<8x128xf32>
    %cst_452 = arith.constant 1.06140542 : f32
    %768 = vector.broadcast %cst_452 : f32 to vector<8x128xf32>
    %769 = arith.mulf %768, %767 : vector<8x128xf32>
    %cst_453 = arith.constant -1.45315206 : f32
    %770 = vector.broadcast %cst_453 : f32 to vector<8x128xf32>
    %771 = arith.addf %769, %770 : vector<8x128xf32>
    %772 = arith.mulf %771, %767 : vector<8x128xf32>
    %cst_454 = arith.constant 1.42141378 : f32
    %773 = vector.broadcast %cst_454 : f32 to vector<8x128xf32>
    %774 = arith.addf %772, %773 : vector<8x128xf32>
    %775 = arith.mulf %774, %767 : vector<8x128xf32>
    %cst_455 = arith.constant -0.284496725 : f32
    %776 = vector.broadcast %cst_455 : f32 to vector<8x128xf32>
    %777 = arith.addf %775, %776 : vector<8x128xf32>
    %778 = arith.mulf %777, %767 : vector<8x128xf32>
    %cst_456 = arith.constant 0.254829586 : f32
    %779 = vector.broadcast %cst_456 : f32 to vector<8x128xf32>
    %780 = arith.addf %778, %779 : vector<8x128xf32>
    %781 = arith.mulf %780, %767 : vector<8x128xf32>
    %cst_457 = arith.constant 0.000000e+00 : f32
    %782 = vector.broadcast %cst_457 : f32 to vector<8x128xf32>
    %783 = arith.subf %782, %761 : vector<8x128xf32>
    %784 = arith.mulf %783, %761 : vector<8x128xf32>
    %785 = math.exp %784 : vector<8x128xf32>
    %786 = arith.mulf %781, %785 : vector<8x128xf32>
    %cst_458 = arith.constant 1.000000e+00 : f32
    %787 = vector.broadcast %cst_458 : f32 to vector<8x128xf32>
    %788 = arith.subf %787, %786 : vector<8x128xf32>
    %789 = arith.mulf %760, %788 : vector<8x128xf32>
    %cst_459 = arith.constant 5.000000e-01 : f32
    %790 = vector.broadcast %cst_459 : f32 to vector<8x128xf32>
    %791 = arith.mulf %790, %753 : vector<8x128xf32>
    %cst_460 = arith.constant 1.000000e+00 : f32
    %792 = vector.broadcast %cst_460 : f32 to vector<8x128xf32>
    %793 = arith.addf %792, %789 : vector<8x128xf32>
    %794 = arith.mulf %791, %793 : vector<8x128xf32>
    %c0_461 = arith.constant 0 : index
    %c8_462 = arith.constant 8 : index
    %795 = vector.load %arg7[%c0_461, %c8_462] : memref<32x144xf32, #tpu.memory_space<vmem>>, vector<8x128xf32>
    tpu.vector_store %arg7[%c0_461, %c8_462], %794 {strides = array<i32>} : memref<32x144xf32, #tpu.memory_space<vmem>>, vector<8x128xf32>,
    %796 = vector.extract_strided_slice %794 {offsets = [0, 1], sizes = [8, 1], strides = [1, 1]} : vector<8x128xf32> to vector<8x1xf32>
    %797 = vector.extract_strided_slice %794 {offsets = [0, 126], sizes = [8, 1], strides = [1, 1]} : vector<8x128xf32> to vector<8x1xf32>
    %c0_463 = arith.constant 0 : index
    %c7_464 = arith.constant 7 : index
    %798 = vector.load %arg7[%c0_463, %c7_464] : memref<32x144xf32, #tpu.memory_space<vmem>>, vector<8x1xf32>
    tpu.vector_store %arg7[%c0_463, %c7_464], %796 {strides = array<i32>} : memref<32x144xf32, #tpu.memory_space<vmem>>, vector<8x1xf32>,
    %c0_465 = arith.constant 0 : index
    %c136_466 = arith.constant 136 : index
    %799 = vector.load %arg7[%c0_465, %c136_466] : memref<32x144xf32, #tpu.memory_space<vmem>>, vector<8x1xf32>
    tpu.vector_store %arg7[%c0_465, %c136_466], %797 {strides = array<i32>} : memref<32x144xf32, #tpu.memory_space<vmem>>, vector<8x1xf32>,
    %800 = vector.extract_strided_slice %794 {offsets = [0, 2], sizes = [8, 1], strides = [1, 1]} : vector<8x128xf32> to vector<8x1xf32>
    %801 = vector.extract_strided_slice %794 {offsets = [0, 125], sizes = [8, 1], strides = [1, 1]} : vector<8x128xf32> to vector<8x1xf32>
    %c0_467 = arith.constant 0 : index
    %c6_468 = arith.constant 6 : index
    %802 = vector.load %arg7[%c0_467, %c6_468] : memref<32x144xf32, #tpu.memory_space<vmem>>, vector<8x1xf32>
    tpu.vector_store %arg7[%c0_467, %c6_468], %800 {strides = array<i32>} : memref<32x144xf32, #tpu.memory_space<vmem>>, vector<8x1xf32>,
    %c0_469 = arith.constant 0 : index
    %c137 = arith.constant 137 : index
    %803 = vector.load %arg7[%c0_469, %c137] : memref<32x144xf32, #tpu.memory_space<vmem>>, vector<8x1xf32>
    tpu.vector_store %arg7[%c0_469, %c137], %801 {strides = array<i32>} : memref<32x144xf32, #tpu.memory_space<vmem>>, vector<8x1xf32>,
    %804 = vector.extract_strided_slice %794 {offsets = [0, 3], sizes = [8, 1], strides = [1, 1]} : vector<8x128xf32> to vector<8x1xf32>
    %805 = vector.extract_strided_slice %794 {offsets = [0, 124], sizes = [8, 1], strides = [1, 1]} : vector<8x128xf32> to vector<8x1xf32>
    %c0_470 = arith.constant 0 : index
    %c5_471 = arith.constant 5 : index
    %806 = vector.load %arg7[%c0_470, %c5_471] : memref<32x144xf32, #tpu.memory_space<vmem>>, vector<8x1xf32>
    tpu.vector_store %arg7[%c0_470, %c5_471], %804 {strides = array<i32>} : memref<32x144xf32, #tpu.memory_space<vmem>>, vector<8x1xf32>,
    %c0_472 = arith.constant 0 : index
    %c138 = arith.constant 138 : index
    %807 = vector.load %arg7[%c0_472, %c138] : memref<32x144xf32, #tpu.memory_space<vmem>>, vector<8x1xf32>
    tpu.vector_store %arg7[%c0_472, %c138], %805 {strides = array<i32>} : memref<32x144xf32, #tpu.memory_space<vmem>>, vector<8x1xf32>,
    %c0_473 = arith.constant 0 : index
    %c5_474 = arith.constant 5 : index
    %808 = vector.load %arg7[%c0_473, %c5_474] : memref<32x144xf32, #tpu.memory_space<vmem>>, vector<8x128xf32>
    %809 = arith.truncf %808 : vector<8x128xf32> to vector<8x128xbf16>
    %c40_475 = arith.constant 40 : index
    %c0_476 = arith.constant 0 : index
    %c0_477 = arith.constant 0 : index
    %810 = vector.load %arg3[%c40_475, %c0_476, %c0_477] : memref<53x32x32xbf16, #tpu.memory_space<vmem>>, vector<1x32x32xbf16>
    %811 = vector.shape_cast %810 : vector<1x32x32xbf16> to vector<32x32xbf16>
    %812 = vector.extract_strided_slice %811 {offsets = [0, 0], sizes = [8, 8], strides = [1, 1]} : vector<32x32xbf16> to vector<8x8xbf16>
    %cst_478 = arith.constant dense<0.000000e+00> : vector<8x128xf32>
    %813 = tpu.matmul %812, %809, %cst_478 {dimension_numbers = #tpu.dot_dimension_numbers<[1], [0], [0], [1], [0, 0, 1, 1], [], []>} : vector<8x8xbf16>, vector<8x128xbf16>, vector<8x128xf32> -> vector<8x128xf32>
    %c0_479 = arith.constant 0 : index
    %c8_480 = arith.constant 8 : index
    %814 = vector.load %arg7[%c0_479, %c8_480] : memref<32x144xf32, #tpu.memory_space<vmem>>, vector<8x128xf32>
    %815 = arith.truncf %814 : vector<8x128xf32> to vector<8x128xbf16>
    %c41_481 = arith.constant 41 : index
    %c0_482 = arith.constant 0 : index
    %c0_483 = arith.constant 0 : index
    %816 = vector.load %arg3[%c41_481, %c0_482, %c0_483] : memref<53x32x32xbf16, #tpu.memory_space<vmem>>, vector<1x32x32xbf16>
    %817 = vector.shape_cast %816 : vector<1x32x32xbf16> to vector<32x32xbf16>
    %818 = vector.extract_strided_slice %817 {offsets = [0, 0], sizes = [8, 8], strides = [1, 1]} : vector<32x32xbf16> to vector<8x8xbf16>
    %cst_484 = arith.constant dense<0.000000e+00> : vector<8x128xf32>
    %819 = tpu.matmul %818, %815, %cst_484 {dimension_numbers = #tpu.dot_dimension_numbers<[1], [0], [0], [1], [0, 0, 1, 1], [], []>} : vector<8x8xbf16>, vector<8x128xbf16>, vector<8x128xf32> -> vector<8x128xf32>
    %820 = arith.addf %813, %819 : vector<8x128xf32>
    %c0_485 = arith.constant 0 : index
    %c11_486 = arith.constant 11 : index
    %821 = vector.load %arg7[%c0_485, %c11_486] : memref<32x144xf32, #tpu.memory_space<vmem>>, vector<8x128xf32>
    %822 = arith.truncf %821 : vector<8x128xf32> to vector<8x128xbf16>
    %c42_487 = arith.constant 42 : index
    %c0_488 = arith.constant 0 : index
    %c0_489 = arith.constant 0 : index
    %823 = vector.load %arg3[%c42_487, %c0_488, %c0_489] : memref<53x32x32xbf16, #tpu.memory_space<vmem>>, vector<1x32x32xbf16>
    %824 = vector.shape_cast %823 : vector<1x32x32xbf16> to vector<32x32xbf16>
    %825 = vector.extract_strided_slice %824 {offsets = [0, 0], sizes = [8, 8], strides = [1, 1]} : vector<32x32xbf16> to vector<8x8xbf16>
    %cst_490 = arith.constant dense<0.000000e+00> : vector<8x128xf32>
    %826 = tpu.matmul %825, %822, %cst_490 {dimension_numbers = #tpu.dot_dimension_numbers<[1], [0], [0], [1], [0, 0, 1, 1], [], []>} : vector<8x8xbf16>, vector<8x128xbf16>, vector<8x128xf32> -> vector<8x128xf32>
    %827 = arith.addf %820, %826 : vector<8x128xf32>
    %c0_491 = arith.constant 0 : index
    %c16_492 = arith.constant 16 : index
    %828 = vector.load %arg4[%c0_491, %c16_492] : memref<32x21xf32, #tpu.memory_space<vmem>>, vector<8x1xf32>
    %829 = vector.broadcast %828 : vector<8x1xf32> to vector<8x128xf32>
    %830 = arith.addf %827, %829 : vector<8x128xf32>
    %831 = vector.broadcast %28 : vector<8x1xf32> to vector<8x128xf32>
    %832 = arith.addf %830, %831 : vector<8x128xf32>
    %cst_493 = arith.constant 0.707106769 : f32
    %833 = vector.broadcast %cst_493 : f32 to vector<8x128xf32>
    %834 = arith.mulf %832, %833 : vector<8x128xf32>
    %cst_494 = arith.constant 0.000000e+00 : f32
    %835 = vector.broadcast %cst_494 : f32 to vector<8x128xf32>
    %836 = arith.cmpf oge, %834, %835 : vector<8x128xf32>
    %cst_495 = arith.constant 1.000000e+00 : f32
    %cst_496 = arith.constant -1.000000e+00 : f32
    %837 = vector.broadcast %cst_495 : f32 to vector<8x128xf32>
    %838 = vector.broadcast %cst_496 : f32 to vector<8x128xf32>
    %839 = arith.select %836, %837, %838 : vector<8x128xi1>, vector<8x128xf32>
    %840 = math.absf %834 : vector<8x128xf32>
    %cst_497 = arith.constant 0.327591091 : f32
    %841 = vector.broadcast %cst_497 : f32 to vector<8x128xf32>
    %842 = arith.mulf %841, %840 : vector<8x128xf32>
    %cst_498 = arith.constant 1.000000e+00 : f32
    %843 = vector.broadcast %cst_498 : f32 to vector<8x128xf32>
    %844 = arith.addf %843, %842 : vector<8x128xf32>
    %cst_499 = arith.constant 1.000000e+00 : f32
    %845 = vector.broadcast %cst_499 : f32 to vector<8x128xf32>
    %846 = arith.divf %845, %844 : vector<8x128xf32>
    %cst_500 = arith.constant 1.06140542 : f32
    %847 = vector.broadcast %cst_500 : f32 to vector<8x128xf32>
    %848 = arith.mulf %847, %846 : vector<8x128xf32>
    %cst_501 = arith.constant -1.45315206 : f32
    %849 = vector.broadcast %cst_501 : f32 to vector<8x128xf32>
    %850 = arith.addf %848, %849 : vector<8x128xf32>
    %851 = arith.mulf %850, %846 : vector<8x128xf32>
    %cst_502 = arith.constant 1.42141378 : f32
    %852 = vector.broadcast %cst_502 : f32 to vector<8x128xf32>
    %853 = arith.addf %851, %852 : vector<8x128xf32>
    %854 = arith.mulf %853, %846 : vector<8x128xf32>
    %cst_503 = arith.constant -0.284496725 : f32
    %855 = vector.broadcast %cst_503 : f32 to vector<8x128xf32>
    %856 = arith.addf %854, %855 : vector<8x128xf32>
    %857 = arith.mulf %856, %846 : vector<8x128xf32>
    %cst_504 = arith.constant 0.254829586 : f32
    %858 = vector.broadcast %cst_504 : f32 to vector<8x128xf32>
    %859 = arith.addf %857, %858 : vector<8x128xf32>
    %860 = arith.mulf %859, %846 : vector<8x128xf32>
    %cst_505 = arith.constant 0.000000e+00 : f32
    %861 = vector.broadcast %cst_505 : f32 to vector<8x128xf32>
    %862 = arith.subf %861, %840 : vector<8x128xf32>
    %863 = arith.mulf %862, %840 : vector<8x128xf32>
    %864 = math.exp %863 : vector<8x128xf32>
    %865 = arith.mulf %860, %864 : vector<8x128xf32>
    %cst_506 = arith.constant 1.000000e+00 : f32
    %866 = vector.broadcast %cst_506 : f32 to vector<8x128xf32>
    %867 = arith.subf %866, %865 : vector<8x128xf32>
    %868 = arith.mulf %839, %867 : vector<8x128xf32>
    %cst_507 = arith.constant 5.000000e-01 : f32
    %869 = vector.broadcast %cst_507 : f32 to vector<8x128xf32>
    %870 = arith.mulf %869, %832 : vector<8x128xf32>
    %cst_508 = arith.constant 1.000000e+00 : f32
    %871 = vector.broadcast %cst_508 : f32 to vector<8x128xf32>
    %872 = arith.addf %871, %868 : vector<8x128xf32>
    %873 = arith.mulf %870, %872 : vector<8x128xf32>
    %c44 = arith.constant 44 : index
    %c0_509 = arith.constant 0 : index
    %c0_510 = arith.constant 0 : index
    %874 = vector.load %arg3[%c44, %c0_509, %c0_510] : memref<53x32x32xbf16, #tpu.memory_space<vmem>>, vector<1x32x32xbf16>
    %875 = vector.shape_cast %874 : vector<1x32x32xbf16> to vector<32x32xbf16>
    %876 = vector.extract_strided_slice %875 {offsets = [0, 0], sizes = [8, 8], strides = [1, 1]} : vector<32x32xbf16> to vector<8x8xbf16>
    %877 = arith.truncf %873 : vector<8x128xf32> to vector<8x128xbf16>
    %cst_511 = arith.constant dense<0.000000e+00> : vector<8x128xf32>
    %878 = tpu.matmul %876, %877, %cst_511 {dimension_numbers = #tpu.dot_dimension_numbers<[1], [0], [0], [1], [0, 0, 1, 1], [], []>} : vector<8x8xbf16>, vector<8x128xbf16>, vector<8x128xf32> -> vector<8x128xf32>
    %c0_512 = arith.constant 0 : index
    %c18_513 = arith.constant 18 : index
    %879 = vector.load %arg4[%c0_512, %c18_513] : memref<32x21xf32, #tpu.memory_space<vmem>>, vector<8x1xf32>
    %880 = vector.broadcast %879 : vector<8x1xf32> to vector<8x128xf32>
    %881 = arith.addf %878, %880 : vector<8x128xf32>
    %c45 = arith.constant 45 : index
    %c0_514 = arith.constant 0 : index
    %c0_515 = arith.constant 0 : index
    %882 = vector.load %arg3[%c45, %c0_514, %c0_515] : memref<53x32x32xbf16, #tpu.memory_space<vmem>>, vector<1x32x32xbf16>
    %883 = vector.shape_cast %882 : vector<1x32x32xbf16> to vector<32x32xbf16>
    %884 = vector.extract_strided_slice %883 {offsets = [0, 0], sizes = [8, 8], strides = [1, 1]} : vector<32x32xbf16> to vector<8x8xbf16>
    %885 = arith.truncf %753 : vector<8x128xf32> to vector<8x128xbf16>
    %cst_516 = arith.constant dense<0.000000e+00> : vector<8x128xf32>
    %886 = tpu.matmul %884, %885, %cst_516 {dimension_numbers = #tpu.dot_dimension_numbers<[1], [0], [0], [1], [0, 0, 1, 1], [], []>} : vector<8x8xbf16>, vector<8x128xbf16>, vector<8x128xf32> -> vector<8x128xf32>
    %c0_517 = arith.constant 0 : index
    %c19_518 = arith.constant 19 : index
    %887 = vector.load %arg4[%c0_517, %c19_518] : memref<32x21xf32, #tpu.memory_space<vmem>>, vector<8x1xf32>
    %888 = vector.broadcast %887 : vector<8x1xf32> to vector<8x128xf32>
    %889 = arith.addf %886, %888 : vector<8x128xf32>
    %890 = arith.addf %889, %881 : vector<8x128xf32>
    %cst_519 = arith.constant 0.707106769 : f32
    %891 = vector.broadcast %cst_519 : f32 to vector<8x128xf32>
    %892 = arith.mulf %890, %891 : vector<8x128xf32>
    %cst_520 = arith.constant 0.000000e+00 : f32
    %893 = vector.broadcast %cst_520 : f32 to vector<8x128xf32>
    %894 = arith.cmpf oge, %892, %893 : vector<8x128xf32>
    %cst_521 = arith.constant 1.000000e+00 : f32
    %cst_522 = arith.constant -1.000000e+00 : f32
    %895 = vector.broadcast %cst_521 : f32 to vector<8x128xf32>
    %896 = vector.broadcast %cst_522 : f32 to vector<8x128xf32>
    %897 = arith.select %894, %895, %896 : vector<8x128xi1>, vector<8x128xf32>
    %898 = math.absf %892 : vector<8x128xf32>
    %cst_523 = arith.constant 0.327591091 : f32
    %899 = vector.broadcast %cst_523 : f32 to vector<8x128xf32>
    %900 = arith.mulf %899, %898 : vector<8x128xf32>
    %cst_524 = arith.constant 1.000000e+00 : f32
    %901 = vector.broadcast %cst_524 : f32 to vector<8x128xf32>
    %902 = arith.addf %901, %900 : vector<8x128xf32>
    %cst_525 = arith.constant 1.000000e+00 : f32
    %903 = vector.broadcast %cst_525 : f32 to vector<8x128xf32>
    %904 = arith.divf %903, %902 : vector<8x128xf32>
    %cst_526 = arith.constant 1.06140542 : f32
    %905 = vector.broadcast %cst_526 : f32 to vector<8x128xf32>
    %906 = arith.mulf %905, %904 : vector<8x128xf32>
    %cst_527 = arith.constant -1.45315206 : f32
    %907 = vector.broadcast %cst_527 : f32 to vector<8x128xf32>
    %908 = arith.addf %906, %907 : vector<8x128xf32>
    %909 = arith.mulf %908, %904 : vector<8x128xf32>
    %cst_528 = arith.constant 1.42141378 : f32
    %910 = vector.broadcast %cst_528 : f32 to vector<8x128xf32>
    %911 = arith.addf %909, %910 : vector<8x128xf32>
    %912 = arith.mulf %911, %904 : vector<8x128xf32>
    %cst_529 = arith.constant -0.284496725 : f32
    %913 = vector.broadcast %cst_529 : f32 to vector<8x128xf32>
    %914 = arith.addf %912, %913 : vector<8x128xf32>
    %915 = arith.mulf %914, %904 : vector<8x128xf32>
    %cst_530 = arith.constant 0.254829586 : f32
    %916 = vector.broadcast %cst_530 : f32 to vector<8x128xf32>
    %917 = arith.addf %915, %916 : vector<8x128xf32>
    %918 = arith.mulf %917, %904 : vector<8x128xf32>
    %cst_531 = arith.constant 0.000000e+00 : f32
    %919 = vector.broadcast %cst_531 : f32 to vector<8x128xf32>
    %920 = arith.subf %919, %898 : vector<8x128xf32>
    %921 = arith.mulf %920, %898 : vector<8x128xf32>
    %922 = math.exp %921 : vector<8x128xf32>
    %923 = arith.mulf %918, %922 : vector<8x128xf32>
    %cst_532 = arith.constant 1.000000e+00 : f32
    %924 = vector.broadcast %cst_532 : f32 to vector<8x128xf32>
    %925 = arith.subf %924, %923 : vector<8x128xf32>
    %926 = arith.mulf %897, %925 : vector<8x128xf32>
    %cst_533 = arith.constant 5.000000e-01 : f32
    %927 = vector.broadcast %cst_533 : f32 to vector<8x128xf32>
    %928 = arith.mulf %927, %890 : vector<8x128xf32>
    %cst_534 = arith.constant 1.000000e+00 : f32
    %929 = vector.broadcast %cst_534 : f32 to vector<8x128xf32>
    %930 = arith.addf %929, %926 : vector<8x128xf32>
    %931 = arith.mulf %928, %930 : vector<8x128xf32>
    %c0_535 = arith.constant 0 : index
    %c8_536 = arith.constant 8 : index
    %932 = vector.load %arg7[%c0_535, %c8_536] : memref<32x144xf32, #tpu.memory_space<vmem>>, vector<8x128xf32>
    tpu.vector_store %arg7[%c0_535, %c8_536], %931 {strides = array<i32>} : memref<32x144xf32, #tpu.memory_space<vmem>>, vector<8x128xf32>,
    %933 = vector.extract_strided_slice %931 {offsets = [0, 1], sizes = [8, 1], strides = [1, 1]} : vector<8x128xf32> to vector<8x1xf32>
    %934 = vector.extract_strided_slice %931 {offsets = [0, 126], sizes = [8, 1], strides = [1, 1]} : vector<8x128xf32> to vector<8x1xf32>
    %c0_537 = arith.constant 0 : index
    %c7_538 = arith.constant 7 : index
    %935 = vector.load %arg7[%c0_537, %c7_538] : memref<32x144xf32, #tpu.memory_space<vmem>>, vector<8x1xf32>
    tpu.vector_store %arg7[%c0_537, %c7_538], %933 {strides = array<i32>} : memref<32x144xf32, #tpu.memory_space<vmem>>, vector<8x1xf32>,
    %c0_539 = arith.constant 0 : index
    %c136_540 = arith.constant 136 : index
    %936 = vector.load %arg7[%c0_539, %c136_540] : memref<32x144xf32, #tpu.memory_space<vmem>>, vector<8x1xf32>
    tpu.vector_store %arg7[%c0_539, %c136_540], %934 {strides = array<i32>} : memref<32x144xf32, #tpu.memory_space<vmem>>, vector<8x1xf32>,
    %937 = vector.extract_strided_slice %931 {offsets = [0, 2], sizes = [8, 1], strides = [1, 1]} : vector<8x128xf32> to vector<8x1xf32>
    %938 = vector.extract_strided_slice %931 {offsets = [0, 125], sizes = [8, 1], strides = [1, 1]} : vector<8x128xf32> to vector<8x1xf32>
    %c0_541 = arith.constant 0 : index
    %c6_542 = arith.constant 6 : index
    %939 = vector.load %arg7[%c0_541, %c6_542] : memref<32x144xf32, #tpu.memory_space<vmem>>, vector<8x1xf32>
    tpu.vector_store %arg7[%c0_541, %c6_542], %937 {strides = array<i32>} : memref<32x144xf32, #tpu.memory_space<vmem>>, vector<8x1xf32>,
    %c0_543 = arith.constant 0 : index
    %c137_544 = arith.constant 137 : index
    %940 = vector.load %arg7[%c0_543, %c137_544] : memref<32x144xf32, #tpu.memory_space<vmem>>, vector<8x1xf32>
    tpu.vector_store %arg7[%c0_543, %c137_544], %938 {strides = array<i32>} : memref<32x144xf32, #tpu.memory_space<vmem>>, vector<8x1xf32>,
    %941 = vector.extract_strided_slice %931 {offsets = [0, 3], sizes = [8, 1], strides = [1, 1]} : vector<8x128xf32> to vector<8x1xf32>
    %942 = vector.extract_strided_slice %931 {offsets = [0, 124], sizes = [8, 1], strides = [1, 1]} : vector<8x128xf32> to vector<8x1xf32>
    %c0_545 = arith.constant 0 : index
    %c5_546 = arith.constant 5 : index
    %943 = vector.load %arg7[%c0_545, %c5_546] : memref<32x144xf32, #tpu.memory_space<vmem>>, vector<8x1xf32>
    tpu.vector_store %arg7[%c0_545, %c5_546], %941 {strides = array<i32>} : memref<32x144xf32, #tpu.memory_space<vmem>>, vector<8x1xf32>,
    %c0_547 = arith.constant 0 : index
    %c138_548 = arith.constant 138 : index
    %944 = vector.load %arg7[%c0_547, %c138_548] : memref<32x144xf32, #tpu.memory_space<vmem>>, vector<8x1xf32>
    tpu.vector_store %arg7[%c0_547, %c138_548], %942 {strides = array<i32>} : memref<32x144xf32, #tpu.memory_space<vmem>>, vector<8x1xf32>,
    %c0_549 = arith.constant 0 : index
    %c5_550 = arith.constant 5 : index
    %945 = vector.load %arg7[%c0_549, %c5_550] : memref<32x144xf32, #tpu.memory_space<vmem>>, vector<8x128xf32>
    %946 = arith.truncf %945 : vector<8x128xf32> to vector<8x128xbf16>
    %c46 = arith.constant 46 : index
    %c0_551 = arith.constant 0 : index
    %c0_552 = arith.constant 0 : index
    %947 = vector.load %arg3[%c46, %c0_551, %c0_552] : memref<53x32x32xbf16, #tpu.memory_space<vmem>>, vector<1x32x32xbf16>
    %948 = vector.shape_cast %947 : vector<1x32x32xbf16> to vector<32x32xbf16>
    %949 = vector.extract_strided_slice %948 {offsets = [0, 0], sizes = [1, 8], strides = [1, 1]} : vector<32x32xbf16> to vector<1x8xbf16>
    %cst_553 = arith.constant dense<0.000000e+00> : vector<1x128xf32>
    %950 = tpu.matmul %949, %946, %cst_553 {dimension_numbers = #tpu.dot_dimension_numbers<[1], [0], [0], [1], [0, 0, 1, 1], [], []>} : vector<1x8xbf16>, vector<8x128xbf16>, vector<1x128xf32> -> vector<1x128xf32>
    %c0_554 = arith.constant 0 : index
    %c6_555 = arith.constant 6 : index
    %951 = vector.load %arg7[%c0_554, %c6_555] : memref<32x144xf32, #tpu.memory_space<vmem>>, vector<8x128xf32>
    %952 = arith.truncf %951 : vector<8x128xf32> to vector<8x128xbf16>
    %c47 = arith.constant 47 : index
    %c0_556 = arith.constant 0 : index
    %c0_557 = arith.constant 0 : index
    %953 = vector.load %arg3[%c47, %c0_556, %c0_557] : memref<53x32x32xbf16, #tpu.memory_space<vmem>>, vector<1x32x32xbf16>
    %954 = vector.shape_cast %953 : vector<1x32x32xbf16> to vector<32x32xbf16>
    %955 = vector.extract_strided_slice %954 {offsets = [0, 0], sizes = [1, 8], strides = [1, 1]} : vector<32x32xbf16> to vector<1x8xbf16>
    %cst_558 = arith.constant dense<0.000000e+00> : vector<1x128xf32>
    %956 = tpu.matmul %955, %952, %cst_558 {dimension_numbers = #tpu.dot_dimension_numbers<[1], [0], [0], [1], [0, 0, 1, 1], [], []>} : vector<1x8xbf16>, vector<8x128xbf16>, vector<1x128xf32> -> vector<1x128xf32>
    %957 = arith.addf %950, %956 : vector<1x128xf32>
    %c0_559 = arith.constant 0 : index
    %c7_560 = arith.constant 7 : index
    %958 = vector.load %arg7[%c0_559, %c7_560] : memref<32x144xf32, #tpu.memory_space<vmem>>, vector<8x128xf32>
    %959 = arith.truncf %958 : vector<8x128xf32> to vector<8x128xbf16>
    %c48 = arith.constant 48 : index
    %c0_561 = arith.constant 0 : index
    %c0_562 = arith.constant 0 : index
    %960 = vector.load %arg3[%c48, %c0_561, %c0_562] : memref<53x32x32xbf16, #tpu.memory_space<vmem>>, vector<1x32x32xbf16>
    %961 = vector.shape_cast %960 : vector<1x32x32xbf16> to vector<32x32xbf16>
    %962 = vector.extract_strided_slice %961 {offsets = [0, 0], sizes = [1, 8], strides = [1, 1]} : vector<32x32xbf16> to vector<1x8xbf16>
    %cst_563 = arith.constant dense<0.000000e+00> : vector<1x128xf32>
    %963 = tpu.matmul %962, %959, %cst_563 {dimension_numbers = #tpu.dot_dimension_numbers<[1], [0], [0], [1], [0, 0, 1, 1], [], []>} : vector<1x8xbf16>, vector<8x128xbf16>, vector<1x128xf32> -> vector<1x128xf32>
    %964 = arith.addf %957, %963 : vector<1x128xf32>
    %c0_564 = arith.constant 0 : index
    %c8_565 = arith.constant 8 : index
    %965 = vector.load %arg7[%c0_564, %c8_565] : memref<32x144xf32, #tpu.memory_space<vmem>>, vector<8x128xf32>
    %966 = arith.truncf %965 : vector<8x128xf32> to vector<8x128xbf16>
    %c49 = arith.constant 49 : index
    %c0_566 = arith.constant 0 : index
    %c0_567 = arith.constant 0 : index
    %967 = vector.load %arg3[%c49, %c0_566, %c0_567] : memref<53x32x32xbf16, #tpu.memory_space<vmem>>, vector<1x32x32xbf16>
    %968 = vector.shape_cast %967 : vector<1x32x32xbf16> to vector<32x32xbf16>
    %969 = vector.extract_strided_slice %968 {offsets = [0, 0], sizes = [1, 8], strides = [1, 1]} : vector<32x32xbf16> to vector<1x8xbf16>
    %cst_568 = arith.constant dense<0.000000e+00> : vector<1x128xf32>
    %970 = tpu.matmul %969, %966, %cst_568 {dimension_numbers = #tpu.dot_dimension_numbers<[1], [0], [0], [1], [0, 0, 1, 1], [], []>} : vector<1x8xbf16>, vector<8x128xbf16>, vector<1x128xf32> -> vector<1x128xf32>
    %971 = arith.addf %964, %970 : vector<1x128xf32>
    %c0_569 = arith.constant 0 : index
    %c9_570 = arith.constant 9 : index
    %972 = vector.load %arg7[%c0_569, %c9_570] : memref<32x144xf32, #tpu.memory_space<vmem>>, vector<8x128xf32>
    %973 = arith.truncf %972 : vector<8x128xf32> to vector<8x128xbf16>
    %c50 = arith.constant 50 : index
    %c0_571 = arith.constant 0 : index
    %c0_572 = arith.constant 0 : index
    %974 = vector.load %arg3[%c50, %c0_571, %c0_572] : memref<53x32x32xbf16, #tpu.memory_space<vmem>>, vector<1x32x32xbf16>
    %975 = vector.shape_cast %974 : vector<1x32x32xbf16> to vector<32x32xbf16>
    %976 = vector.extract_strided_slice %975 {offsets = [0, 0], sizes = [1, 8], strides = [1, 1]} : vector<32x32xbf16> to vector<1x8xbf16>
    %cst_573 = arith.constant dense<0.000000e+00> : vector<1x128xf32>
    %977 = tpu.matmul %976, %973, %cst_573 {dimension_numbers = #tpu.dot_dimension_numbers<[1], [0], [0], [1], [0, 0, 1, 1], [], []>} : vector<1x8xbf16>, vector<8x128xbf16>, vector<1x128xf32> -> vector<1x128xf32>
    %978 = arith.addf %971, %977 : vector<1x128xf32>
    %c0_574 = arith.constant 0 : index
    %c10_575 = arith.constant 10 : index
    %979 = vector.load %arg7[%c0_574, %c10_575] : memref<32x144xf32, #tpu.memory_space<vmem>>, vector<8x128xf32>
    %980 = arith.truncf %979 : vector<8x128xf32> to vector<8x128xbf16>
    %c51 = arith.constant 51 : index
    %c0_576 = arith.constant 0 : index
    %c0_577 = arith.constant 0 : index
    %981 = vector.load %arg3[%c51, %c0_576, %c0_577] : memref<53x32x32xbf16, #tpu.memory_space<vmem>>, vector<1x32x32xbf16>
    %982 = vector.shape_cast %981 : vector<1x32x32xbf16> to vector<32x32xbf16>
    %983 = vector.extract_strided_slice %982 {offsets = [0, 0], sizes = [1, 8], strides = [1, 1]} : vector<32x32xbf16> to vector<1x8xbf16>
    %cst_578 = arith.constant dense<0.000000e+00> : vector<1x128xf32>
    %984 = tpu.matmul %983, %980, %cst_578 {dimension_numbers = #tpu.dot_dimension_numbers<[1], [0], [0], [1], [0, 0, 1, 1], [], []>} : vector<1x8xbf16>, vector<8x128xbf16>, vector<1x128xf32> -> vector<1x128xf32>
    %985 = arith.addf %978, %984 : vector<1x128xf32>
    %c0_579 = arith.constant 0 : index
    %c11_580 = arith.constant 11 : index
    %986 = vector.load %arg7[%c0_579, %c11_580] : memref<32x144xf32, #tpu.memory_space<vmem>>, vector<8x128xf32>
    %987 = arith.truncf %986 : vector<8x128xf32> to vector<8x128xbf16>
    %c52 = arith.constant 52 : index
    %c0_581 = arith.constant 0 : index
    %c0_582 = arith.constant 0 : index
    %988 = vector.load %arg3[%c52, %c0_581, %c0_582] : memref<53x32x32xbf16, #tpu.memory_space<vmem>>, vector<1x32x32xbf16>
    %989 = vector.shape_cast %988 : vector<1x32x32xbf16> to vector<32x32xbf16>
    %990 = vector.extract_strided_slice %989 {offsets = [0, 0], sizes = [1, 8], strides = [1, 1]} : vector<32x32xbf16> to vector<1x8xbf16>
    %cst_583 = arith.constant dense<0.000000e+00> : vector<1x128xf32>
    %991 = tpu.matmul %990, %987, %cst_583 {dimension_numbers = #tpu.dot_dimension_numbers<[1], [0], [0], [1], [0, 0, 1, 1], [], []>} : vector<1x8xbf16>, vector<8x128xbf16>, vector<1x128xf32> -> vector<1x128xf32>
    %992 = arith.addf %985, %991 : vector<1x128xf32>
    %c0_584 = arith.constant 0 : index
    %c20_585 = arith.constant 20 : index
    %993 = vector.load %arg4[%c0_584, %c20_585] : memref<32x21xf32, #tpu.memory_space<vmem>>, vector<1x1xf32>
    %994 = vector.broadcast %993 : vector<1x1xf32> to vector<1x128xf32>
    %995 = arith.addf %992, %994 : vector<1x128xf32>
    %996 = math.tanh %995 : vector<1x128xf32>
    %c0_586 = arith.constant 0 : index
    %c0_587 = arith.constant 0 : index
    %c0_588 = arith.constant 0 : index
    %997 = vector.load %arg6[%c0_586, %c0_587, %c0_588] : memref<1x1x128xf32, #tpu.memory_space<vmem>>, vector<1x1x128xf32>
    %998 = vector.shape_cast %997 : vector<1x1x128xf32> to vector<1x128xf32>
    %999 = vector.shape_cast %996 : vector<1x128xf32> to vector<1x1x128xf32>
    tpu.vector_store %arg6[%c0_586, %c0_587, %c0_588], %999 {strides = array<i32>} : memref<1x1x128xf32, #tpu.memory_space<vmem>>, vector<1x1x128xf32>,
    return
  }
  func.func @transform_0(%arg0: i32) -> (i32, i32, i32) {
    %c0_i32 = arith.constant 0 : i32
    %c0_i32_0 = arith.constant 0 : i32
    %c0_i32_1 = arith.constant 0 : i32
    return %arg0, %c0_i32, %c0_i32_0 : i32, i32, i32
  }
  func.func @transform_1(%arg0: i32) -> (i32, i32, i32) {
    %c0_i32 = arith.constant 0 : i32
    %c0_i32_0 = arith.constant 0 : i32
    %c0_i32_1 = arith.constant 0 : i32
    return %arg0, %c0_i32, %c0_i32_0 : i32, i32, i32
  }
  func.func @transform_2(%arg0: i32) -> (i32, i32, i32) {
    %c0_i32 = arith.constant 0 : i32
    %c0_i32_0 = arith.constant 0 : i32
    %c0_i32_1 = arith.constant 0 : i32
    %c0_i32_2 = arith.constant 0 : i32
    return %c0_i32, %c0_i32_0, %c0_i32_1 : i32, i32, i32
  }
  func.func @transform_3(%arg0: i32) -> (i32, i32) {
    %c0_i32 = arith.constant 0 : i32
    %c0_i32_0 = arith.constant 0 : i32
    %c0_i32_1 = arith.constant 0 : i32
    return %c0_i32, %c0_i32_0 : i32, i32
  }
  func.func @transform_4(%arg0: i32) -> (i32, i32, i32) {
    %c0_i32 = arith.constant 0 : i32
    %c0_i32_0 = arith.constant 0 : i32
    %c0_i32_1 = arith.constant 0 : i32
    %c0_i32_2 = arith.constant 0 : i32
    return %c0_i32, %c0_i32_0, %c0_i32_1 : i32, i32, i32
  }
  func.func @transform_5(%arg0: i32) -> (i32, i32, i32) {
    %c0_i32 = arith.constant 0 : i32
    %c0_i32_0 = arith.constant 0 : i32
    %c0_i32_1 = arith.constant 0 : i32
    return %arg0, %c0_i32, %c0_i32_0 : i32, i32, i32
  }
}

</mosaic_0001>

<bundles_post_ra>
// kernel: fwd.1
= control target key start
LH: loop header
LB: loop body
LE: loop exit
PB: predicated region body
PF: predicated region fallthrough
CT: control target
= control target key end

     0   :  { %s7375_s0 = inlined_call_operand.vmem [shape: f32[2,4,32], index: 0, kind: input, shape index: {}]   ;;  %s7376_s1 = inlined_call_operand.vmem [shape: f32[2,16,1], index: 1, kind: input, shape index: {}]   ;;  %s7377_s2 = inlined_call_operand.vmem [shape: bf16[53,32,32], index: 2, kind: input, shape index: {}]   ;;  %s7378_s3 = inlined_call_operand.vmem [shape: f32[32,21], index: 3, kind: input, shape index: {}]   ;;  %s7379_s4 = inlined_call_operand.vmem [shape: bf16[2,64,128], index: 4, kind: input, shape index: {}]   ;;  %s7380_s5 = inlined_call_operand.hbm [shape: f32[2,1,128], index: 5, kind: output, shape index: {}]  }
   0x1   :  { %7409 = sst [smem:[#allocation6_spill]] %s7375_s0 }
   0x2   :  { %7410 = sst [smem:[#allocation7_spill]] %s7376_s1 }
   0x3   :  { %10 = vsyncpa [#allocation4], 0 }
   0x4   :  { %12 = vsyncpa [#allocation4 + $0x1], 0  ;;  %s6307_s18 = smov 0   ;;  %s6309_s19 = smov 0  }
   0x5   :  { %s6311_s20 = smov 0   ;;  %s6313_s21 = smov 0  }
   0x6 LB: > { %s6328_s22 = sadd.s32 4294967295, %s6237_s21   ;;  %s5035_s23 = sadd.s32 4294967294, %s6237_s21   ;;  %s6237_s21 = sphi %s6313_s21, %s7432_s21   ;;  %s6233_s20 = sphi %s6311_s20, %s7431_s20   ;;  %s6229_s19 = sphi %s6309_s19, %s7430_s19   ;;  %s6225_s18 = sphi %s6307_s18, %s7429_s18  }
   0x7   : > { %s6332_s24 = sadd.s32 1, %s6237_s21   ;;  %s140_s25 = sadd.s32 1, %s6233_s20 }
   0x8   : > { %s137_s26 = ssub.s32 %s6237_s21, %s6332_s24  ;;  %p150_p0 = scmp.ne.s32.totalorder %s6233_s20, %s6229_s19 }
   0x9   : > { %p138_p1 = scmp.eq.s32.totalorder %s137_s26, 0  ;;  %p151_p2 = scmp.eq.s32.totalorder %s6328_s22, 1 }
   0xa   : > { %p156_p3 = scmp.ne.s32.totalorder %s6229_s19, %s6225_s18  ;;  %p157_p4 = scmp.eq.s32.totalorder %s5035_s23, 1 }
   0xb   : > { %s6343_s27 = scalar_select %p138_p1, %s6233_s20, %s140_s25  }
   0xc   : > { %p6345_p5 = por %p151_p2, %p150_p0  ;;  %p6349_p6 = por %p157_p4, %p156_p3 }
   0xd   : > { %p5038_p7 = scmp.ge.s32.totalorder %s6237_s21, 1  ;;  %p199_p8 = scmp.lt.s32.totalorder %s6237_s21, 3 }
   0xf   : > { %p200_p9 = pnand %p5038_p7, %p199_p8 }
  0x10   : > { %p230_p10 = scmp.lt.s32.totalorder (!%p200_p9), %s6328_s22, 1  ;;  %s7413_s0 = sld [smem:[#allocation6_spill]] (!%p200_p9)  ;;  %v6246_v1 = vmov (!%p200_p9), 0.0   ;;  %vm6247_vm0 = vmmov (!%p200_p9), 0   ;;  %v6025_v4 = vld [vmem:[%s7377_s2 + $0x150] sm:$0xff] (!%p200_p9)   ;;  %vm262_vm1 = vcmask (!%p200_p9), 130048  }
  0x11   : > { %203 = sbr.rel (%p200_p9) target bundleno = 6499 (0x1963), region = 40  ;;  %s7407_s10 = smov (!%p200_p9), 8   ;;  %5439 = vmatprep.subr.bf16.mxu0 (!%p200_p9), %v6246_v1  ;;  %5441 = vmatprep.mubr.msk.bf16.mxu0 (!%p200_p9), %vm6247_vm0, %v6246_v1  ;;  %v5050_v6 = vld [vmem:[%s7377_s2 + $0x250] sm:$0xf] (!%p200_p9)  ;;  %vm467_vm2 = vcmask (!%p200_p9), 322624   ;;  %vm472_vm3 = vcmask (!%p200_p9), 60472  }
  0x12   : > { %s7403_s11 = smov (!%p200_p9), 10   ;;  %s7401_s12 = smov (!%p200_p9), 6   ;;  %5445 = vmatprep.subr.bf16.mxu1 (!%p200_p9), %v6246_v1  ;;  %5447 = vmatprep.mubr.msk.bf16.mxu1 (!%p200_p9), %vm6247_vm0, %v6246_v1  ;;  %vm477_vm4 = vcmask (!%p200_p9), 331072   ;;  %vm482_vm5 = vcmask (!%p200_p9), 52272   ;;  %vm487_vm6 = vcmask (!%p200_p9), 339272   ;;  %vm492_vm7 = vcmask (!%p200_p9), 44072  }
  0x13   : > { %s7395_s13 = smov (!%p200_p9), 4   ;;  %s7393_s14 = smov (!%p200_p9), 12   ;;  %vm497_vm8 = vcmask (!%p200_p9), 347472   ;;  %v6026_v13 = vld [vmem:[%s7377_s2 + $0x10] sm:$0xff] (!%p200_p9)   ;;  %vm523_vm9 = vcmask (!%p200_p9), 31744   ;;  %v6407_v17 = vld [vmem:[%s7378_s3] sm:$0xff] (!%p200_p9) }
  0x14   : > { %s7391_s15 = smov (!%p200_p9), 2   ;;  %s7389_s16 = smov (!%p200_p9), 14   ;;  %v6412_v18 = vld [vmem:[%s7378_s3 + $0x8] sm:$0xff] (!%p200_p9)  ;;  %v6255_v19 = vmov (!%p200_p9), 0   ;;  %v6421_v20 = vld [vmem:[%s7378_s3 + $0x18] sm:$0xff] (!%p200_p9)  ;;  %v6426_v21 = vld [vmem:[%s7378_s3 + $0x10] sm:$0xff] (!%p200_p9) }
  0x15   : > { %s7414_s1 = sld [smem:[#allocation7_spill]] (!%p200_p9)  ;;  %s7381_s23 = smov (!%p200_p9), 123   ;;  %5995 = vset.pattern.permute.xlu1 (!%p200_p9), %v6255_v19  ;;  %5994 = vset.pattern.permute.xlu0 (!%p200_p9), %v6255_v19  ;;  %vm530_vm10 = vcmask (!%p200_p9), 1041408   ;;  %v6027_v31 = vld [vmem:[%s7377_s2 + $0x18] sm:$0xff] (!%p200_p9)   ;;  %v6028_v34 = vld [vmem:[%s7377_s2] sm:$0xff] (!%p200_p9)   ;;  %v6029_v37 = vld [vmem:[%s7377_s2 + $0x8] sm:$0xff] (!%p200_p9)  }
  0x16   : > { %s7383_s25 = smov (!%p200_p9), 122   ;;  %s7387_s7 = smov (!%p200_p9), 118   ;;  %v6030_v38 = vld [vmem:[%s7377_s2 + $0x20] sm:$0xff] (!%p200_p9)   ;;  %v6031_v41 = vld [vmem:[%s7377_s2 + $0x28] sm:$0xff] (!%p200_p9)   ;;  %v6032_v42 = vld [vmem:[%s7377_s2 + $0x30] sm:$0xff] (!%p200_p9)   ;;  %vm1200_vm15 = vcmask (!%p200_p9), 326720  }
  0x17   : > { %s7385_s8 = smov (!%p200_p9), 117   ;;  %v6033_v45 = vld [vmem:[%s7377_s2 + $0x38] sm:$0xff] (!%p200_p9)   ;;  %v6034_v46 = vld [vmem:[%s7377_s2 + $0x40] sm:$0xff] (!%p200_p9)   ;;  %v6035_v49 = vld [vmem:[%s7377_s2 + $0x48] sm:$0xff] (!%p200_p9)  }
  0x18   : > { %s231_s30 = scalar_select %p230_p10, %s6328_s22, 1  ;;  %v6036_v50 = vld [vmem:[%s7377_s2 + $0x50] sm:$0xff]   ;;  %v6037_v53 = vld [vmem:[%s7377_s2 + $0x58] sm:$0xff]   ;;  %v6038_v54 = vld [vmem:[%s7377_s2 + $0x60] sm:$0xff]  }
  0x19   : > { %v6039_v56 = vld [vmem:[%s7377_s2 + $0x68] sm:$0xff]  }
  0x1a   : > { %s5039_s6 = sshll.u32 %s231_s30, 2  ;;  %s5291_s17 = sshll.u32 %s231_s30, 4 }
  0x1b   : > { %s233_s9 = scalar_lea.vmem %s7413_s0, %s5039_s6  ;;  %s238_s26 = scalar_lea.vmem %s7414_s1, %s5291_s17 }
  0x1c   : > { %v240_v0 = vld [vmem:[%s233_s9] sm:$0xf]  ;;  %v242_v3 = vld [vmem:[%s238_s26 + $0x8] sm:$0xff]  ;;  %s7405_s6 = smov 121   ;;  %s7397_s30 = smov 119  }
  0x1d   : > { %464 = vrot.lane.b32.xlu0 %v240_v0, %s7407_s10  ;;  %474 = vrot.lane.b32.xlu1 %v240_v0, %s7403_s11  ;;  %v241_v2 = vld [vmem:[%s238_s26] sm:$0xff]  ;;  %s7399_s26 = smov 120   ;;  %s7417_s9 = smov 118  }
  0x1e   : > { %v6379_v5 = vpack.c.bf16 %v242_v3, %v241_v2  ;;  %s7418_s17 = smov 117   ;;  %s6272_s1 = smov 111  }
  0x20   : > { %5440 = vmatpush3.bf16.msra.mxu0 %v6379_v5  ;;  %5446 = vmatpush3.bf16.msra.mxu1 %v6379_v5 }
  0x21   : > { %469 = vrot.lane.b32.xlu0 %v240_v0, %s7401_s12  ;;  %479 = vrot.lane.b32.xlu1 %v240_v0, %s7395_s13 }
  0x22   : > { %5451 = vmatprep.subr.bf16.mxu0 %v6246_v1  ;;  %5457 = vmatprep.subr.bf16.mxu1 %v6246_v1 }
  0x23   : > { %5442 = vmatmul.mubr.msk.bf16.vlgmr.msra.gmra.mrb[0].mxu0 %vm262_vm1, %v6025_v4 }
  0x24   : > { %5452 = vmatpush3.bf16.msra.mxu0 %v6379_v5  ;;  %5453 = vmatprep.mubr.msk.bf16.mxu0 %vm6247_vm0, %v6246_v1 }
  0x25   : > { %484 = vrot.lane.b32.xlu0 %v240_v0, %s7393_s14  ;;  %489 = vrot.lane.b32.xlu1 %v240_v0, %s7391_s15 }
  0x29   : > { %494 = vrot.lane.b32.xlu0 %v240_v0, %s7389_s16 }
  0x2b   : > { %5454 = vmatmul.mubr.msk.bf16.vlgmr.msra.gmra.mrb[4].mxu0 %vm262_vm1, %v5050_v6 }
  0x2c   : > { %5465 = vmatprep.mubr.msk.bf16.mxu0 %vm523_vm9, %v6026_v13 }
  0x8f   : > { %v465_v7 = vpop.permute.xlu0 %464  ;;  %v475_v8 = vpop.permute.xlu1 %474 }
  0x90   : > { %468 = vst.msk [vmem:[#allocation2] sm:$0xf] %vm467_vm2, %v465_v7  ;;  %vm1217_vm2 = vcmask 64568  }
  0x93   : > { %v470_v9 = vpop.permute.xlu0 %469  ;;  %v480_v10 = vpop.permute.xlu1 %479 }
  0x94   : > { %473 = vst.msk [vmem:[#allocation2] sm:$0xf] %vm472_vm3, %v470_v9  ;;  %vm1234_vm3 = vcmask 335168  }
  0x95   : > { %478 = vst.msk [vmem:[#allocation2] sm:$0xf] %vm477_vm4, %v475_v8  ;;  %vm1251_vm4 = vcmask 56368  }
  0x96   : > { %483 = vst.msk [vmem:[#allocation2] sm:$0xf] %vm482_vm5, %v480_v10  ;;  %vm1268_vm5 = vcmask 343368  }
  0x97   : > { %v485_v11 = vpop.permute.xlu0 %484  ;;  %v490_v12 = vpop.permute.xlu1 %489 }
  0x98   : > { %488 = vst.msk [vmem:[#allocation2] sm:$0xf] %vm487_vm6, %v485_v11  ;;  %vm1285_vm6 = vcmask 48168  }
  0x99   : > { %493 = vst.msk [vmem:[#allocation2] sm:$0xf] %vm492_vm7, %v490_v12  ;;  %vm1302_vm7 = vcmask 351568  }
  0x9b   : > { %v495_v14 = vpop.permute.xlu0 %494 }
  0x9c   : > { %498 = vst.msk [vmem:[#allocation2] sm:$0xf] %vm497_vm8, %v495_v14  ;;  %vm1341_vm8 = vcmask 261120  }
  0xa3   : > { %v499_v15 = vld [vmem:[#allocation2] sm:$0xf] }
  0xa4   : > { %v500_v16 = vpack.c.bf16 %v499_v15, %v499_v15 }
  0xa6   : > { %593 = vrot.lane.b32.xlu0 %v500_v16, %s7381_s23  ;;  %521 = vrot.lane.b32.xlu1 %v500_v16, %s7383_s25  ;;  %s7421_s25 = smov 4   ;;  %s5288_s23 = sshll.u32 %s6328_s22, 4 }
  0xa7   : > { %s6276_s22 = smov [#allocation3]  }
  0xaa   : > { %747 = vrot.lane.b32.xlu0 %v500_v16, %s7399_s26  ;;  %668 = vrot.lane.b32.xlu1 %v500_v16, %s7405_s6 }
  0xae   : > { %905 = vrot.lane.b32.xlu0 %v500_v16, %s7387_s7  ;;  %826 = vrot.lane.b32.xlu1 %v500_v16, %s7397_s30  ;;  %s7415_s7 = smov 122  }
  0xb2   : > { %984 = vrot.lane.b32.xlu1 %v500_v16, %s7385_s8  ;;  %1054 = vperm.xlu0 %5994, %v6407_v17   ;;  %s7416_s8 = smov 123  }
  0xb6   : > { %1059 = vperm.xlu1 %5995, %v6412_v18   ;;  %1069 = vperm.xlu0 %5994, %v6421_v20  }
  0xba   : > { %1064 = vperm.xlu1 %5995, %v6426_v21  }
  0xf6   : > { %v6430_v22 = vpop.f32.mrb[0].mxu0 }
  0xf7   : > { %v5443_v23 = vpop.f32.mrb[1].mxu0 }
  0xf8   : > { %v6432_v24 = vpop.f32.mrb[2].mxu0 }
  0xf9   : > { %v5444_v25 = vpop.f32.mrb[3].mxu0 }
  0xfe   : > { %v6434_v26 = vpop.f32.mrb[4].mxu0 }
  0xff   : > { %v5455_v27 = vpop.f32.mrb[5].mxu0 }
 0x100   : > { %v412_v28 = vpop.f32.mrb[6].mxu0 }
 0x101   : > { %v5456_v32 = vpop.f32.mrb[7].mxu0 }
 0x118   : > { %v522_v29 = vpop.permute.xlu1 %521  ;;  %v594_v33 = vpop.permute.xlu0 %593 }
 0x119   : > { %5911 = vmatprep.subr.msk.bf16.mxu0 %vm530_vm10, %v522_v29  ;;  %v532_v30 = vsel %vm530_vm10, %v522_v29, 0  ;;  %v602_v35 = vsel %vm530_vm10, %v594_v33, 0 }
 0x11a   : > { %5464 = vmatpush3.bf16.msra.mxu0 %v532_v30 }
 0x11b   : > { %5912 = vmatprep.subr.msk.bf16.mxu0 %vm530_vm10, %v594_v33 }
 0x11c   : > { %v669_v36 = vpop.permute.xlu1 %668  ;;  %v748_v40 = vpop.permute.xlu0 %747 }
 0x11d   : > { %5466 = vmatmul.mubr.msk.bf16.vlgmr.msra.gmra.mrb[8].mxu0 %vm523_vm9, %v6027_v31  ;;  %v677_v39 = vsel %vm530_vm10, %v669_v36, 0  ;;  %v756_v43 = vsel %vm530_vm10, %v748_v40, 0 }
 0x11e   : > { %5470 = vmatpush3.bf16.msra.mxu0 %v602_v35  ;;  %5471 = vmatprep.mubr.msk.bf16.mxu0 %vm523_vm9, %v6028_v34 }
 0x11f   : > { %5913 = vmatprep.subr.msk.bf16.mxu0 %vm530_vm10, %v669_v36 }
 0x120   : > { %v827_v44 = vpop.permute.xlu1 %826  ;;  %v906_v48 = vpop.permute.xlu0 %905 }
 0x121   : > { %v835_v47 = vsel %vm530_vm10, %v827_v44, 0  ;;  %v914_v51 = vsel %vm530_vm10, %v906_v48, 0 }
 0x124   : > { %v985_v52 = vpop.permute.xlu1 %984 }
 0x125   : > { %v993_v55 = vsel %vm530_vm10, %v985_v52, 0 }
 0x129   : > { %5472 = vmatmul.mubr.msk.bf16.vlgmr.msra.gmra.mrb[8].mxu0 %vm523_vm9, %v6029_v37 }
 0x12a   : > { %5476 = vmatpush3.bf16.msra.mxu0 %v677_v39  ;;  %5477 = vmatprep.mubr.msk.bf16.mxu0 %vm523_vm9, %v6030_v38 }
 0x12b   : > { %5914 = vmatprep.subr.msk.bf16.mxu0 %vm530_vm10, %v748_v40 }
 0x131   : > { %v1055_v58 = vpop.permute.xlu0 %1054 }
 0x135   : > { %5478 = vmatmul.mubr.msk.bf16.vlgmr.msra.gmra.mrb[8].mxu0 %vm523_vm9, %v6031_v41  ;;  %v1060_v57 = vpop.permute.xlu1 %1059  ;;  %v1070_v63 = vpop.permute.xlu0 %1069 }
 0x136   : > { %5482 = vmatpush3.bf16.msra.mxu0 %v756_v43  ;;  %5483 = vmatprep.mubr.msk.bf16.mxu0 %vm523_vm9, %v6032_v42 }
 0x137   : > { %5915 = vmatprep.subr.msk.bf16.mxu0 %vm530_vm10, %v827_v44 }
 0x139   : > { %v1065_v59 = vpop.permute.xlu1 %1064 }
 0x141   : > { %5484 = vmatmul.mubr.msk.bf16.vlgmr.msra.gmra.mrb[8].mxu0 %vm523_vm9, %v6033_v45 }
 0x142   : > { %5488 = vmatpush3.bf16.msra.mxu0 %v835_v47  ;;  %5489 = vmatprep.mubr.msk.bf16.mxu0 %vm523_vm9, %v6034_v46 }
 0x143   : > { %5916 = vmatprep.subr.msk.bf16.mxu0 %vm530_vm10, %v906_v48 }
 0x14d   : > { %5490 = vmatmul.mubr.msk.bf16.vlgmr.msra.gmra.mrb[8].mxu0 %vm523_vm9, %v6035_v49 }
 0x14e   : > { %5494 = vmatpush3.bf16.msra.mxu0 %v914_v51  ;;  %5495 = vmatprep.mubr.msk.bf16.mxu0 %vm523_vm9, %v6036_v50 }
 0x14f   : > { %5917 = vmatprep.subr.msk.bf16.mxu0 %vm530_vm10, %v985_v52 }
 0x159   : > { %5496 = vmatmul.mubr.msk.bf16.vlgmr.msra.gmra.mrb[8].mxu0 %vm523_vm9, %v6037_v53 }
 0x15a   : > { %5500 = vmatpush3.bf16.msra.mxu0 %v993_v55  ;;  %5501 = vmatprep.mubr.msk.bf16.mxu0 %vm523_vm9, %v6038_v54 }
 0x15b   : > { %5561 = vmatprep.subr.bf16.mxu0 %v6246_v1 }
 0x165   : > { %5502 = vmatmul.mubr.msk.bf16.vlgmr.msra.gmra.mrb[8].mxu0 %vm523_vm9, %v6039_v56 }
 0x166   : > { %5565 = vmatprep.mubr.msk.bf16.mxu0 %vm6247_vm0, %v6246_v1 }
 0x238   : > { %v5503_v60 = vpop.f32.mrb[8].mxu0 }
 0x239   : > { %v6505_v61 = vadd.f32 %v5503_v60, %v1065_v59  ;;  %v1029_v62 = vpop.f32.mrb[9].mxu0 }
 0x23a   : > { %v6507_v0 = vadd.f32 %v1055_v58, %v1029_v62  ;;  %v5504_v2 = vpop.f32.mrb[10].mxu0 }
 0x23b   : > { %v6510_v3 = vmul.f32 0.70710677, %v6505_v61  ;;  %v6512_v4 = vadd.f32 %v5504_v2, %v1070_v63  ;;  %v1032_v6 = vpop.f32.mrb[11].mxu0 }
 0x23c   : > { %v6515_v7 = vmul.f32 0.70710677, %v6507_v0  ;;  %v6517_v8 = vadd.f32 %v1060_v57, %v1032_v6 }
 0x23d   : > { %v1090_v9 = vand.u32 2147483647, %v6510_v3  ;;  %v6521_v10 = vmul.f32 0.70710677, %v6512_v4  ;;  %vm1082_vm11 = vcmp.ge.f32.partialorder %v6510_v3, 0.0 }
 0x23e   : > { %v1088_v11 = vand.u32 2147483647, %v6515_v7  ;;  %v6525_v12 = vmul.f32 0.70710677, %v6517_v8  ;;  %vm1080_vm13 = vcmp.ge.f32.partialorder %v6515_v7, 0.0 }
 0x23f   : > { %v1094_v13 = vmul.f32 0.3275911, %v1090_v9  ;;  %v1091_v15 = vand.u32 2147483647, %v6521_v10  ;;  %v1146_v31 = vsub.f32 0.0, %v1090_v9  ;;  %vm1083_vm12 = vcmp.ge.f32.partialorder %v6521_v10, 0.0 }
 0x240   : > { %v1092_v14 = vmul.f32 0.3275911, %v1088_v11  ;;  %v1089_v23 = vand.u32 2147483647, %v6525_v12  ;;  %v1144_v58 = vsub.f32 0.0, %v1088_v11  ;;  %v1175_v10 = vmul.f32 0.5, %v6512_v4 }
 0x241   : > { %v1098_v16 = vadd.f32 1.0, %v1094_v13  ;;  %v1095_v27 = vmul.f32 0.3275911, %v1091_v15  ;;  %v1150_v33 = vmul.f32 %v1146_v31, %v1090_v9  ;;  %v1147_v34 = vsub.f32 0.0, %v1091_v15 }
 0x242   : > { %v1096_v25 = vadd.f32 1.0, %v1092_v14  ;;  %v1093_v28 = vmul.f32 0.3275911, %v1089_v23  ;;  %v1148_v9 = vmul.f32 %v1144_v58, %v1088_v11  ;;  %v1145_v13 = vsub.f32 0.0, %v1089_v23 }
 0x243   : > { %6081 = vrcp.f32 %v1098_v16  ;;  %v1099_v29 = vadd.f32 1.0, %v1095_v27  ;;  %v1156_v40 = vmul.f32 1.442695, %v1150_v33  ;;  %v1151_v42 = vmul.f32 %v1147_v34, %v1091_v15 }
 0x244   : > { %6083 = vrcp.f32 %v1096_v25  ;;  %v1097_v30 = vadd.f32 1.0, %v1093_v28  ;;  %v1149_v31 = vmul.f32 %v1145_v13, %v1089_v23  ;;  %vm1081_vm14 = vcmp.ge.f32.partialorder %v6525_v12, 0.0 }
 0x245   : > { %6085 = vrcp.f32 %v1099_v29  ;;  %v1158_v50 = vmul.f32 1.442695, %v1151_v42  ;;  %v1174_v42 = vmul.f32 0.5, %v6505_v61 }
 0x246   : > { %6087 = vrcp.f32 %v1097_v30  ;;  %v1152_v30 = vmul.f32 1.442695, %v1148_v9 }
 0x247   : > { %6089 = vpow2.f32 %v1156_v40 }
 0x248   : > { %6091 = vpow2.f32 %v1158_v50 }
 0x249   : > { %6093 = vpow2.f32 %v1152_v30 }
 0x24d   : > { %v6082_v32 = vpop.eup %6081 }
 0x24e   : > { %v6529_v35 = vpop.eup %6083  ;;  %v1110_v36 = vmul.f32 1.0614054, %v6082_v32 }
 0x24f   : > { %v1108_v37 = vmul.f32 1.0614054, %v6529_v35  ;;  %v6086_v39 = vpop.eup %6085 }
 0x250   : > { %v1114_v38 = vadd.f32 -1.4531521, %v1110_v36  ;;  %v1111_v44 = vmul.f32 1.0614054, %v6086_v39  ;;  %v6532_v45 = vpop.eup %6087 }
 0x251   : > { %v1112_v41 = vadd.f32 -1.4531521, %v1108_v37  ;;  %v1109_v49 = vmul.f32 1.0614054, %v6532_v45  ;;  %v6090_v16 = vpop.eup %6089  ;;  %v6256_v37 = vmov -1.0  }
 0x252   : > { %v1118_v43 = vmul.f32 %v6082_v32, %v1114_v38  ;;  %v1115_v48 = vadd.f32 -1.4531521, %v1111_v44  ;;  %v6092_v36 = vpop.eup %6091  ;;  %v1086_v38 = vsel %vm1082_vm11, 1.0, %v6256_v37  ;;  %v1087_v23 = vsel %vm1083_vm12, 1.0, %v6256_v37 }
 0x253   : > { %v1116_v47 = vmul.f32 %v6529_v35, %v1112_v41  ;;  %v1113_v53 = vadd.f32 -1.4531521, %v1109_v49  ;;  %v1154_v41 = vmul.f32 1.442695, %v1149_v31  ;;  %v6094_v61 = vpop.eup %6093 }
 0x254   : > { %v1122_v46 = vadd.f32 1.4214138, %v1118_v43  ;;  %v1119_v52 = vmul.f32 %v6086_v39, %v1115_v48 }
 0x255   : > { %v1120_v55 = vadd.f32 1.4214138, %v1116_v47  ;;  %v1117_v57 = vmul.f32 %v6532_v45, %v1113_v53  ;;  %6095 = vpow2.f32 %v1154_v41 }
 0x256   : > { %v1126_v51 = vmul.f32 %v6082_v32, %v1122_v46  ;;  %v1123_v56 = vadd.f32 1.4214138, %v1119_v52 }
 0x257   : > { %v1124_v63 = vmul.f32 %v6529_v35, %v1120_v55  ;;  %v1121_v6 = vadd.f32 1.4214138, %v1117_v57 }
 0x258   : > { %v1130_v54 = vadd.f32 -0.28449672, %v1126_v51  ;;  %v1127_v60 = vmul.f32 %v6086_v39, %v1123_v56 }
 0x259   : > { %v1128_v27 = vadd.f32 -0.28449672, %v1124_v63  ;;  %v1125_v29 = vmul.f32 %v6532_v45, %v1121_v6 }
 0x25a   : > { %v1134_v59 = vmul.f32 %v6082_v32, %v1130_v54  ;;  %v1131_v2 = vadd.f32 -0.28449672, %v1127_v60  ;;  %v1172_v60 = vmul.f32 0.5, %v6507_v0  ;;  %v6040_v0 = vld [vmem:[%s7377_s2 + $0x1b0] sm:$0xff]  }
 0x25b   : > { %v1129_v3 = vadd.f32 -0.28449672, %v1125_v29  ;;  %5448 = vmatmul.mubr.msk.bf16.vlgmr.msra.gmra.mrb[0].mxu1 %vm262_vm1, %v6040_v0  ;;  %v6047_v0 = vld [vmem:[%s7377_s2 + $0xa0] sm:$0xff]  }
 0x25c   : > { %v1138_v62 = vadd.f32 0.2548296, %v1134_v59  ;;  %v1135_v15 = vmul.f32 %v6086_v39, %v1131_v2  ;;  %v1173_v2 = vmul.f32 0.5, %v6517_v8  ;;  %5458 = vmatpush3.bf16.msra.mxu1 %v6379_v5  ;;  %5459 = vmatprep.mubr.msk.bf16.mxu1 %vm6247_vm0, %v6246_v1  ;;  %v5052_v8 = vld [vmem:[%s7377_s2 + $0x2b0] sm:$0xf] }
 0x25d   : > { %v1133_v48 = vmul.f32 %v6532_v45, %v1129_v3 }
 0x25e   : > { %v1142_v14 = vmul.f32 %v6082_v32, %v1138_v62  ;;  %v1139_v28 = vadd.f32 0.2548296, %v1135_v15  ;;  %v1132_v32 = vmul.f32 %v6529_v35, %v1128_v27 }
 0x25f   : > { %v1137_v52 = vadd.f32 0.2548296, %v1133_v48  ;;  %v6096_v4 = vpop.eup %6095 }
 0x260   : > { %v1162_v25 = vmul.f32 %v6090_v16, %v1142_v14  ;;  %v1143_v34 = vmul.f32 %v6086_v39, %v1139_v28  ;;  %v1136_v46 = vadd.f32 0.2548296, %v1132_v32 }
 0x261   : > { %v1141_v54 = vmul.f32 %v6532_v45, %v1137_v52  ;;  %v1085_v45 = vsel %vm1081_vm14, 1.0, %v6256_v37 }
 0x262   : > { %v1166_v33 = vsub.f32 1.0, %v1162_v25  ;;  %v1163_v40 = vmul.f32 %v6092_v36, %v1143_v34  ;;  %v1140_v50 = vmul.f32 %v6529_v35, %v1136_v46  ;;  %v1084_v35 = vsel %vm1080_vm13, 1.0, %v6256_v37 }
 0x263   : > { %v1161_v56 = vmul.f32 %v6096_v4, %v1141_v54  ;;  %5460 = vmatmul.mubr.msk.bf16.vlgmr.msra.gmra.mrb[4].mxu1 %vm262_vm1, %v5052_v8 }
 0x264   : > { %v1170_v11 = vmul.f32 %v1166_v33, %v1086_v38  ;;  %v1167_v44 = vsub.f32 1.0, %v1163_v40  ;;  %v1160_v53 = vmul.f32 %v6094_v61, %v1140_v50  ;;  %v6257_v61 = vmov 1  }
 0x265   : > { %v1165_v58 = vsub.f32 1.0, %v1161_v56  ;;  %5996 = vset.pattern.permute.xlu1 %v6257_v61  ;;  %5997 = vset.pattern.permute.xlu0 %v6257_v61 }
 0x266   : > { %v1178_v43 = vadd.f32 1.0, %v1170_v11  ;;  %v1171_v47 = vmul.f32 %v1167_v44, %v1087_v23  ;;  %v1164_v55 = vsub.f32 1.0, %v1160_v53 }
 0x267   : > { %v1169_v7 = vmul.f32 %v1165_v58, %v1085_v45 }
 0x268   : > { %v1182_v39 = vmul.f32 %v1178_v43, %v1174_v42  ;;  %v1179_v49 = vadd.f32 1.0, %v1171_v47  ;;  %v1168_v57 = vmul.f32 %v1164_v55, %v1084_v35  ;;  %v6041_v47 = vld [vmem:[%s7377_s2 + $0x80] sm:$0xff]  }
 0x269   : > { %v1177_v63 = vadd.f32 1.0, %v1169_v7  ;;  %5509 = vmatprep.mubr.msk.bf16.mxu1 %vm1341_vm8, %v6041_v47 }
 0x26a   : > { %1192 = vrot.lane.b32.xlu1 %v1182_v39, %s7407_s10  ;;  %v1183_v51 = vmul.f32 %v1179_v49, %v1175_v10  ;;  %v1176_v59 = vadd.f32 1.0, %v1168_v57 }
 0x26b   : > { %v1181_v12 = vmul.f32 %v1177_v63, %v1173_v2 }
 0x26c   : > { %1194 = vrot.lane.b32.xlu0 %v1183_v51, %s7407_s10  ;;  %v1180_v62 = vmul.f32 %v1176_v59, %v1172_v60  ;;  %v6044_v60 = vld [vmem:[%s7377_s2 + $0x78] sm:$0xff]  }
 0x26e   : > { %1209 = vrot.lane.b32.xlu1 %v1182_v39, %s7401_s12 }
 0x270   : > { %1211 = vrot.lane.b32.xlu0 %v1183_v51, %s7401_s12 }
 0x272   : > { %1226 = vrot.lane.b32.xlu1 %v1182_v39, %s7403_s11 }
 0x274   : > { %1228 = vrot.lane.b32.xlu0 %v1183_v51, %s7403_s11 }
 0x276   : > { %1243 = vrot.lane.b32.xlu1 %v1182_v39, %s7395_s13 }
 0x278   : > { %1245 = vrot.lane.b32.xlu0 %v1183_v51, %s7395_s13 }
 0x27a   : > { %1260 = vrot.lane.b32.xlu1 %v1182_v39, %s7393_s14 }
 0x27c   : > { %1262 = vrot.lane.b32.xlu0 %v1183_v51, %s7393_s14 }
 0x27e   : > { %1277 = vrot.lane.b32.xlu1 %v1182_v39, %s7391_s15 }
 0x280   : > { %1279 = vrot.lane.b32.xlu0 %v1183_v51, %s7391_s15 }
 0x282   : > { %1188 = vrot.lane.b32.xlu1 %v1180_v62, %s7407_s10 }
 0x284   : > { %1190 = vrot.lane.b32.xlu0 %v1181_v12, %s7407_s10 }
 0x286   : > { %1205 = vrot.lane.b32.xlu1 %v1180_v62, %s7401_s12 }
 0x288   : > { %1207 = vrot.lane.b32.xlu0 %v1181_v12, %s7401_s12 }
 0x28a   : > { %1222 = vrot.lane.b32.xlu1 %v1180_v62, %s7403_s11 }
 0x28c   : > { %1224 = vrot.lane.b32.xlu0 %v1181_v12, %s7403_s11 }
 0x28e   : > { %1239 = vrot.lane.b32.xlu1 %v1180_v62, %s7395_s13 }
 0x290   : > { %1241 = vrot.lane.b32.xlu0 %v1181_v12, %s7395_s13  ;;  %s7424_s13 = smov 14  }
 0x292   : > { %1256 = vrot.lane.b32.xlu1 %v1180_v62, %s7393_s14 }
 0x294   : > { %1258 = vrot.lane.b32.xlu0 %v1181_v12, %s7393_s14  ;;  %s6268_s14 = smov 115  }
 0x296   : > { %1273 = vrot.lane.b32.xlu1 %v1180_v62, %s7391_s15 }
 0x298   : > { %1275 = vrot.lane.b32.xlu0 %v1181_v12, %s7391_s15  ;;  %s7419_s15 = smov 120  }
 0x29a   : > { %1290 = vrot.lane.b32.xlu1 %v1180_v62, %s7389_s16  ;;  %v6045_v62 = vld [vmem:[%s7377_s2 + $0x90] sm:$0xff]  }
 0x29c   : > { %1292 = vrot.lane.b32.xlu0 %v1181_v12, %s7389_s16  ;;  %v6046_v12 = vld [vmem:[%s7377_s2 + $0x98] sm:$0xff]  }
 0x29e   : > { %1294 = vrot.lane.b32.xlu1 %v1182_v39, %s7389_s16 }
 0x2a0   : > { %1296 = vrot.lane.b32.xlu0 %v1183_v51, %s7389_s16  ;;  %s6260_s16 = smov 124  }
 0x2dc   : > { %v1193_v6 = vpop.permute.xlu1 %1192 }
 0x2dd   : > { %1203 = vst.msk [vmem:[#allocation2 + $0x20] sm:$0xff] %vm1200_vm15, %v1193_v6 }
 0x2de   : > { %v1195_v9 = vpop.permute.xlu0 %1194 }
 0x2df   : > { %1204 = vst.msk [vmem:[#allocation2 + $0x30] sm:$0xff] %vm1200_vm15, %v1195_v9  ;;  %v6048_v9 = vld [vmem:[%s7377_s2 + $0xa8] sm:$0xff]  }
 0x2e0   : > { %v1210_v13 = vpop.permute.xlu1 %1209 }
 0x2e1   : > { %1220 = vst.msk [vmem:[#allocation2 + $0x20] sm:$0xff] %vm1217_vm2, %v1210_v13  ;;  %v6049_v13 = vld [vmem:[%s7377_s2 + $0xb0] sm:$0xff]  }
 0x2e2   : > { %v1212_v5 = vpop.permute.xlu0 %1211 }
 0x2e3   : > { %1221 = vst.msk [vmem:[#allocation2 + $0x30] sm:$0xff] %vm1217_vm2, %v1212_v5 }
 0x2e4   : > { %v1227_v14 = vpop.permute.xlu1 %1226 }
 0x2e5   : > { %1237 = vst.msk [vmem:[#allocation2 + $0x20] sm:$0xff] %vm1234_vm3, %v1227_v14 }
 0x2e6   : > { %v1229_v15 = vpop.permute.xlu0 %1228 }
 0x2e7   : > { %1238 = vst.msk [vmem:[#allocation2 + $0x30] sm:$0xff] %vm1234_vm3, %v1229_v15  ;;  %v6050_v15 = vld [vmem:[%s7377_s2 + $0xb8] sm:$0xff]  }
 0x2e8   : > { %v1244_v16 = vpop.permute.xlu1 %1243 }
 0x2e9   : > { %1254 = vst.msk [vmem:[#allocation2 + $0x20] sm:$0xff] %vm1251_vm4, %v1244_v16  ;;  %v6051_v16 = vld [vmem:[%s7377_s2 + $0xc0] sm:$0xff]  }
 0x2ea   : > { %v1246_v25 = vpop.permute.xlu0 %1245 }
 0x2eb   : > { %1255 = vst.msk [vmem:[#allocation2 + $0x30] sm:$0xff] %vm1251_vm4, %v1246_v25 }
 0x2ec   : > { %v1261_v27 = vpop.permute.xlu1 %1260 }
 0x2ed   : > { %1271 = vst.msk [vmem:[#allocation2 + $0x20] sm:$0xff] %vm1268_vm5, %v1261_v27 }
 0x2ee   : > { %v1263_v28 = vpop.permute.xlu0 %1262 }
 0x2ef   : > { %1272 = vst.msk [vmem:[#allocation2 + $0x30] sm:$0xff] %vm1268_vm5, %v1263_v28  ;;  %v6052_v28 = vld [vmem:[%s7377_s2 + $0xc8] sm:$0xff]  }
 0x2f0   : > { %v1278_v29 = vpop.permute.xlu1 %1277 }
 0x2f1   : > { %1288 = vst.msk [vmem:[#allocation2 + $0x20] sm:$0xff] %vm1285_vm6, %v1278_v29  ;;  %v6053_v29 = vld [vmem:[%s7377_s2 + $0xd0] sm:$0xff]  }
 0x2f2   : > { %v1280_v30 = vpop.permute.xlu0 %1279 }
 0x2f3   : > { %1289 = vst.msk [vmem:[#allocation2 + $0x30] sm:$0xff] %vm1285_vm6, %v1280_v30 }
 0x2f4   : > { %v1189_v31 = vpop.permute.xlu1 %1188 }
 0x2f5   : > { %1201 = vst.msk [vmem:[#allocation2] sm:$0xff] %vm1200_vm15, %v1189_v31  ;;  %v6054_v31 = vld [vmem:[%s7377_s2 + $0xd8] sm:$0xff]  }
 0x2f6   : > { %v1191_v33 = vpop.permute.xlu0 %1190 }
 0x2f7   : > { %1202 = vst.msk [vmem:[#allocation2 + $0x10] sm:$0xff] %vm1200_vm15, %v1191_v33 }
 0x2f8   : > { %v1206_v34 = vpop.permute.xlu1 %1205 }
 0x2f9   : > { %1218 = vst.msk [vmem:[#allocation2] sm:$0xff] %vm1217_vm2, %v1206_v34 }
 0x2fa   : > { %v1208_v36 = vpop.permute.xlu0 %1207 }
 0x2fb   : > { %1219 = vst.msk [vmem:[#allocation2 + $0x10] sm:$0xff] %vm1217_vm2, %v1208_v36 }
 0x2fc   : > { %v1223_v38 = vpop.permute.xlu1 %1222 }
 0x2fd   : > { %1235 = vst.msk [vmem:[#allocation2] sm:$0xff] %vm1234_vm3, %v1223_v38 }
 0x2fe   : > { %v1225_v11 = vpop.permute.xlu0 %1224 }
 0x2ff   : > { %1236 = vst.msk [vmem:[#allocation2 + $0x10] sm:$0xff] %vm1234_vm3, %v1225_v11 }
 0x300   : > { %v1240_v32 = vpop.permute.xlu1 %1239 }
 0x301   : > { %1252 = vst.msk [vmem:[#allocation2] sm:$0xff] %vm1251_vm4, %v1240_v32 }
 0x302   : > { %v1242_v40 = vpop.permute.xlu0 %1241 }
 0x303   : > { %1253 = vst.msk [vmem:[#allocation2 + $0x10] sm:$0xff] %vm1251_vm4, %v1242_v40 }
 0x304   : > { %v1257_v3 = vpop.permute.xlu1 %1256 }
 0x305   : > { %1269 = vst.msk [vmem:[#allocation2] sm:$0xff] %vm1268_vm5, %v1257_v3 }
 0x306   : > { %v1259_v41 = vpop.permute.xlu0 %1258 }
 0x307   : > { %1270 = vst.msk [vmem:[#allocation2 + $0x10] sm:$0xff] %vm1268_vm5, %v1259_v41 }
 0x308   : > { %v1274_v42 = vpop.permute.xlu1 %1273 }
 0x309   : > { %1286 = vst.msk [vmem:[#allocation2] sm:$0xff] %vm1285_vm6, %v1274_v42 }
 0x30a   : > { %v1276_v43 = vpop.permute.xlu0 %1275 }
 0x30b   : > { %1287 = vst.msk [vmem:[#allocation2 + $0x10] sm:$0xff] %vm1285_vm6, %v1276_v43 }
 0x30c   : > { %v1291_v44 = vpop.permute.xlu1 %1290 }
 0x30d   : > { %1303 = vst.msk [vmem:[#allocation2] sm:$0xff] %vm1302_vm7, %v1291_v44 }
 0x30e   : > { %v1293_v23 = vpop.permute.xlu0 %1292 }
 0x30f   : > { %1304 = vst.msk [vmem:[#allocation2 + $0x10] sm:$0xff] %vm1302_vm7, %v1293_v23 }
 0x310   : > { %v1295_v39 = vpop.permute.xlu1 %1294 }
 0x311   : > { %1305 = vst.msk [vmem:[#allocation2 + $0x20] sm:$0xff] %vm1302_vm7, %v1295_v39 }
 0x312   : > { %v1297_v46 = vpop.permute.xlu0 %1296 }
 0x313   : > { %1306 = vst.msk [vmem:[#allocation2 + $0x30] sm:$0xff] %vm1302_vm7, %v1297_v46 }
 0x314   : > { %v1307_v48 = vld [vmem:[#allocation2] sm:$0xff] }
 0x316   : > { %v1308_v10 = vld [vmem:[#allocation2 + $0x10] sm:$0xff] }
 0x317   : > { %v1311_v49 = vpack.c.bf16 %v1308_v10, %v1307_v48 }
 0x318   : > { %v1309_v50 = vld [vmem:[#allocation2 + $0x20] sm:$0xff] }
 0x319   : > { %1335 = vrot.lane.b32.xlu1 %v1311_v49, %s7415_s7 }
 0x31a   : > { %v1310_v51 = vld [vmem:[#allocation2 + $0x30] sm:$0xff] }
 0x31b   : > { %v1312_v52 = vpack.c.bf16 %v1310_v51, %v1309_v50 }
 0x31d   : > { %1407 = vrot.lane.b32.xlu1 %v1311_v49, %s7416_s8  ;;  %1337 = vrot.lane.b32.xlu0 %v1312_v52, %s7415_s7 }
 0x321   : > { %1483 = vrot.lane.b32.xlu1 %v1311_v49, %s7405_s6  ;;  %1409 = vrot.lane.b32.xlu0 %v1312_v52, %s7416_s8 }
 0x325   : > { %1563 = vrot.lane.b32.xlu1 %v1311_v49, %s7399_s26  ;;  %1485 = vrot.lane.b32.xlu0 %v1312_v52, %s7405_s6 }
 0x329   : > { %1643 = vrot.lane.b32.xlu1 %v1311_v49, %s7397_s30  ;;  %1565 = vrot.lane.b32.xlu0 %v1312_v52, %s7399_s26 }
 0x32d   : > { %1723 = vrot.lane.b32.xlu1 %v1311_v49, %s7417_s9  ;;  %1645 = vrot.lane.b32.xlu0 %v1312_v52, %s7397_s30 }
 0x32e   : > { %v6640_v53 = vpop.f32.mrb[0].mxu1 }
 0x32f   : > { %v5449_v4 = vpop.f32.mrb[1].mxu1 }
 0x330   : > { %v6642_v55 = vpop.f32.mrb[2].mxu1 }
 0x331   : > { %1803 = vrot.lane.b32.xlu1 %v1311_v49, %s7418_s17  ;;  %1725 = vrot.lane.b32.xlu0 %v1312_v52, %s7417_s9  ;;  %v5450_v56 = vpop.f32.mrb[3].mxu1 }
 0x335   : > { %1805 = vrot.lane.b32.xlu0 %v1312_v52, %s7418_s17  ;;  %1874 = vperm.xlu1 %5996, %v6407_v17   ;;  %v6042_v17 = vld [vmem:[%s7377_s2 + $0x88] sm:$0xff]  }
 0x339   : > { %1879 = vperm.xlu0 %5997, %v6412_v18   ;;  %1884 = vperm.xlu1 %5996, %v6426_v21   ;;  %v6650_v21 = vpop.f32.mrb[4].mxu1 }
 0x33a   : > { %v5461_v57 = vpop.f32.mrb[5].mxu1 }
 0x33b   : > { %v460_v45 = vpop.f32.mrb[6].mxu1 }
 0x33c   : > { %v5462_v59 = vpop.f32.mrb[7].mxu1 }
 0x33d   : > { %1889 = vperm.xlu1 %5996, %v6421_v20   ;;  %v6043_v20 = vld [vmem:[%s7377_s2 + $0x70] sm:$0xff]  }
 0x38b   : > { %v1336_v54 = vpop.permute.xlu1 %1335 }
 0x38c   : > { %5505 = vmatprep.subr.bf16.mxu1 %v1336_v54 }
 0x38d   : > { %5506 = vmatpush3.bf16.msra.mxu1 %v1336_v54 }
 0x38f   : > { %v1338_v35 = vpop.permute.xlu0 %1337  ;;  %v1408_v18 = vpop.permute.xlu1 %1407 }
 0x390   : > { %5507 = vmatprep.subr.bf16.mxu1 %v1338_v35 }
 0x391   : > { %5508 = vmatpush3.bf16.msra.mxu1 %v1338_v35 }
 0x392   : > { %5513 = vmatprep.subr.bf16.mxu1 %v1408_v18 }
 0x393   : > { %v1410_v58 = vpop.permute.xlu0 %1409  ;;  %v1484_v7 = vpop.permute.xlu1 %1483 }
 0x394   : > { %5510 = vmatmul.mubr.msk.bf16.vlgmr.msra.gmra.mrb[8].mxu1 %vm1341_vm8, %v6042_v17 }
 0x395   : > { %5514 = vmatpush3.bf16.msra.mxu1 %v1408_v18  ;;  %5517 = vmatprep.mubr.msk.bf16.mxu1 %vm1341_vm8, %v6043_v20 }
 0x396   : > { %5515 = vmatprep.subr.bf16.mxu1 %v1410_v58 }
 0x397   : > { %v1486_v63 = vpop.permute.xlu0 %1485  ;;  %v1564_v2 = vpop.permute.xlu1 %1563 }
 0x399   : > { %5516 = vmatpush3.bf16.msra.mxu1 %v1410_v58 }
 0x39a   : > { %5521 = vmatprep.subr.bf16.mxu1 %v1484_v7 }
 0x39b   : > { %v1566_v8 = vpop.permute.xlu0 %1565  ;;  %v1644_v6 = vpop.permute.xlu1 %1643 }
 0x39f   : > { %v1646_v5 = vpop.permute.xlu0 %1645  ;;  %v1724_v14 = vpop.permute.xlu1 %1723 }
 0x3a0   : > { %5518 = vmatmul.mubr.msk.bf16.vlgmr.msra.gmra.mrb[8].mxu1 %vm1341_vm8, %v6044_v60 }
 0x3a1   : > { %5522 = vmatpush3.bf16.msra.mxu1 %v1484_v7  ;;  %5525 = vmatprep.mubr.msk.bf16.mxu1 %vm1341_vm8, %v6045_v62 }
 0x3a2   : > { %5523 = vmatprep.subr.bf16.mxu1 %v1486_v63 }
 0x3a3   : > { %v1726_v25 = vpop.permute.xlu0 %1725  ;;  %v1804_v27 = vpop.permute.xlu1 %1803 }
 0x3a5   : > { %5524 = vmatpush3.bf16.msra.mxu1 %v1486_v63 }
 0x3a6   : > { %5529 = vmatprep.subr.bf16.mxu1 %v1564_v2 }
 0x3a7   : > { %v1806_v30 = vpop.permute.xlu0 %1805 }
 0x3ac   : > { %5526 = vmatmul.mubr.msk.bf16.vlgmr.msra.gmra.mrb[8].mxu1 %vm1341_vm8, %v6046_v12 }
 0x3ad   : > { %5530 = vmatpush3.bf16.msra.mxu1 %v1564_v2  ;;  %5533 = vmatprep.mubr.msk.bf16.mxu1 %vm1341_vm8, %v6047_v0 }
 0x3ae   : > { %5531 = vmatprep.subr.bf16.mxu1 %v1566_v8 }
 0x3b1   : > { %5532 = vmatpush3.bf16.msra.mxu1 %v1566_v8 }
 0x3b2   : > { %5537 = vmatprep.subr.bf16.mxu1 %v1644_v6 }
 0x3b4   : > { %v1875_v33 = vpop.permute.xlu1 %1874 }
 0x3b8   : > { %5534 = vmatmul.mubr.msk.bf16.vlgmr.msra.gmra.mrb[8].mxu1 %vm1341_vm8, %v6048_v9  ;;  %v1885_v34 = vpop.permute.xlu1 %1884  ;;  %v1880_v32 = vpop.permute.xlu0 %1879 }
 0x3b9   : > { %5538 = vmatpush3.bf16.msra.mxu1 %v1644_v6  ;;  %5541 = vmatprep.mubr.msk.bf16.mxu1 %vm1341_vm8, %v6049_v13 }
 0x3ba   : > { %5539 = vmatprep.subr.bf16.mxu1 %v1646_v5 }
 0x3bc   : > { %v1890_v40 = vpop.permute.xlu1 %1889 }
 0x3bd   : > { %5540 = vmatpush3.bf16.msra.mxu1 %v1646_v5 }
 0x3be   : > { %5545 = vmatprep.subr.bf16.mxu1 %v1724_v14 }
 0x3c4   : > { %5542 = vmatmul.mubr.msk.bf16.vlgmr.msra.gmra.mrb[8].mxu1 %vm1341_vm8, %v6050_v15 }
 0x3c5   : > { %5546 = vmatpush3.bf16.msra.mxu1 %v1724_v14  ;;  %5549 = vmatprep.mubr.msk.bf16.mxu1 %vm1341_vm8, %v6051_v16 }
 0x3c6   : > { %5547 = vmatprep.subr.bf16.mxu1 %v1726_v25 }
 0x3c9   : > { %5548 = vmatpush3.bf16.msra.mxu1 %v1726_v25 }
 0x3ca   : > { %5553 = vmatprep.subr.bf16.mxu1 %v1804_v27 }
 0x3d0   : > { %5550 = vmatmul.mubr.msk.bf16.vlgmr.msra.gmra.mrb[8].mxu1 %vm1341_vm8, %v6052_v28 }
 0x3d1   : > { %5554 = vmatpush3.bf16.msra.mxu1 %v1804_v27  ;;  %5557 = vmatprep.mubr.msk.bf16.mxu1 %vm1341_vm8, %v6053_v29 }
 0x3d2   : > { %5555 = vmatprep.subr.bf16.mxu1 %v1806_v30 }
 0x3d5   : > { %5556 = vmatpush3.bf16.msra.mxu1 %v1806_v30 }
 0x3d6   : > { %5577 = vmatprep.subr.bf16.mxu1 %v6246_v1 }
 0x3dc   : > { %5558 = vmatmul.mubr.msk.bf16.vlgmr.msra.gmra.mrb[8].mxu1 %vm1341_vm8, %v6054_v31 }
 0x3dd   : > { %5581 = vmatprep.mubr.msk.bf16.mxu1 %vm6247_vm0, %v6246_v1 }
 0x4af   : > { %v5559_v36 = vpop.f32.mrb[8].mxu1 }
 0x4b0   : > { %v6701_v38 = vadd.f32 %v5559_v36, %v1885_v34  ;;  %v1849_v11 = vpop.f32.mrb[9].mxu1 }
 0x4b1   : > { %v6703_v3 = vadd.f32 %v1875_v33, %v1849_v11  ;;  %v5560_v41 = vpop.f32.mrb[10].mxu1 }
 0x4b2   : > { %v6706_v42 = vmul.f32 0.70710677, %v6701_v38  ;;  %v6708_v43 = vadd.f32 %v5560_v41, %v1890_v40  ;;  %v1852_v44 = vpop.f32.mrb[11].mxu1 }
 0x4b3   : > { %v6711_v23 = vmul.f32 0.70710677, %v6703_v3  ;;  %v6713_v39 = vadd.f32 %v1880_v32, %v1852_v44 }
 0x4b4   : > { %v1910_v46 = vand.u32 2147483647, %v6706_v42  ;;  %v6717_v47 = vmul.f32 0.70710677, %v6708_v43  ;;  %vm1902_vm9 = vcmp.ge.f32.partialorder %v6706_v42, 0.0 }
 0x4b5   : > { %v1908_v48 = vand.u32 2147483647, %v6711_v23  ;;  %v6721_v10 = vmul.f32 0.70710677, %v6713_v39  ;;  %vm1900_vm10 = vcmp.ge.f32.partialorder %v6711_v23, 0.0 }
 0x4b6   : > { %v1914_v49 = vmul.f32 0.3275911, %v1910_v46  ;;  %v1911_v51 = vand.u32 2147483647, %v6717_v47  ;;  %v1966_v18 = vsub.f32 0.0, %v1910_v46  ;;  %vm1903_vm11 = vcmp.ge.f32.partialorder %v6717_v47, 0.0 }
 0x4b7   : > { %v1912_v50 = vmul.f32 0.3275911, %v1908_v48  ;;  %v1909_v61 = vand.u32 2147483647, %v6721_v10  ;;  %v1964_v20 = vsub.f32 0.0, %v1908_v48  ;;  %vm1901_vm12 = vcmp.ge.f32.partialorder %v6721_v10, 0.0 }
 0x4b8   : > { %v1918_v52 = vadd.f32 1.0, %v1914_v49  ;;  %v1915_v4 = vmul.f32 0.3275911, %v1911_v51  ;;  %v1970_v58 = vmul.f32 %v1966_v18, %v1910_v46  ;;  %v1967_v45 = vsub.f32 0.0, %v1911_v51 }
 0x4b9   : > { %v1916_v54 = vadd.f32 1.0, %v1912_v50  ;;  %v1913_v56 = vmul.f32 0.3275911, %v1909_v61  ;;  %v1968_v7 = vmul.f32 %v1964_v20, %v1908_v48  ;;  %v1965_v62 = vsub.f32 0.0, %v1909_v61 }
 0x4ba   : > { %6097 = vrcp.f32 %v1918_v52  ;;  %v1919_v35 = vadd.f32 1.0, %v1915_v4  ;;  %v1976_v0 = vmul.f32 1.442695, %v1970_v58  ;;  %v1971_v8 = vmul.f32 %v1967_v45, %v1911_v51 }
 0x4bb   : > { %6099 = vrcp.f32 %v1916_v54  ;;  %v1917_v17 = vadd.f32 1.0, %v1913_v56  ;;  %v1972_v9 = vmul.f32 1.442695, %v1968_v7  ;;  %v1969_v15 = vmul.f32 %v1965_v62, %v1909_v61 }
 0x4bc   : > { %6101 = vrcp.f32 %v1919_v35  ;;  %v1978_v29 = vmul.f32 1.442695, %v1971_v8  ;;  %v1993_v47 = vmul.f32 0.5, %v6713_v39 }
 0x4bd   : > { %6103 = vrcp.f32 %v1917_v17  ;;  %v1974_v36 = vmul.f32 1.442695, %v1969_v15 }
 0x4be   : > { %6105 = vpow2.f32 %v1976_v0 }
 0x4bf   : > { %6107 = vpow2.f32 %v1972_v9 }
 0x4c0   : > { %6109 = vpow2.f32 %v1978_v29 }
 0x4c1   : > { %6111 = vpow2.f32 %v1974_v36 }
 0x4c4   : > { %v6098_v57 = vpop.eup %6097 }
 0x4c5   : > { %v6100_v59 = vpop.eup %6099  ;;  %v1930_v60 = vmul.f32 1.0614054, %v6098_v57 }
 0x4c6   : > { %v1928_v63 = vmul.f32 1.0614054, %v6100_v59  ;;  %v6102_v12 = vpop.eup %6101 }
 0x4c7   : > { %v1934_v2 = vadd.f32 -1.4531521, %v1930_v60  ;;  %v1931_v5 = vmul.f32 1.0614054, %v6102_v12  ;;  %v6104_v14 = vpop.eup %6103 }
 0x4c8   : > { %v1932_v6 = vadd.f32 -1.4531521, %v1928_v63  ;;  %v1929_v25 = vmul.f32 1.0614054, %v6104_v14  ;;  %v6106_v17 = vpop.eup %6105 }
 0x4c9   : > { %v1938_v13 = vmul.f32 %v6098_v57, %v1934_v2  ;;  %v1935_v28 = vadd.f32 -1.4531521, %v1931_v5  ;;  %v6108_v20 = vpop.eup %6107 }
 0x4ca   : > { %v1936_v16 = vmul.f32 %v6100_v59, %v1932_v6  ;;  %v1933_v31 = vadd.f32 -1.4531521, %v1929_v25  ;;  %v6110_v0 = vpop.eup %6109  ;;  %v1906_v6 = vsel %vm1902_vm9, 1.0, %v6256_v37 }
 0x4cb   : > { %v1942_v27 = vadd.f32 1.4214138, %v1938_v13  ;;  %v1939_v34 = vmul.f32 %v6102_v12, %v1935_v28  ;;  %v6112_v13 = vpop.eup %6111  ;;  %v1905_v28 = vsel %vm1901_vm12, 1.0, %v6256_v37 }
 0x4cc   : > { %v1940_v30 = vadd.f32 1.4214138, %v1936_v16  ;;  %v1937_v32 = vmul.f32 %v6104_v14, %v1933_v31  ;;  %v1992_v16 = vmul.f32 0.5, %v6703_v3 }
 0x4cd   : > { %v1946_v33 = vmul.f32 %v6098_v57, %v1942_v27  ;;  %v1943_v41 = vadd.f32 1.4214138, %v1939_v34  ;;  %v1907_v27 = vsel %vm1903_vm11, 1.0, %v6256_v37  ;;  %vm2971_vm11 = vcmask 613968  }
 0x4ce   : > { %v1944_v11 = vmul.f32 %v6100_v59, %v1940_v30  ;;  %v1941_v46 = vadd.f32 1.4214138, %v1937_v32 }
 0x4cf   : > { %v1950_v40 = vadd.f32 -0.28449672, %v1946_v33  ;;  %v1947_v49 = vmul.f32 %v6102_v12, %v1943_v41  ;;  %v1994_v33 = vmul.f32 0.5, %v6701_v38 }
 0x4d0   : > { %v1948_v44 = vadd.f32 -0.28449672, %v1944_v11  ;;  %v1945_v51 = vmul.f32 %v6104_v14, %v1941_v46  ;;  %v1995_v11 = vmul.f32 0.5, %v6708_v43 }
 0x4d1   : > { %v1954_v48 = vmul.f32 %v6098_v57, %v1950_v40  ;;  %v1951_v61 = vadd.f32 -0.28449672, %v1947_v49 }
 0x4d2   : > { %v1952_v50 = vmul.f32 %v6100_v59, %v1948_v44  ;;  %v1949_v4 = vadd.f32 -0.28449672, %v1945_v51 }
 0x4d3   : > { %v1958_v52 = vadd.f32 0.2548296, %v1954_v48  ;;  %v1955_v35 = vmul.f32 %v6102_v12, %v1951_v61 }
 0x4d4   : > { %v1956_v54 = vadd.f32 0.2548296, %v1952_v50  ;;  %v1953_v58 = vmul.f32 %v6104_v14, %v1949_v4  ;;  %v6055_v4 = vld [vmem:[%s7377_s2 + $0xf0] sm:$0xff]  }
 0x4d5   : > { %v1962_v56 = vmul.f32 %v6098_v57, %v1958_v52  ;;  %v1959_v7 = vadd.f32 0.2548296, %v1955_v35  ;;  %v1904_v57 = vsel %vm1900_vm10, 1.0, %v6256_v37  ;;  %vm2954_vm10 = vcmask 605768  }
 0x4d6   : > { %v1960_v18 = vmul.f32 %v6100_v59, %v1956_v54  ;;  %v1957_v62 = vadd.f32 0.2548296, %v1953_v58  ;;  %v6059_v58 = vld [vmem:[%s7379_s4 + $0x20] sm:$0xff]  }
 0x4d7   : > { %v1982_v45 = vmul.f32 %v6106_v17, %v1962_v56  ;;  %v1963_v2 = vmul.f32 %v6102_v12, %v1959_v7  ;;  %v6056_v56 = vld [vmem:[%s7377_s2 + $0x110] sm:$0xff]   ;;  %v6061_v7 = vld [vmem:[%s7379_s4 + $0x28] sm:$0xff]  }
 0x4d8   : > { %v1980_v60 = vmul.f32 %v6108_v20, %v1960_v18  ;;  %v1961_v9 = vmul.f32 %v6104_v14, %v1957_v62  ;;  %v6057_v18 = vld [vmem:[%s7377_s2 + $0xe0] sm:$0xff]  }
 0x4d9   : > { %v1986_v63 = vsub.f32 1.0, %v1982_v45  ;;  %v1983_v59 = vmul.f32 %v6110_v0, %v1963_v2  ;;  %v6058_v20 = vld [vmem:[%s7377_s2 + $0x100] sm:$0xff]   ;;  %v6258_v2 = vmov 2  }
 0x4da   : > { %v1984_v8 = vsub.f32 1.0, %v1980_v60  ;;  %v1981_v42 = vmul.f32 %v6112_v13, %v1961_v9  ;;  %v6060_v45 = vld [vmem:[%s7379_s4] sm:$0xff]   ;;  %v6062_v60 = vld [vmem:[%s7379_s4 + $0x8] sm:$0xff]   ;;  %5998 = vset.pattern.permute.xlu0 %v6258_v2  ;;  %5999 = vset.pattern.permute.xlu1 %v6258_v2 }
 0x4db   : > { %v1990_v15 = vmul.f32 %v1986_v63, %v1906_v6  ;;  %v1987_v23 = vsub.f32 1.0, %v1983_v59  ;;  %v6816_v62 = vld [vmem:[%s7378_s3] sm:$0xff]  ;;  %v6821_v63 = vld [vmem:[%s7378_s3 + $0x8] sm:$0xff] }
 0x4dc   : > { %v1988_v5 = vmul.f32 %v1984_v8, %v1904_v57  ;;  %v1985_v25 = vsub.f32 1.0, %v1981_v42 }
 0x4dd   : > { %v1998_v14 = vadd.f32 1.0, %v1990_v15  ;;  %v1991_v31 = vmul.f32 %v1987_v23, %v1907_v27 }
 0x4de   : > { %v1996_v12 = vadd.f32 1.0, %v1988_v5  ;;  %v1989_v30 = vmul.f32 %v1985_v25, %v1905_v28 }
 0x4df   : > { %v2002_v34 = vmul.f32 %v1998_v14, %v1994_v33  ;;  %v1999_v3 = vadd.f32 1.0, %v1991_v31 }
 0x4e0   : > { %v2000_v29 = vmul.f32 %v1996_v12, %v1992_v16  ;;  %v1997_v10 = vadd.f32 1.0, %v1989_v30 }
 0x4e1   : > { %v2003_v32 = vmul.f32 %v1999_v3, %v1995_v11 }
 0x4e2   : > { %2008 = vrot.lane.b32.xlu0 %v2000_v29, %s7407_s10  ;;  %v2001_v36 = vmul.f32 %v1997_v10, %v1993_v47 }
 0x4e4   : > { %2010 = vrot.lane.b32.xlu1 %v2001_v36, %s7407_s10 }
 0x4e6   : > { %2012 = vrot.lane.b32.xlu0 %v2002_v34, %s7407_s10 }
 0x4e8   : > { %2014 = vrot.lane.b32.xlu1 %v2003_v32, %s7407_s10 }
 0x554   : > { %v2009_v40 = vpop.permute.xlu0 %2008 }
 0x555   : > { %2020 = vst.msk [vmem:[#allocation2] sm:$0xff] %vm1200_vm15, %v2009_v40 }
 0x556   : > { %2024 = vst.msk [vmem:[#allocation2] sm:$0xff] %vm1217_vm2, %v6246_v1  ;;  %v2011_v39 = vpop.permute.xlu1 %2010 }
 0x557   : > { %2028 = vst.msk [vmem:[#allocation2] sm:$0xff] %vm1234_vm3, %v6246_v1 }
 0x558   : > { %v2013_v38 = vpop.permute.xlu0 %2012  ;;  %2021 = vst.msk [vmem:[#allocation2 + $0x10] sm:$0xff] %vm1200_vm15, %v2011_v39 }
 0x559   : > { %2022 = vst.msk [vmem:[#allocation2 + $0x20] sm:$0xff] %vm1200_vm15, %v2013_v38 }
 0x55a   : > { %2026 = vst.msk [vmem:[#allocation2 + $0x20] sm:$0xff] %vm1217_vm2, %v6246_v1  ;;  %2025 = vst.msk [vmem:[#allocation2 + $0x10] sm:$0xff] %vm1217_vm2, %v6246_v1  ;;  %v2015_v43 = vpop.permute.xlu1 %2014 }
 0x55b   : > { %2030 = vst.msk [vmem:[#allocation2 + $0x20] sm:$0xff] %vm1234_vm3, %v6246_v1  ;;  %2029 = vst.msk [vmem:[#allocation2 + $0x10] sm:$0xff] %vm1234_vm3, %v6246_v1 }
 0x55c   : > { %2023 = vst.msk [vmem:[#allocation2 + $0x30] sm:$0xff] %vm1200_vm15, %v2015_v43  ;;  %vm2465_vm15 = vcmask 588864  }
 0x55d   : > { %2027 = vst.msk [vmem:[#allocation2 + $0x30] sm:$0xff] %vm1217_vm2, %v6246_v1 }
 0x55e   : > { %2031 = vst.msk [vmem:[#allocation2 + $0x30] sm:$0xff] %vm1234_vm3, %v6246_v1  ;;  %v2032_v41 = vld [vmem:[#allocation2] sm:$0xff]  ;;  %vm2482_vm3 = vcmask 597568  }
 0x562   : > { %v2033_v44 = vld [vmem:[#allocation2 + $0x10] sm:$0xff]  ;;  %v2034_v48 = vld [vmem:[#allocation2 + $0x20] sm:$0xff] }
 0x563   : > { %v2036_v46 = vpack.c.bf16 %v2033_v44, %v2032_v41 }
 0x565   : > { %2106 = vrot.lane.b32.xlu1 %v2036_v46, %s7399_s26  ;;  %2051 = vrot.lane.b32.xlu0 %v2036_v46, %s7405_s6  ;;  %v2035_v49 = vld [vmem:[#allocation2 + $0x30] sm:$0xff] }
 0x566   : > { %v2037_v50 = vpack.c.bf16 %v2035_v49, %v2034_v48 }
 0x569   : > { %2108 = vrot.lane.b32.xlu1 %v2037_v50, %s7399_s26  ;;  %2053 = vrot.lane.b32.xlu0 %v2037_v50, %s7405_s6  ;;  %s7420_s26 = smov 119  }
 0x56d   : > { %2221 = vrot.lane.b32.xlu0 %v2036_v46, %s7397_s30  ;;  %2223 = vrot.lane.b32.xlu1 %v2037_v50, %s7397_s30  ;;  %s7423_s30 = smov 2  }
 0x571   : > { %2393 = vperm.xlu0 %5998, %v6816_v62   ;;  %2398 = vperm.xlu1 %5999, %v6821_v63  }
 0x5d7   : > { %v2052_v51 = vpop.permute.xlu0 %2051  ;;  %v2107_v52 = vpop.permute.xlu1 %2106 }
 0x5d8   : > { %5562 = vmatpush3.bf16.msra.mxu0 %v2052_v51  ;;  %5578 = vmatpush3.bf16.msra.mxu1 %v2107_v52 }
 0x5d9   : > { %5563 = vmatprep.subr.bf16.mxu0 %v6246_v1  ;;  %5579 = vmatprep.subr.bf16.mxu1 %v6246_v1 }
 0x5db   : > { %v2054_v61 = vpop.permute.xlu0 %2053  ;;  %v2109_v54 = vpop.permute.xlu1 %2108 }
 0x5dc   : > { %5564 = vmatpush3.bf16.msra.mxu0 %v2054_v61  ;;  %5580 = vmatpush3.bf16.msra.mxu1 %v2109_v54 }
 0x5dd   : > { %5569 = vmatprep.subr.bf16.mxu0 %v6246_v1  ;;  %5585 = vmatprep.subr.bf16.mxu1 %v6246_v1 }
 0x5df   : > { %5566 = vmatmul.mubr.msk.bf16.vlgmr.msra.gmra.mrb[12].mxu0 %vm1341_vm8, %v6055_v4  ;;  %5582 = vmatmul.mubr.msk.bf16.vlgmr.msra.gmra.mrb[12].mxu1 %vm1341_vm8, %v6056_v56  ;;  %v2222_v35 = vpop.permute.xlu0 %2221  ;;  %v2224_v17 = vpop.permute.xlu1 %2223 }
 0x5e0   : > { %5570 = vmatpush3.bf16.msra.mxu0 %v2107_v52  ;;  %5586 = vmatpush3.bf16.msra.mxu1 %v2222_v35 }
 0x5e1   : > { %5571 = vmatprep.subr.bf16.mxu0 %v6246_v1  ;;  %5587 = vmatprep.subr.bf16.mxu1 %v6246_v1 }
 0x5e2   : > { %5573 = vmatprep.mubr.msk.bf16.mxu0 %vm6247_vm0, %v6246_v1  ;;  %5589 = vmatprep.mubr.msk.bf16.mxu1 %vm6247_vm0, %v6246_v1 }
 0x5e4   : > { %5572 = vmatpush3.bf16.msra.mxu0 %v2109_v54  ;;  %5588 = vmatpush3.bf16.msra.mxu1 %v2224_v17 }
 0x5e5   : > { %5593 = vmatprep.subr.bf16.mxu0 %v6246_v1  ;;  %5601 = vmatprep.subr.bf16.mxu1 %v6246_v1 }
 0x5eb   : > { %5574 = vmatmul.mubr.msk.bf16.vlgmr.msra.gmra.mrb[12].mxu0 %vm1341_vm8, %v6057_v18  ;;  %5590 = vmatmul.mubr.msk.bf16.vlgmr.msra.gmra.mrb[12].mxu1 %vm1341_vm8, %v6058_v20 }
 0x5ec   : > { %5594 = vmatpush3.bf16.msra.mxu0 %v6059_v58  ;;  %5602 = vmatpush3.bf16.msra.mxu1 %v6060_v45 }
 0x5ed   : > { %5595 = vmatprep.subr.bf16.mxu0 %v6246_v1  ;;  %5603 = vmatprep.subr.bf16.mxu1 %v6246_v1 }
 0x5ee   : > { %5597 = vmatprep.mubr.msk.bf16.mxu0 %vm6247_vm0, %v6246_v1  ;;  %5605 = vmatprep.mubr.msk.bf16.mxu1 %vm6247_vm0, %v6246_v1 }
 0x5f0   : > { %5596 = vmatpush3.bf16.msra.mxu0 %v6061_v7  ;;  %5604 = vmatpush3.bf16.msra.mxu1 %v6062_v60  ;;  %v2394_v23 = vpop.permute.xlu0 %2393  ;;  %v2399_v16 = vpop.permute.xlu1 %2398 }
 0x5f1   : > { %5609 = vmatprep.subr.bf16.mxu0 %v6246_v1  ;;  %5615 = vmatprep.subr.bf16.mxu1 %v6246_v1 }
 0x6be   : > { %v2149_v0 = vpop.f32.mrb[12].mxu0  ;;  %v2264_v8 = vpop.f32.mrb[12].mxu1 }
 0x6bf   : > { %v5575_v6 = vpop.f32.mrb[13].mxu0  ;;  %v5591_v57 = vpop.f32.mrb[13].mxu1 }
 0x6c0   : > { %v2152_v9 = vpop.f32.mrb[14].mxu0  ;;  %v2267_v59 = vpop.f32.mrb[14].mxu1 }
 0x6c1   : > { %v2160_v13 = vpack.c.bf16 %v2152_v9, %v2149_v0  ;;  %v2276_v5 = vpack.c.bf16 %v2267_v59, %v2264_v8  ;;  %v5576_v15 = vpop.f32.mrb[15].mxu0  ;;  %v5592_v42 = vpop.f32.mrb[15].mxu1 }
 0x6c3   : > { %5598 = vmatmul.mubr.msk.bf16.vlgmr.msra.gmra.mrb[16].mxu0 %vm1341_vm8, %v2276_v5  ;;  %5606 = vmatmul.mubr.msk.bf16.vlgmr.msra.gmra.mrb[16].mxu1 %vm1341_vm8, %v2160_v13 }
 0x6c4   : > { %5611 = vmatprep.mubr.msk.bf16.mxu0 %vm6247_vm0, %v6246_v1  ;;  %5617 = vmatprep.mubr.msk.bf16.mxu1 %vm6247_vm0, %v6246_v1 }
 0x796   : > { %v2326_v12 = vpop.f32.mrb[16].mxu0  ;;  %v2382_v25 = vpop.f32.mrb[16].mxu1 }
 0x797   : > { %v2383_v27 = vadd.f32 %v2382_v25, %v2326_v12  ;;  %v5599_v28 = vpop.f32.mrb[17].mxu0  ;;  %v5607_v29 = vpop.f32.mrb[17].mxu1 }
 0x798   : > { %v2329_v14 = vpop.f32.mrb[18].mxu0  ;;  %v2385_v30 = vpop.f32.mrb[18].mxu1 }
 0x799   : > { %v6833_v31 = vadd.f32 %v2394_v23, %v2383_v27  ;;  %v2386_v33 = vadd.f32 %v2385_v30, %v2329_v14  ;;  %v5600_v47 = vpop.f32.mrb[19].mxu0  ;;  %v5608_v10 = vpop.f32.mrb[19].mxu1 }
 0x79b   : > { %v2403_v34 = vmul.f32 0.70710677, %v6833_v31  ;;  %v6836_v36 = vadd.f32 %v2399_v16, %v2386_v33  ;;  %v2451_v27 = vmul.f32 0.5, %v6833_v31 }
 0x79d   : > { %v2409_v3 = vand.u32 2147483647, %v2403_v34  ;;  %v2404_v11 = vmul.f32 0.70710677, %v6836_v36  ;;  %v2800_v32 = vpack.c.bf16 %v6836_v36, %v6833_v31  ;;  %vm2405_vm13 = vcmp.ge.f32.partialorder %v2403_v34, 0.0 }
 0x79e   : > { %v2407_v23 = vsel %vm2405_vm13, 1.0, %v6256_v37  ;;  %v2452_v33 = vmul.f32 0.5, %v6836_v36 }
 0x79f   : > { %v2411_v40 = vmul.f32 0.3275911, %v2409_v3  ;;  %v2410_v38 = vand.u32 2147483647, %v2404_v11  ;;  %v2437_v44 = vsub.f32 0.0, %v2409_v3  ;;  %vm2406_vm14 = vcmp.ge.f32.partialorder %v2404_v11, 0.0 }
 0x7a0   : > { %v2408_v29 = vsel %vm2406_vm14, 1.0, %v6256_v37 }
 0x7a1   : > { %v2413_v39 = vadd.f32 1.0, %v2411_v40  ;;  %v2412_v43 = vmul.f32 0.3275911, %v2410_v38  ;;  %v2438_v46 = vsub.f32 0.0, %v2410_v38  ;;  %v2439_v49 = vmul.f32 %v2437_v44, %v2409_v3 }
 0x7a3   : > { %6113 = vrcp.f32 %v2413_v39  ;;  %v2414_v41 = vadd.f32 1.0, %v2412_v43  ;;  %v2440_v52 = vmul.f32 %v2438_v46, %v2410_v38  ;;  %v2441_v54 = vmul.f32 1.442695, %v2439_v49 }
 0x7a4   : > { %v6259_v39 = vmov 3  }
 0x7a5   : > { %6115 = vrcp.f32 %v2414_v41  ;;  %v2443_v17 = vmul.f32 1.442695, %v2440_v52  ;;  %6001 = vset.pattern.permute.xlu1 %v6259_v39  ;;  %6000 = vset.pattern.permute.xlu0 %v6259_v39 }
 0x7a6   : > { %6117 = vpow2.f32 %v2441_v54 }
 0x7a7   : > { %6119 = vpow2.f32 %v2443_v17  ;;  %v6262_v17 = vmov 6  }
 0x7ad   : > { %v6114_v48 = vpop.eup %6113 }
 0x7ae   : > { %v2419_v50 = vmul.f32 1.0614054, %v6114_v48 }
 0x7af   : > { %v6116_v51 = vpop.eup %6115 }
 0x7b0   : > { %v2421_v61 = vadd.f32 -1.4531521, %v2419_v50  ;;  %v2420_v4 = vmul.f32 1.0614054, %v6116_v51  ;;  %v6118_v9 = vpop.eup %6117  ;;  %v6063_v50 = vld [vmem:[%s7377_s2 + $0x120] sm:$0xff]  }
 0x7b1   : > { %v6120_v15 = vpop.eup %6119 }
 0x7b2   : > { %v2423_v56 = vmul.f32 %v6114_v48, %v2421_v61  ;;  %v2422_v35 = vadd.f32 -1.4531521, %v2420_v4 }
 0x7b4   : > { %v2425_v18 = vadd.f32 1.4214138, %v2423_v56  ;;  %v2424_v20 = vmul.f32 %v6116_v51, %v2422_v35  ;;  %v6065_v56 = vld [vmem:[%s7377_s2 + $0x140] sm:$0xff]  }
 0x7b6   : > { %v2427_v58 = vmul.f32 %v6114_v48, %v2425_v18  ;;  %v2426_v45 = vadd.f32 1.4214138, %v2424_v20 }
 0x7b8   : > { %v2429_v7 = vadd.f32 -0.28449672, %v2427_v58  ;;  %v2428_v60 = vmul.f32 %v6116_v51, %v2426_v45 }
 0x7ba   : > { %v2431_v2 = vmul.f32 %v6114_v48, %v2429_v7  ;;  %v2430_v0 = vadd.f32 -0.28449672, %v2428_v60 }
 0x7bc   : > { %v2433_v8 = vadd.f32 0.2548296, %v2431_v2  ;;  %v2432_v6 = vmul.f32 %v6116_v51, %v2430_v0 }
 0x7be   : > { %v2435_v57 = vmul.f32 %v6114_v48, %v2433_v8  ;;  %v2434_v59 = vadd.f32 0.2548296, %v2432_v6 }
 0x7c0   : > { %v2445_v13 = vmul.f32 %v6118_v9, %v2435_v57  ;;  %v2436_v5 = vmul.f32 %v6116_v51, %v2434_v59  ;;  %v6064_v51 = vld [vmem:[%s7377_s2 + $0x130] sm:$0xff]  }
 0x7c2   : > { %v2447_v42 = vsub.f32 1.0, %v2445_v13  ;;  %v2446_v16 = vmul.f32 %v6120_v15, %v2436_v5 }
 0x7c4   : > { %v2449_v12 = vmul.f32 %v2447_v42, %v2407_v23  ;;  %v2448_v25 = vsub.f32 1.0, %v2446_v16 }
 0x7c6   : > { %v2453_v28 = vadd.f32 1.0, %v2449_v12  ;;  %v2450_v14 = vmul.f32 %v2448_v25, %v2408_v29 }
 0x7c8   : > { %v2455_v30 = vmul.f32 %v2453_v28, %v2451_v27  ;;  %v2454_v47 = vadd.f32 1.0, %v2450_v14 }
 0x7ca   : > { %2459 = vrot.lane.b32.xlu1 %v2455_v30, %s7407_s10  ;;  %v2456_v10 = vmul.f32 %v2454_v47, %v2452_v33 }
 0x7cc   : > { %2461 = vrot.lane.b32.xlu0 %v2456_v10, %s7407_s10 }
 0x7ce   : > { %2468 = vrot.lane.b32.xlu1 %v2455_v30, %s7401_s12 }
 0x7d0   : > { %2470 = vrot.lane.b32.xlu0 %v2456_v10, %s7401_s12 }
 0x7d2   : > { %2476 = vrot.lane.b32.xlu1 %v2455_v30, %s7403_s11 }
 0x7d4   : > { %2478 = vrot.lane.b32.xlu0 %v2456_v10, %s7403_s11 }
 0x83c   : > { %v2460_v34 = vpop.permute.xlu1 %2459 }
 0x83d   : > { %2466 = vst.msk [vmem:[#allocation2] sm:$0xff] %vm2465_vm15, %v2460_v34 }
 0x83e   : > { %v2462_v3 = vpop.permute.xlu0 %2461 }
 0x83f   : > { %2467 = vst.msk [vmem:[#allocation2 + $0x10] sm:$0xff] %vm2465_vm15, %v2462_v3 }
 0x840   : > { %v2469_v11 = vpop.permute.xlu1 %2468 }
 0x841   : > { %2474 = vst.msk [vmem:[#allocation2] sm:$0xff] %vm1217_vm2, %v2469_v11 }
 0x842   : > { %v2471_v40 = vpop.permute.xlu0 %2470 }
 0x843   : > { %2475 = vst.msk [vmem:[#allocation2 + $0x10] sm:$0xff] %vm1217_vm2, %v2471_v40 }
 0x844   : > { %v2477_v38 = vpop.permute.xlu1 %2476 }
 0x845   : > { %2483 = vst.msk [vmem:[#allocation2] sm:$0xff] %vm2482_vm3, %v2477_v38 }
 0x846   : > { %v2479_v43 = vpop.permute.xlu0 %2478 }
 0x847   : > { %2484 = vst.msk [vmem:[#allocation2 + $0x10] sm:$0xff] %vm2482_vm3, %v2479_v43 }
 0x84c   : > { %v2485_v41 = vld [vmem:[#allocation2] sm:$0xff] }
 0x84e   : > { %v2486_v44 = vld [vmem:[#allocation2 + $0x10] sm:$0xff] }
 0x84f   : > { %v2487_v46 = vpack.c.bf16 %v2486_v44, %v2485_v41 }
 0x851   : > { %2552 = vrot.lane.b32.xlu0 %v2487_v46, %s7405_s6  ;;  %2500 = vrot.lane.b32.xlu1 %v2487_v46, %s7419_s15 }
 0x855   : > { %256 = vrot.lane.b32.xlu0 %v6816_v62, %s6260_s16  ;;  %2607 = vrot.lane.b32.xlu1 %v2487_v46, %s7420_s26 }
 0x859   : > { %258 = vrot.lane.b32.xlu1 %v6821_v63, %s6260_s16  ;;  %2660 = vperm.xlu0 %6000, %v6816_v62   ;;  %s7422_s16 = smov 12  }
 0x85d   : > { %2665 = vperm.xlu1 %6001, %v6821_v63   ;;  %6003 = vset.pattern.permute.xlu0 %v6255_v19 }
 0x861   : > { %6002 = vset.pattern.permute.xlu1 %v6255_v19 }
 0x8c3   : > { %v2553_v48 = vpop.permute.xlu0 %2552  ;;  %v2501_v49 = vpop.permute.xlu1 %2500 }
 0x8c4   : > { %5610 = vmatpush3.bf16.msra.mxu0 %v2501_v49  ;;  %5616 = vmatpush3.bf16.msra.mxu1 %v2553_v48 }
 0x8c5   : > { %5621 = vmatprep.subr.bf16.mxu0 %v6246_v1  ;;  %5627 = vmatprep.subr.bf16.mxu1 %v6246_v1 }
 0x8c7   : > { %5618 = vmatmul.mubr.msk.bf16.vlgmr.msra.gmra.mrb[20].mxu1 %vm262_vm1, %v6063_v50  ;;  %v257_v52 = vpop.permute.xlu0 %256  ;;  %5612 = vmatmul.mubr.msk.bf16.vlgmr.msra.gmra.mrb[20].mxu0 %vm262_vm1, %v6064_v51  ;;  %v2608_v61 = vpop.permute.xlu1 %2607 }
 0x8c8   : > { %v301_v54 = vadd.f32 %v6430_v22, %v257_v52  ;;  %5622 = vmatpush3.bf16.msra.mxu0 %v2608_v61  ;;  %5623 = vmatprep.mubr.msk.bf16.mxu0 %vm6247_vm0, %v6246_v1  ;;  %v6261_v22 = vmov 5  }
 0x8c9   : > { %5629 = vmatprep.mubr.msk.bf16.mxu1 %vm6247_vm0, %v6246_v1  ;;  %5639 = vmatprep.subr.bf16.mxu0 %v6246_v1 }
 0x8ca   : > { %2672 = vperm.xlu1 %6002, %v301_v54  }
 0x8cb   : > { %v259_v4 = vpop.permute.xlu1 %258 }
 0x8cc   : > { %v304_v35 = vadd.f32 %v6432_v24, %v259_v4 }
 0x8ce   : > { %2677 = vperm.xlu0 %6003, %v304_v35   ;;  %6004 = vset.pattern.permute.xlu1 %v6261_v22 }
 0x8cf   : > { %5624 = vmatmul.mubr.msk.bf16.vlgmr.msra.gmra.mrb[24].mxu0 %vm262_vm1, %v6065_v56  ;;  %2741 = vperm.xlu1 %6004, %v6816_v62  }
 0x8d0   : > { %5641 = vmatprep.mubr.msk.bf16.mxu0 %vm6247_vm0, %v6246_v1 }
 0x8d2   : > { %6005 = vset.pattern.permute.xlu0 %v6262_v17 }
 0x8d3   : > { %2802 = vperm.xlu0 %6005, %v6816_v62   ;;  %2745 = vperm.xlu1 %6004, %v6821_v63  }
 0x8d7   : > { %6006 = vset.pattern.permute.xlu1 %v6262_v17 }
 0x8d8   : > { %2806 = vperm.xlu1 %6006, %v6821_v63   ;;  %v2661_v57 = vpop.permute.xlu0 %2660 }
 0x8dc   : > { %v2666_v6 = vpop.permute.xlu1 %2665 }
 0x949   : > { %v2673_v16 = vpop.permute.xlu1 %2672 }
 0x94d   : > { %v2678_v27 = vpop.permute.xlu0 %2677 }
 0x99a   : > { %v2540_v24 = vpop.f32.mrb[20].mxu0  ;;  %v2592_v18 = vpop.f32.mrb[20].mxu1 }
 0x99b   : > { %v2593_v20 = vadd.f32 %v2592_v18, %v2540_v24  ;;  %v5613_v58 = vpop.f32.mrb[21].mxu0  ;;  %v5619_v45 = vpop.f32.mrb[21].mxu1 }
 0x99c   : > { %v2543_v7 = vpop.f32.mrb[22].mxu0  ;;  %v2595_v60 = vpop.f32.mrb[22].mxu1 }
 0x99d   : > { %v2596_v2 = vadd.f32 %v2595_v60, %v2543_v7  ;;  %v5614_v0 = vpop.f32.mrb[23].mxu0  ;;  %v5620_v8 = vpop.f32.mrb[23].mxu1 }
 0x9a2   : > { %v2647_v9 = vpop.f32.mrb[24].mxu0 }
 0x9a3   : > { %v2654_v59 = vadd.f32 %v2647_v9, %v2593_v20  ;;  %v5625_v13 = vpop.f32.mrb[25].mxu0 }
 0x9a4   : > { %v2650_v5 = vpop.f32.mrb[26].mxu0 }
 0x9a5   : > { %v2668_v15 = vadd.f32 %v2661_v57, %v2654_v59  ;;  %v2655_v42 = vadd.f32 %v2650_v5, %v2596_v2  ;;  %v5626_v23 = vpop.f32.mrb[27].mxu0 }
 0x9a7   : > { %v2680_v12 = vadd.f32 %v2673_v16, %v2668_v15  ;;  %v2669_v25 = vadd.f32 %v2666_v6, %v2655_v42 }
 0x9a9   : > { %v2682_v28 = vmul.f32 0.70710677, %v2680_v12  ;;  %v2681_v29 = vadd.f32 %v2678_v27, %v2669_v25  ;;  %v2730_v42 = vmul.f32 0.5, %v2680_v12  ;;  %v6067_v12 = vld [vmem:[%s7377_s2 + $0x170] sm:$0xff]  }
 0x9ab   : > { %v2688_v14 = vand.u32 2147483647, %v2682_v28  ;;  %v2683_v30 = vmul.f32 0.70710677, %v2681_v29  ;;  %vm2684_vm5 = vcmp.ge.f32.partialorder %v2682_v28, 0.0  ;;  %v2731_v23 = vmul.f32 0.5, %v2681_v29  ;;  %v2742_v29 = vpop.permute.xlu1 %2741 }
 0x9ac   : > { %v2686_v6 = vsel %vm2684_vm5, 1.0, %v6256_v37 }
 0x9ad   : > { %v2690_v33 = vmul.f32 0.3275911, %v2688_v14  ;;  %v2689_v47 = vand.u32 2147483647, %v2683_v30  ;;  %v2716_v11 = vsub.f32 0.0, %v2688_v14  ;;  %vm2685_vm7 = vcmp.ge.f32.partialorder %v2683_v30, 0.0 }
 0x9ae   : > { %v2687_v13 = vsel %vm2685_vm7, 1.0, %v6256_v37  ;;  %vm3803_vm7 = vcmask 64512  }
 0x9af   : > { %v2692_v10 = vadd.f32 1.0, %v2690_v33  ;;  %v2691_v34 = vmul.f32 0.3275911, %v2689_v47  ;;  %v2717_v40 = vsub.f32 0.0, %v2689_v47  ;;  %v2718_v39 = vmul.f32 %v2716_v11, %v2688_v14  ;;  %v6066_v14 = vld [vmem:[%s7377_s2 + $0x160] sm:$0xff]   ;;  %v2746_v30 = vpop.permute.xlu1 %2745  ;;  %v2803_v33 = vpop.permute.xlu0 %2802 }
 0x9b0   : > { %v5819_v31 = vadd.f32 %v2803_v33, %v2742_v29 }
 0x9b1   : > { %6121 = vrcp.f32 %v2692_v10  ;;  %v2693_v3 = vadd.f32 1.0, %v2691_v34  ;;  %v2719_v46 = vmul.f32 %v2717_v40, %v2689_v47  ;;  %v2720_v48 = vmul.f32 1.442695, %v2718_v39 }
 0x9b3   : > { %6123 = vrcp.f32 %v2693_v3  ;;  %v2722_v61 = vmul.f32 1.442695, %v2719_v46  ;;  %v2807_v47 = vpop.permute.xlu1 %2806 }
 0x9b4   : > { %6125 = vpow2.f32 %v2720_v48 }
 0x9b5   : > { %6127 = vpow2.f32 %v2722_v61 }
 0x9bb   : > { %v6122_v38 = vpop.eup %6121 }
 0x9bc   : > { %v2698_v43 = vmul.f32 1.0614054, %v6122_v38 }
 0x9bd   : > { %v6124_v41 = vpop.eup %6123 }
 0x9be   : > { %v2700_v44 = vadd.f32 -1.4531521, %v2698_v43  ;;  %v2699_v49 = vmul.f32 1.0614054, %v6124_v41  ;;  %v6126_v45 = vpop.eup %6125 }
 0x9bf   : > { %v6128_v0 = vpop.eup %6127 }
 0x9c0   : > { %v2702_v50 = vmul.f32 %v6122_v38, %v2700_v44  ;;  %v2701_v51 = vadd.f32 -1.4531521, %v2699_v49 }
 0x9c2   : > { %v2704_v52 = vadd.f32 1.4214138, %v2702_v50  ;;  %v2703_v54 = vmul.f32 %v6124_v41, %v2701_v51 }
 0x9c4   : > { %v2706_v4 = vmul.f32 %v6122_v38, %v2704_v52  ;;  %v2705_v56 = vadd.f32 1.4214138, %v2703_v54 }
 0x9c6   : > { %v2708_v35 = vadd.f32 -0.28449672, %v2706_v4  ;;  %v2707_v22 = vmul.f32 %v6124_v41, %v2705_v56 }
 0x9c8   : > { %v2710_v17 = vmul.f32 %v6122_v38, %v2708_v35  ;;  %v2709_v24 = vadd.f32 -0.28449672, %v2707_v22 }
 0x9ca   : > { %v2712_v18 = vadd.f32 0.2548296, %v2710_v17  ;;  %v2711_v20 = vmul.f32 %v6124_v41, %v2709_v24 }
 0x9cc   : > { %v2714_v58 = vmul.f32 %v6122_v38, %v2712_v18  ;;  %v2713_v7 = vadd.f32 0.2548296, %v2711_v20 }
 0x9ce   : > { %v2724_v60 = vmul.f32 %v6126_v45, %v2714_v58  ;;  %v2715_v2 = vmul.f32 %v6124_v41, %v2713_v7 }
 0x9d0   : > { %v2726_v8 = vsub.f32 1.0, %v2724_v60  ;;  %v2725_v57 = vmul.f32 %v6128_v0, %v2715_v2 }
 0x9d2   : > { %v2728_v9 = vmul.f32 %v2726_v8, %v2686_v6  ;;  %v2727_v59 = vsub.f32 1.0, %v2725_v57 }
 0x9d4   : > { %v2732_v5 = vadd.f32 1.0, %v2728_v9  ;;  %v2729_v15 = vmul.f32 %v2727_v59, %v2687_v13 }
 0x9d6   : > { %v2733_v16 = vadd.f32 1.0, %v2729_v15  ;;  %v2734_v25 = vmul.f32 %v2732_v5, %v2730_v42 }
 0x9d8   : > { %v2735_v27 = vmul.f32 %v2733_v16, %v2731_v23 }
 0x9da   : > { %v2739_v28 = vpack.c.bf16 %v2735_v27, %v2734_v25 }
 0x9dc   : > { %5628 = vmatpush3.bf16.msra.mxu1 %v2739_v28 }
 0x9dd   : > { %5633 = vmatprep.subr.bf16.mxu1 %v6246_v1 }
 0x9df   : > { %5630 = vmatmul.mubr.msk.bf16.vlgmr.msra.gmra.mrb[24].mxu1 %vm262_vm1, %v6066_v14 }
 0x9e0   : > { %5634 = vmatpush3.bf16.msra.mxu1 %v2800_v32  ;;  %5635 = vmatprep.mubr.msk.bf16.mxu1 %vm6247_vm0, %v6246_v1  ;;  %v5821_v32 = vadd.f32 %v2807_v47, %v2746_v30 }
 0x9e1   : > { %5651 = vmatprep.subr.bf16.mxu1 %v6246_v1 }
 0x9eb   : > { %5636 = vmatmul.mubr.msk.bf16.vlgmr.msra.gmra.mrb[24].mxu1 %vm262_vm1, %v6067_v12 }
 0x9ec   : > { %5653 = vmatprep.mubr.msk.bf16.mxu1 %vm6247_vm0, %v6246_v1 }
 0xabe   : > { %v2851_v36 = vpop.f32.mrb[24].mxu1 }
 0xabf   : > { %v6912_v10 = vadd.f32 %v5819_v31, %v2851_v36  ;;  %v5637_v34 = vpop.f32.mrb[25].mxu1 }
 0xac0   : > { %v2854_v3 = vpop.f32.mrb[26].mxu1 }
 0xac1   : > { %v2860_v11 = vmul.f32 0.70710677, %v6912_v10  ;;  %v6915_v40 = vadd.f32 %v5821_v32, %v2854_v3  ;;  %v5638_v38 = vpop.f32.mrb[27].mxu1  ;;  %v2908_v29 = vmul.f32 0.5, %v6912_v10 }
 0xac3   : > { %v2866_v39 = vand.u32 2147483647, %v2860_v11  ;;  %v2861_v43 = vmul.f32 0.70710677, %v6915_v40  ;;  %v3289_v41 = vpack.c.bf16 %v6915_v40, %v6912_v10  ;;  %vm2862_vm8 = vcmp.ge.f32.partialorder %v2860_v11, 0.0 }
 0xac4   : > { %v2864_v27 = vsel %vm2862_vm8, 1.0, %v6256_v37  ;;  %v2909_v36 = vmul.f32 0.5, %v6915_v40  ;;  %vm3812_vm8 = vcmask 72768  }
 0xac5   : > { %v2868_v44 = vmul.f32 0.3275911, %v2866_v39  ;;  %v2867_v46 = vand.u32 2147483647, %v2861_v43  ;;  %v2894_v51 = vsub.f32 0.0, %v2866_v39  ;;  %vm2863_vm9 = vcmp.ge.f32.partialorder %v2861_v43, 0.0 }
 0xac6   : > { %v2865_v33 = vsel %vm2863_vm9, 1.0, %v6256_v37  ;;  %vm3828_vm9 = vcmask 982016  }
 0xac7   : > { %v2870_v48 = vadd.f32 1.0, %v2868_v44  ;;  %v2869_v49 = vmul.f32 0.3275911, %v2867_v46  ;;  %v2895_v52 = vsub.f32 0.0, %v2867_v46  ;;  %v2896_v54 = vmul.f32 %v2894_v51, %v2866_v39 }
 0xac9   : > { %6129 = vrcp.f32 %v2870_v48  ;;  %v2871_v50 = vadd.f32 1.0, %v2869_v49  ;;  %v2897_v22 = vmul.f32 %v2895_v52, %v2867_v46  ;;  %v2898_v17 = vmul.f32 1.442695, %v2896_v54 }
 0xaca   : > { %v6263_v54 = vmov 7  }
 0xacb   : > { %6131 = vrcp.f32 %v2871_v50  ;;  %v2900_v45 = vmul.f32 1.442695, %v2897_v22  ;;  %6008 = vset.pattern.permute.xlu1 %v6263_v54  ;;  %6007 = vset.pattern.permute.xlu0 %v6263_v54 }
 0xacc   : > { %6133 = vpow2.f32 %v2898_v17 }
 0xacd   : > { %6135 = vpow2.f32 %v2900_v45  ;;  %v6069_v45 = vld [vmem:[%s7377_s2 + $0x1a0] sm:$0xff]  }
 0xad3   : > { %v6130_v61 = vpop.eup %6129 }
 0xad4   : > { %v2876_v4 = vmul.f32 1.0614054, %v6130_v61 }
 0xad5   : > { %v6132_v56 = vpop.eup %6131 }
 0xad6   : > { %v2878_v35 = vadd.f32 -1.4531521, %v2876_v4  ;;  %v2877_v24 = vmul.f32 1.0614054, %v6132_v56  ;;  %v6134_v5 = vpop.eup %6133 }
 0xad7   : > { %v6136_v16 = vpop.eup %6135 }
 0xad8   : > { %v2880_v18 = vmul.f32 %v6130_v61, %v2878_v35  ;;  %v2879_v20 = vadd.f32 -1.4531521, %v2877_v24 }
 0xada   : > { %v2882_v58 = vadd.f32 1.4214138, %v2880_v18  ;;  %v2881_v7 = vmul.f32 %v6132_v56, %v2879_v20  ;;  %v6068_v18 = vld [vmem:[%s7377_s2 + $0x190] sm:$0xff]  }
 0xadc   : > { %v2884_v60 = vmul.f32 %v6130_v61, %v2882_v58  ;;  %v2883_v2 = vadd.f32 1.4214138, %v2881_v7 }
 0xade   : > { %v2886_v0 = vadd.f32 -0.28449672, %v2884_v60  ;;  %v2885_v8 = vmul.f32 %v6132_v56, %v2883_v2  ;;  %v6070_v2 = vld [vmem:[%s7377_s2 + $0x180] sm:$0xff]  }
 0xae0   : > { %v2888_v6 = vmul.f32 %v6130_v61, %v2886_v0  ;;  %v2887_v57 = vadd.f32 -0.28449672, %v2885_v8  ;;  %v6265_v8 = vmov 10  }
 0xae2   : > { %v2890_v9 = vadd.f32 0.2548296, %v2888_v6  ;;  %v2889_v59 = vmul.f32 %v6132_v56, %v2887_v57 }
 0xae4   : > { %v2892_v13 = vmul.f32 %v6130_v61, %v2890_v9  ;;  %v2891_v15 = vadd.f32 0.2548296, %v2889_v59 }
 0xae6   : > { %v2902_v42 = vmul.f32 %v6134_v5, %v2892_v13  ;;  %v2893_v23 = vmul.f32 %v6132_v56, %v2891_v15 }
 0xae8   : > { %v2904_v25 = vsub.f32 1.0, %v2902_v42  ;;  %v2903_v28 = vmul.f32 %v6136_v16, %v2893_v23 }
 0xaea   : > { %v2906_v14 = vmul.f32 %v2904_v25, %v2864_v27  ;;  %v2905_v12 = vsub.f32 1.0, %v2903_v28 }
 0xaec   : > { %v2910_v30 = vadd.f32 1.0, %v2906_v14  ;;  %v2907_v47 = vmul.f32 %v2905_v12, %v2865_v33 }
 0xaee   : > { %v2912_v31 = vmul.f32 %v2910_v30, %v2908_v29  ;;  %v2911_v32 = vadd.f32 1.0, %v2907_v47 }
 0xaf0   : > { %2916 = vrot.lane.b32.xlu1 %v2912_v31, %s7407_s10  ;;  %v2913_v34 = vmul.f32 %v2911_v32, %v2909_v36 }
 0xaf2   : > { %2918 = vrot.lane.b32.xlu0 %v2913_v34, %s7407_s10 }
 0xaf4   : > { %2924 = vrot.lane.b32.xlu1 %v2912_v31, %s7401_s12 }
 0xaf6   : > { %2926 = vrot.lane.b32.xlu0 %v2913_v34, %s7401_s12  ;;  %s7428_s12 = smov 121  }
 0xaf8   : > { %2932 = vrot.lane.b32.xlu1 %v2912_v31, %s7403_s11 }
 0xafa   : > { %2934 = vrot.lane.b32.xlu0 %v2913_v34, %s7403_s11  ;;  %s7427_s11 = smov 6  }
 0xafc   : > { %2940 = vrot.lane.b32.xlu1 %v2912_v31, %s7421_s25 }
 0xafe   : > { %2942 = vrot.lane.b32.xlu0 %v2913_v34, %s7421_s25 }
 0xb00   : > { %2948 = vrot.lane.b32.xlu1 %v2912_v31, %s7422_s16 }
 0xb02   : > { %2950 = vrot.lane.b32.xlu0 %v2913_v34, %s7422_s16 }
 0xb04   : > { %2957 = vrot.lane.b32.xlu1 %v2912_v31, %s7423_s30 }
 0xb06   : > { %2959 = vrot.lane.b32.xlu0 %v2913_v34, %s7423_s30 }
 0xb08   : > { %2965 = vrot.lane.b32.xlu1 %v2912_v31, %s7424_s13 }
 0xb0a   : > { %2967 = vrot.lane.b32.xlu0 %v2913_v34, %s7424_s13 }
 0xb62   : > { %v2917_v3 = vpop.permute.xlu1 %2916 }
 0xb63   : > { %2922 = vst.msk [vmem:[#allocation2] sm:$0xff] %vm2465_vm15, %v2917_v3 }
 0xb64   : > { %v2919_v11 = vpop.permute.xlu0 %2918 }
 0xb65   : > { %2923 = vst.msk [vmem:[#allocation2 + $0x10] sm:$0xff] %vm2465_vm15, %v2919_v11 }
 0xb66   : > { %v2925_v38 = vpop.permute.xlu1 %2924 }
 0xb67   : > { %2930 = vst.msk [vmem:[#allocation2] sm:$0xff] %vm1217_vm2, %v2925_v38 }
 0xb68   : > { %v2927_v39 = vpop.permute.xlu0 %2926 }
 0xb69   : > { %2931 = vst.msk [vmem:[#allocation2 + $0x10] sm:$0xff] %vm1217_vm2, %v2927_v39 }
 0xb6a   : > { %v2933_v43 = vpop.permute.xlu1 %2932 }
 0xb6b   : > { %2938 = vst.msk [vmem:[#allocation2] sm:$0xff] %vm2482_vm3, %v2933_v43 }
 0xb6c   : > { %v2935_v44 = vpop.permute.xlu0 %2934 }
 0xb6d   : > { %2939 = vst.msk [vmem:[#allocation2 + $0x10] sm:$0xff] %vm2482_vm3, %v2935_v44 }
 0xb6e   : > { %v2941_v46 = vpop.permute.xlu1 %2940 }
 0xb6f   : > { %2946 = vst.msk [vmem:[#allocation2] sm:$0xff] %vm1251_vm4, %v2941_v46 }
 0xb70   : > { %v2943_v48 = vpop.permute.xlu0 %2942 }
 0xb71   : > { %2947 = vst.msk [vmem:[#allocation2 + $0x10] sm:$0xff] %vm1251_vm4, %v2943_v48 }
 0xb72   : > { %v2949_v49 = vpop.permute.xlu1 %2948 }
 0xb73   : > { %2955 = vst.msk [vmem:[#allocation2] sm:$0xff] %vm2954_vm10, %v2949_v49 }
 0xb74   : > { %v2951_v50 = vpop.permute.xlu0 %2950 }
 0xb75   : > { %2956 = vst.msk [vmem:[#allocation2 + $0x10] sm:$0xff] %vm2954_vm10, %v2951_v50  ;;  %vm3833_vm10 = vcmask 1043456  }
 0xb76   : > { %v2958_v51 = vpop.permute.xlu1 %2957 }
 0xb77   : > { %2963 = vst.msk [vmem:[#allocation2] sm:$0xff] %vm1285_vm6, %v2958_v51 }
 0xb78   : > { %v2960_v52 = vpop.permute.xlu0 %2959 }
 0xb79   : > { %2964 = vst.msk [vmem:[#allocation2 + $0x10] sm:$0xff] %vm1285_vm6, %v2960_v52 }
 0xb7a   : > { %v2966_v61 = vpop.permute.xlu1 %2965 }
 0xb7b   : > { %2972 = vst.msk [vmem:[#allocation2] sm:$0xff] %vm2971_vm11, %v2966_v61 }
 0xb7c   : > { %v2968_v4 = vpop.permute.xlu0 %2967 }
 0xb7d   : > { %2973 = vst.msk [vmem:[#allocation2 + $0x10] sm:$0xff] %vm2971_vm11, %v2968_v4  ;;  %vm3881_vm11 = vcmask 990208  }
 0xb82   : > { %v2974_v56 = vld [vmem:[#allocation2] sm:$0xff] }
 0xb84   : > { %v2975_v35 = vld [vmem:[#allocation2 + $0x10] sm:$0xff] }
 0xb85   : > { %v2976_v22 = vpack.c.bf16 %v2975_v35, %v2974_v56 }
 0xb87   : > { %3041 = vrot.lane.b32.xlu0 %v2976_v22, %s7416_s8  ;;  %2989 = vrot.lane.b32.xlu1 %v2976_v22, %s7419_s15 }
 0xb8b   : > { %315 = vrot.lane.b32.xlu0 %v6816_v62, %s7419_s15  ;;  %3096 = vrot.lane.b32.xlu1 %v2976_v22, %s7418_s17 }
 0xb8f   : > { %317 = vrot.lane.b32.xlu1 %v6821_v63, %s7419_s15  ;;  %3149 = vperm.xlu0 %6007, %v6816_v62  }
 0xb93   : > { %3154 = vperm.xlu1 %6008, %v6821_v63   ;;  %6010 = vset.pattern.permute.xlu0 %v6255_v19 }
 0xb97   : > { %6009 = vset.pattern.permute.xlu1 %v6255_v19 }
 0xbf9   : > { %v3042_v17 = vpop.permute.xlu0 %3041  ;;  %v2990_v24 = vpop.permute.xlu1 %2989 }
 0xbfa   : > { %5640 = vmatpush3.bf16.msra.mxu0 %v2990_v24 }
 0xbfb   : > { %5645 = vmatprep.subr.bf16.mxu0 %v6246_v1 }
 0xbfd   : > { %v316_v20 = vpop.permute.xlu0 %315  ;;  %5642 = vmatmul.mubr.msk.bf16.vlgmr.msra.gmra.mrb[28].mxu0 %vm262_vm1, %v6068_v18  ;;  %v3097_v58 = vpop.permute.xlu1 %3096 }
 0xbfe   : > { %v359_v7 = vadd.f32 %v6640_v53, %v316_v20  ;;  %5646 = vmatpush3.bf16.msra.mxu0 %v3042_v17  ;;  %5652 = vmatpush3.bf16.msra.mxu1 %v3097_v58  ;;  %v6264_v53 = vmov 9  }
 0xbff   : > { %5647 = vmatprep.mubr.msk.bf16.mxu0 %vm6247_vm0, %v6246_v1  ;;  %5657 = vmatprep.subr.bf16.mxu0 %v6246_v1 }
 0xc00   : > { %3161 = vperm.xlu1 %6009, %v359_v7   ;;  %5669 = vmatprep.subr.bf16.mxu1 %v6246_v1 }
 0xc01   : > { %v318_v60 = vpop.permute.xlu1 %317  ;;  %5654 = vmatmul.mubr.msk.bf16.vlgmr.msra.gmra.mrb[28].mxu1 %vm262_vm1, %v6069_v45 }
 0xc02   : > { %v362_v0 = vadd.f32 %v6642_v55, %v318_v60  ;;  %5671 = vmatprep.mubr.msk.bf16.mxu1 %vm6247_vm0, %v6246_v1 }
 0xc04   : > { %3166 = vperm.xlu0 %6010, %v362_v0   ;;  %6011 = vset.pattern.permute.xlu1 %v6264_v53 }
 0xc05   : > { %5648 = vmatmul.mubr.msk.bf16.vlgmr.msra.gmra.mrb[32].mxu0 %vm262_vm1, %v6070_v2  ;;  %3230 = vperm.xlu1 %6011, %v6816_v62  }
 0xc06   : > { %5659 = vmatprep.mubr.msk.bf16.mxu0 %vm6247_vm0, %v6246_v1 }
 0xc08   : > { %6012 = vset.pattern.permute.xlu0 %v6265_v8 }
 0xc09   : > { %3291 = vperm.xlu0 %6012, %v6816_v62   ;;  %3234 = vperm.xlu1 %6011, %v6821_v63  }
 0xc0d   : > { %6013 = vset.pattern.permute.xlu1 %v6265_v8 }
 0xc0e   : > { %3295 = vperm.xlu1 %6013, %v6821_v63   ;;  %v3150_v62 = vpop.permute.xlu0 %3149 }
 0xc12   : > { %6016 = vset.pattern.permute.xlu1 %v6255_v19  ;;  %v3155_v42 = vpop.permute.xlu1 %3154 }
 0xc7f   : > { %v3162_v30 = vpop.permute.xlu1 %3161 }
 0xc83   : > { %v3167_v31 = vpop.permute.xlu0 %3166 }
 0xcd0   : > { %v3029_v55 = vpop.f32.mrb[28].mxu0 }
 0xcd1   : > { %v5643_v6 = vpop.f32.mrb[29].mxu0 }
 0xcd2   : > { %v3032_v57 = vpop.f32.mrb[30].mxu0 }
 0xcd3   : > { %v5644_v9 = vpop.f32.mrb[31].mxu0 }
 0xcd4   : > { %v3136_v59 = vpop.f32.mrb[28].mxu1 }
 0xcd5   : > { %v5655_v13 = vpop.f32.mrb[29].mxu1 }
 0xcd6   : > { %v3139_v5 = vpop.f32.mrb[30].mxu1 }
 0xcd7   : > { %v5656_v15 = vpop.f32.mrb[31].mxu1 }
 0xcd8   : > { %v3081_v23 = vpop.f32.mrb[32].mxu0 }
 0xcd9   : > { %v3082_v16 = vadd.f32 %v3081_v23, %v3029_v55  ;;  %v5649_v25 = vpop.f32.mrb[33].mxu0 }
 0xcda   : > { %v3084_v27 = vpop.f32.mrb[34].mxu0 }
 0xcdb   : > { %v3143_v28 = vadd.f32 %v3136_v59, %v3082_v16  ;;  %v3085_v14 = vadd.f32 %v3084_v27, %v3032_v57  ;;  %v5650_v12 = vpop.f32.mrb[35].mxu0 }
 0xcdd   : > { %v3157_v63 = vadd.f32 %v3150_v62, %v3143_v28  ;;  %v3144_v29 = vadd.f32 %v3139_v5, %v3085_v14 }
 0xcdf   : > { %v3169_v33 = vadd.f32 %v3162_v30, %v3157_v63  ;;  %v3158_v47 = vadd.f32 %v3155_v42, %v3144_v29  ;;  %v6071_v30 = vld [vmem:[%s7377_s2 + $0x1c0] sm:$0xff]  }
 0xce1   : > { %v3171_v36 = vmul.f32 0.70710677, %v3169_v33  ;;  %v3170_v32 = vadd.f32 %v3167_v31, %v3158_v47  ;;  %v3219_v27 = vmul.f32 0.5, %v3169_v33  ;;  %v6072_v33 = vld [vmem:[%s7377_s2 + $0x1d0] sm:$0xff]   ;;  %v3231_v47 = vpop.permute.xlu1 %3230 }
 0xce3   : > { %v3177_v34 = vand.u32 2147483647, %v3171_v36  ;;  %v3172_v3 = vmul.f32 0.70710677, %v3170_v32  ;;  %vm3173_vm12 = vcmp.ge.f32.partialorder %v3171_v36, 0.0  ;;  %v3220_v28 = vmul.f32 0.5, %v3170_v32  ;;  %v3292_v36 = vpop.permute.xlu0 %3291 }
 0xce4   : > { %v3175_v5 = vsel %vm3173_vm12, 1.0, %v6256_v37  ;;  %v5823_v10 = vadd.f32 %v3292_v36, %v3231_v47  ;;  %vm3935_vm12 = vcmask 973824  }
 0xce5   : > { %v3179_v11 = vmul.f32 0.3275911, %v3177_v34  ;;  %v3178_v38 = vand.u32 2147483647, %v3172_v3  ;;  %v3205_v46 = vsub.f32 0.0, %v3177_v34  ;;  %vm3174_vm13 = vcmp.ge.f32.partialorder %v3172_v3, 0.0  ;;  %v3235_v31 = vpop.permute.xlu1 %3234 }
 0xce6   : > { %v3176_v16 = vsel %vm3174_vm13, 1.0, %v6256_v37 }
 0xce7   : > { %v3181_v39 = vadd.f32 1.0, %v3179_v11  ;;  %v3180_v43 = vmul.f32 0.3275911, %v3178_v38  ;;  %v3206_v48 = vsub.f32 0.0, %v3178_v38  ;;  %v3207_v50 = vmul.f32 %v3205_v46, %v3177_v34 }
 0xce9   : > { %6137 = vrcp.f32 %v3181_v39  ;;  %v3182_v44 = vadd.f32 1.0, %v3180_v43  ;;  %v3208_v61 = vmul.f32 %v3206_v48, %v3178_v38  ;;  %v3209_v4 = vmul.f32 1.442695, %v3207_v50  ;;  %v3296_v32 = vpop.permute.xlu1 %3295 }
 0xceb   : > { %6139 = vrcp.f32 %v3182_v44  ;;  %v3211_v17 = vmul.f32 1.442695, %v3208_v61 }
 0xcec   : > { %6141 = vpow2.f32 %v3209_v4 }
 0xced   : > { %6143 = vpow2.f32 %v3211_v17 }
 0xcf3   : > { %v6138_v49 = vpop.eup %6137 }
 0xcf4   : > { %v3187_v51 = vmul.f32 1.0614054, %v6138_v49 }
 0xcf5   : > { %v6140_v52 = vpop.eup %6139 }
 0xcf6   : > { %v3189_v54 = vadd.f32 -1.4531521, %v3187_v51  ;;  %v3188_v56 = vmul.f32 1.0614054, %v6140_v52  ;;  %v6142_v55 = vpop.eup %6141 }
 0xcf7   : > { %v6144_v59 = vpop.eup %6143 }
 0xcf8   : > { %v3191_v35 = vmul.f32 %v6138_v49, %v3189_v54  ;;  %v3190_v22 = vadd.f32 -1.4531521, %v3188_v56 }
 0xcfa   : > { %v3193_v24 = vadd.f32 1.4214138, %v3191_v35  ;;  %v3192_v18 = vmul.f32 %v6140_v52, %v3190_v22 }
 0xcfc   : > { %v3195_v20 = vmul.f32 %v6138_v49, %v3193_v24  ;;  %v3194_v58 = vadd.f32 1.4214138, %v3192_v18 }
 0xcfe   : > { %v3197_v45 = vadd.f32 -0.28449672, %v3195_v20  ;;  %v3196_v7 = vmul.f32 %v6140_v52, %v3194_v58 }
 0xd00   : > { %v3199_v60 = vmul.f32 %v6138_v49, %v3197_v45  ;;  %v3198_v2 = vadd.f32 -0.28449672, %v3196_v7 }
 0xd02   : > { %v3201_v0 = vadd.f32 0.2548296, %v3199_v60  ;;  %v3200_v53 = vmul.f32 %v6140_v52, %v3198_v2 }
 0xd04   : > { %v3203_v8 = vmul.f32 %v6138_v49, %v3201_v0  ;;  %v3202_v6 = vadd.f32 0.2548296, %v3200_v53 }
 0xd06   : > { %v3213_v57 = vmul.f32 %v6142_v55, %v3203_v8  ;;  %v3204_v9 = vmul.f32 %v6140_v52, %v3202_v6 }
 0xd08   : > { %v3215_v13 = vsub.f32 1.0, %v3213_v57  ;;  %v3214_v15 = vmul.f32 %v6144_v59, %v3204_v9 }
 0xd0a   : > { %v3217_v42 = vmul.f32 %v3215_v13, %v3175_v5  ;;  %v3216_v23 = vsub.f32 1.0, %v3214_v15 }
 0xd0c   : > { %v3218_v25 = vmul.f32 %v3216_v23, %v3176_v16  ;;  %v3221_v62 = vadd.f32 1.0, %v3217_v42 }
 0xd0e   : > { %v3222_v14 = vadd.f32 1.0, %v3218_v25  ;;  %v3223_v12 = vmul.f32 %v3221_v62, %v3219_v27 }
 0xd10   : > { %v3224_v63 = vmul.f32 %v3222_v14, %v3220_v28 }
 0xd12   : > { %v3228_v29 = vpack.c.bf16 %v3224_v63, %v3223_v12 }
 0xd14   : > { %5658 = vmatpush3.bf16.msra.mxu0 %v3228_v29 }
 0xd15   : > { %5663 = vmatprep.subr.bf16.mxu0 %v6246_v1 }
 0xd17   : > { %5660 = vmatmul.mubr.msk.bf16.vlgmr.msra.gmra.mrb[36].mxu0 %vm262_vm1, %v6071_v30 }
 0xd18   : > { %5664 = vmatpush3.bf16.msra.mxu0 %v3289_v41  ;;  %5665 = vmatprep.mubr.msk.bf16.mxu0 %vm6247_vm0, %v6246_v1  ;;  %v5825_v41 = vadd.f32 %v3296_v32, %v3235_v31 }
 0xd19   : > { %5681 = vmatprep.subr.bf16.mxu0 %v6246_v1 }
 0xd23   : > { %5666 = vmatmul.mubr.msk.bf16.vlgmr.msra.gmra.mrb[36].mxu0 %vm262_vm1, %v6072_v33 }
 0xd24   : > { %5683 = vmatprep.mubr.msk.bf16.mxu0 %vm6247_vm0, %v6246_v1 }
 0xdf6   : > { %v3340_v40 = vpop.f32.mrb[36].mxu0 }
 0xdf7   : > { %v5824_v34 = vadd.f32 %v5823_v10, %v3340_v40  ;;  %v5667_v3 = vpop.f32.mrb[37].mxu0 }
 0xdf8   : > { %v3343_v11 = vpop.f32.mrb[38].mxu0 }
 0xdf9   : > { %v3349_v38 = vmul.f32 0.70710677, %v5824_v34  ;;  %v5826_v39 = vadd.f32 %v5825_v41, %v3343_v11  ;;  %v5668_v43 = vpop.f32.mrb[39].mxu0  ;;  %v3397_v12 = vmul.f32 0.5, %v5824_v34 }
 0xdfb   : > { %v3355_v44 = vand.u32 2147483647, %v3349_v38  ;;  %v3350_v46 = vmul.f32 0.70710677, %v5826_v39  ;;  %vm3351_vm14 = vcmp.ge.f32.partialorder %v3349_v38, 0.0  ;;  %v3398_v47 = vmul.f32 0.5, %v5826_v39 }
 0xdfc   : > { %v3353_v62 = vsel %vm3351_vm14, 1.0, %v6256_v37  ;;  %v5229_v38 = vld [vmem:[%s7377_s2 + $0x1f0] sm:$0xf] }
 0xdfd   : > { %v3357_v48 = vmul.f32 0.3275911, %v3355_v44  ;;  %v3356_v49 = vand.u32 2147483647, %v3350_v46  ;;  %v3383_v61 = vsub.f32 0.0, %v3355_v44  ;;  %vm3352_vm5 = vcmp.ge.f32.partialorder %v3350_v46, 0.0 }
 0xdfe   : > { %v3354_v29 = vsel %vm3352_vm5, 1.0, %v6256_v37  ;;  %v5233_v39 = vld [vmem:[%s7377_s2 + $0x210] sm:$0xf]  ;;  %v5232_v46 = vld [vmem:[%s7377_s2 + $0x200] sm:$0xf]  ;;  %vm4179_vm5 = vcmask 80968  }
 0xdff   : > { %v3359_v50 = vadd.f32 1.0, %v3357_v48  ;;  %v3358_v51 = vmul.f32 0.3275911, %v3356_v49  ;;  %v3384_v54 = vsub.f32 0.0, %v3356_v49  ;;  %v3385_v56 = vmul.f32 %v3383_v61, %v3355_v44  ;;  %v5228_v44 = vld [vmem:[%s7377_s2 + $0x1e0] sm:$0xf] }
 0xe00   : > { %v6073_v48 = vld [vmem:[%s7379_s4 + $0x20] sm:$0xff]   ;;  %v6078_v61 = vld [vmem:[%s7379_s4 + $0x10] sm:$0xff]  }
 0xe01   : > { %6145 = vrcp.f32 %v3359_v50  ;;  %v3360_v52 = vadd.f32 1.0, %v3358_v51  ;;  %v3386_v24 = vmul.f32 %v3384_v54, %v3356_v49  ;;  %v3387_v18 = vmul.f32 1.442695, %v3385_v56  ;;  %v6074_v49 = vld [vmem:[%s7379_s4] sm:$0xff]   ;;  %v6075_v50 = vld [vmem:[%s7379_s4 + $0x28] sm:$0xff]   ;;  %v6079_v54 = vld [vmem:[%s7379_s4 + $0x38] sm:$0xff]  }
 0xe02   : > { %v6076_v51 = vld [vmem:[%s7379_s4 + $0x8] sm:$0xff]   ;;  %v7086_v56 = vld [vmem:[%s7378_s3] sm:$0xff] }
 0xe03   : > { %6147 = vrcp.f32 %v3360_v52  ;;  %v3389_v60 = vmul.f32 1.442695, %v3386_v24  ;;  %v6077_v52 = vld [vmem:[%s7379_s4 + $0x30] sm:$0xff]  }
 0xe04   : > { %6149 = vpow2.f32 %v3387_v18 }
 0xe05   : > { %6151 = vpow2.f32 %v3389_v60 }
 0xe0b   : > { %v6146_v4 = vpop.eup %6145 }
 0xe0c   : > { %v3365_v35 = vmul.f32 1.0614054, %v6146_v4 }
 0xe0d   : > { %v6148_v22 = vpop.eup %6147 }
 0xe0e   : > { %v3367_v17 = vadd.f32 -1.4531521, %v3365_v35  ;;  %v3366_v20 = vmul.f32 1.0614054, %v6148_v22  ;;  %v6150_v5 = vpop.eup %6149  ;;  %v6266_v35 = vmov 11  }
 0xe0f   : > { %v6152_v16 = vpop.eup %6151  ;;  %6014 = vset.pattern.permute.xlu0 %v6266_v35 }
 0xe10   : > { %v3369_v58 = vmul.f32 %v6146_v4, %v3367_v17  ;;  %v3368_v45 = vadd.f32 -1.4531521, %v3366_v20 }
 0xe12   : > { %v3371_v7 = vadd.f32 1.4214138, %v3369_v58  ;;  %v3370_v2 = vmul.f32 %v6148_v22, %v3368_v45 }
 0xe14   : > { %v3373_v0 = vmul.f32 %v6146_v4, %v3371_v7  ;;  %v3372_v53 = vadd.f32 1.4214138, %v3370_v2 }
 0xe16   : > { %v3375_v8 = vadd.f32 -0.28449672, %v3373_v0  ;;  %v3374_v55 = vmul.f32 %v6148_v22, %v3372_v53 }
 0xe18   : > { %v3377_v6 = vmul.f32 %v6146_v4, %v3375_v8  ;;  %v3376_v57 = vadd.f32 -0.28449672, %v3374_v55 }
 0xe1a   : > { %v3379_v9 = vadd.f32 0.2548296, %v3377_v6  ;;  %v3378_v59 = vmul.f32 %v6148_v22, %v3376_v57 }
 0xe1c   : > { %v3381_v13 = vmul.f32 %v6146_v4, %v3379_v9  ;;  %v3380_v15 = vadd.f32 0.2548296, %v3378_v59  ;;  %v6080_v4 = vld [vmem:[%s7379_s4 + $0x18] sm:$0xff]  }
 0xe1e   : > { %v3391_v42 = vmul.f32 %v6150_v5, %v3381_v13  ;;  %v3382_v23 = vmul.f32 %v6148_v22, %v3380_v15 }
 0xe20   : > { %v3393_v25 = vsub.f32 1.0, %v3391_v42  ;;  %v3392_v27 = vmul.f32 %v6152_v16, %v3382_v23 }
 0xe22   : > { %v3395_v28 = vmul.f32 %v3393_v25, %v3353_v62  ;;  %v3394_v14 = vsub.f32 1.0, %v3392_v27 }
 0xe24   : > { %v3399_v63 = vadd.f32 1.0, %v3395_v28  ;;  %v3396_v30 = vmul.f32 %v3394_v14, %v3354_v29 }
 0xe26   : > { %v3401_v33 = vmul.f32 %v3399_v63, %v3397_v12  ;;  %v3400_v31 = vadd.f32 1.0, %v3396_v30 }
 0xe28   : > { %3405 = vrot.lane.b32.xlu1 %v3401_v33, %s7407_s10  ;;  %v3402_v36 = vmul.f32 %v3400_v31, %v3398_v47 }
 0xe2a   : > { %3407 = vrot.lane.b32.xlu0 %v3402_v36, %s7407_s10  ;;  %s7425_s10 = smov 10  }
 0xe9a   : > { %v3406_v32 = vpop.permute.xlu1 %3405 }
 0xe9b   : > { %3411 = vst.msk [vmem:[#allocation2] sm:$0xff] %vm2465_vm15, %v3406_v32 }
 0xe9c   : > { %3413 = vst.msk [vmem:[#allocation2] sm:$0xff] %vm1217_vm2, %v6246_v1  ;;  %v3408_v10 = vpop.permute.xlu0 %3407 }
 0xe9d   : > { %3415 = vst.msk [vmem:[#allocation2] sm:$0xff] %vm2482_vm3, %v6246_v1 }
 0xe9e   : > { %3412 = vst.msk [vmem:[#allocation2 + $0x10] sm:$0xff] %vm2465_vm15, %v3408_v10 }
 0xe9f   : > { %3414 = vst.msk [vmem:[#allocation2 + $0x10] sm:$0xff] %vm1217_vm2, %v6246_v1 }
 0xea0   : > { %3416 = vst.msk [vmem:[#allocation2 + $0x10] sm:$0xff] %vm2482_vm3, %v6246_v1  ;;  %vm3801_vm3 = vcmask 1047616  }
 0xea4   : > { %v3417_v40 = vld [vmem:[#allocation2] sm:$0xff] }
 0xea7   : > { %v3418_v41 = vld [vmem:[#allocation2 + $0x10] sm:$0xff] }
 0xea8   : > { %v3419_v34 = vpack.c.bf16 %v3418_v41, %v3417_v40 }
 0xeaa   : > { %3471 = vrot.lane.b32.xlu0 %v3419_v34, %s7419_s15  ;;  %3425 = vrot.lane.b32.xlu1 %v3419_v34, %s7405_s6  ;;  %s7426_s6 = smov 8  }
 0xeae   : > { %3573 = vrot.lane.b32.xlu1 %v3419_v34, %s7420_s26  ;;  %3766 = vperm.xlu0 %6014, %v7086_v56  }
 0xf1c   : > { %v3472_v3 = vpop.permute.xlu0 %3471  ;;  %v3426_v11 = vpop.permute.xlu1 %3425 }
 0xf1d   : > { %5670 = vmatpush3.bf16.msra.mxu1 %v3426_v11  ;;  %5682 = vmatpush3.bf16.msra.mxu0 %v3472_v3 }
 0xf1e   : > { %5675 = vmatprep.subr.bf16.mxu1 %v6246_v1  ;;  %5687 = vmatprep.subr.bf16.mxu0 %v6246_v1 }
 0xf20   : > { %5672 = vmatmul.mubr.msk.bf16.vlgmr.msra.gmra.mrb[32].mxu1 %vm262_vm1, %v5229_v38  ;;  %5684 = vmatmul.mubr.msk.bf16.vlgmr.msra.gmra.mrb[40].mxu0 %vm262_vm1, %v5233_v39  ;;  %v3574_v43 = vpop.permute.xlu1 %3573 }
 0xf21   : > { %5676 = vmatpush3.bf16.msra.mxu1 %v3472_v3  ;;  %5688 = vmatpush3.bf16.msra.mxu0 %v3574_v43 }
 0xf22   : > { %5677 = vmatprep.mubr.msk.bf16.mxu1 %vm6247_vm0, %v6246_v1  ;;  %5689 = vmatprep.mubr.msk.bf16.mxu0 %vm6247_vm0, %v6246_v1 }
 0xf23   : > { %5693 = vmatprep.subr.bf16.mxu1 %v6246_v1  ;;  %5705 = vmatprep.subr.bf16.mxu0 %v6246_v1 }
 0xf2c   : > { %5678 = vmatmul.mubr.msk.bf16.vlgmr.msra.gmra.mrb[32].mxu1 %vm262_vm1, %v5228_v44  ;;  %5690 = vmatmul.mubr.msk.bf16.vlgmr.msra.gmra.mrb[40].mxu0 %vm262_vm1, %v5232_v46  ;;  %vm3652_vm1 = vcmask 523264  }
 0xf2d   : > { %5694 = vmatpush3.bf16.msra.mxu1 %v6073_v48  ;;  %5706 = vmatpush3.bf16.msra.mxu0 %v6074_v49  ;;  %v3767_v0 = vpop.permute.xlu0 %3766 }
 0xf2e   : > { %5695 = vmatprep.subr.bf16.mxu1 %v6246_v1  ;;  %5707 = vmatprep.subr.bf16.mxu0 %v6246_v1 }
 0xf2f   : > { %5701 = vmatprep.mubr.msk.bf16.mxu1 %vm6247_vm0, %v6246_v1  ;;  %5713 = vmatprep.mubr.msk.bf16.mxu0 %vm6247_vm0, %v6246_v1 }
 0xf31   : > { %5696 = vmatpush3.bf16.msra.mxu1 %v6075_v50  ;;  %5708 = vmatpush3.bf16.msra.mxu0 %v6076_v51 }
 0xf32   : > { %5697 = vmatprep.subr.bf16.mxu1 %v6246_v1  ;;  %5709 = vmatprep.subr.bf16.mxu0 %v6246_v1 }
 0xf35   : > { %5698 = vmatpush3.bf16.msra.mxu1 %v6077_v52  ;;  %5710 = vmatpush3.bf16.msra.mxu0 %v6078_v61  ;;  %v6267_v52 = vmov 12  }
 0xf36   : > { %5699 = vmatprep.subr.bf16.mxu1 %v6246_v1  ;;  %5711 = vmatprep.subr.bf16.mxu0 %v6246_v1 }
 0xf37   : > { %6015 = vset.pattern.permute.xlu0 %v6267_v52 }
 0xf39   : > { %5700 = vmatpush3.bf16.msra.mxu1 %v6079_v54  ;;  %5712 = vmatpush3.bf16.msra.mxu0 %v6080_v4 }
 0xf3a   : > { %5717 = vmatprep.subr.bf16.mxu1 %v6246_v1  ;;  %5729 = vmatprep.subr.bf16.mxu0 %v6246_v1 }
 0xfff   : > { %v3511_v22 = vpop.f32.mrb[32].mxu1  ;;  %v3613_v17 = vpop.f32.mrb[40].mxu0 }
0x1000   : > { %v3525_v24 = vpack.c.bf16 %v3511_v22, %v3511_v22  ;;  %v3627_v18 = vpack.c.bf16 %v3613_v17, %v3613_v17  ;;  %v5679_v20 = vpop.f32.mrb[33].mxu1  ;;  %v5691_v58 = vpop.f32.mrb[41].mxu0  ;;  %v5255_v17 = vld [vmem:[%s7377_s2 + $0x230] sm:$0xf] }
0x1001   : > { %v3514_v45 = vpop.f32.mrb[34].mxu1  ;;  %v3616_v7 = vpop.f32.mrb[42].mxu0 }
0x1002   : > { %v5680_v60 = vpop.f32.mrb[35].mxu1  ;;  %v5692_v2 = vpop.f32.mrb[43].mxu0  ;;  %5702 = vmatmul.mubr.msk.bf16.vlgmr.msra.gmra.mrb[36].mxu1 %vm3652_vm1, %v3627_v18  ;;  %5714 = vmatmul.mubr.msk.bf16.vlgmr.msra.gmra.mrb[44].mxu0 %vm3652_vm1, %v3525_v24  ;;  %vm4188_vm1 = vcmask 89168  }
0x1003   : > { %5719 = vmatprep.mubr.msk.bf16.mxu1 %vm6247_vm0, %v6246_v1  ;;  %5731 = vmatprep.mubr.msk.bf16.mxu0 %vm6247_vm0, %v6246_v1  ;;  %v5254_v2 = vld [vmem:[%s7377_s2 + $0x220] sm:$0xf] }
0x10d5   : > { %v3690_v53 = vpop.f32.mrb[36].mxu1  ;;  %v3757_v8 = vpop.f32.mrb[44].mxu0 }
0x10d6   : > { %v3758_v55 = vadd.f32 %v3757_v8, %v3690_v53  ;;  %v5703_v6 = vpop.f32.mrb[37].mxu1  ;;  %v5715_v57 = vpop.f32.mrb[45].mxu0 }
0x10d7   : > { %v3693_v9 = vpop.f32.mrb[38].mxu1  ;;  %v3760_v59 = vpop.f32.mrb[46].mxu0  ;;  %v6270_v6 = vmov 14  }
0x10d8   : > { %v7093_v13 = vadd.f32 %v3767_v0, %v3758_v55  ;;  %v5704_v5 = vpop.f32.mrb[39].mxu1  ;;  %v5716_v15 = vpop.f32.mrb[47].mxu0  ;;  %v5258_v0 = vld [vmem:[%s7377_s2 + $0x240] sm:$0xf]  ;;  %v6269_v55 = vmov 15  }
0x10da   : > { %v3770_v42 = vmul.f32 0.70710677, %v7093_v13  ;;  %v3794_v11 = vmul.f32 0.5, %v7093_v13 }
0x10dc   : > { %v3773_v23 = vand.u32 2147483647, %v3770_v42  ;;  %vm3771_vm15 = vcmp.ge.f32.partialorder %v3770_v42, 0.0 }
0x10dd   : > { %v3772_v34 = vsel %vm3771_vm15, 1.0, %v6256_v37  ;;  %vm4255_vm15 = vcmask 1006592  }
0x10de   : > { %v3774_v16 = vmul.f32 0.3275911, %v3773_v23  ;;  %v3787_v62 = vsub.f32 0.0, %v3773_v23 }
0x10e0   : > { %v3775_v25 = vadd.f32 1.0, %v3774_v16  ;;  %v3788_v28 = vmul.f32 %v3787_v62, %v3773_v23 }
0x10e2   : > { %6153 = vrcp.f32 %v3775_v25  ;;  %v3789_v63 = vmul.f32 1.442695, %v3788_v28 }
0x10e4   : > { %6155 = vpow2.f32 %v3789_v63 }
0x10ec   : > { %v6154_v27 = vpop.eup %6153 }
0x10ed   : > { %v3778_v14 = vmul.f32 1.0614054, %v6154_v27 }
0x10ee   : > { %v6156_v10 = vpop.eup %6155 }
0x10ef   : > { %v3779_v12 = vadd.f32 -1.4531521, %v3778_v14 }
0x10f1   : > { %v3780_v29 = vmul.f32 %v6154_v27, %v3779_v12 }
0x10f3   : > { %v3781_v30 = vadd.f32 1.4214138, %v3780_v29 }
0x10f5   : > { %v3782_v33 = vmul.f32 %v6154_v27, %v3781_v30 }
0x10f7   : > { %v3783_v47 = vadd.f32 -0.28449672, %v3782_v33 }
0x10f9   : > { %v3784_v31 = vmul.f32 %v6154_v27, %v3783_v47 }
0x10fb   : > { %v3785_v36 = vadd.f32 0.2548296, %v3784_v31 }
0x10fd   : > { %v3786_v32 = vmul.f32 %v6154_v27, %v3785_v36 }
0x10ff   : > { %v3791_v40 = vmul.f32 %v6156_v10, %v3786_v32 }
0x1101   : > { %v3792_v41 = vsub.f32 1.0, %v3791_v40 }
0x1103   : > { %v3793_v3 = vmul.f32 %v3792_v41, %v3772_v34 }
0x1105   : > { %v3795_v38 = vadd.f32 1.0, %v3793_v3 }
0x1107   : > { %v3796_v39 = vmul.f32 %v3795_v38, %v3794_v11 }
0x1109   : > { %3809 = vrot.lane.b32.xlu0 %v3796_v39, %s7425_s10  ;;  %3798 = vrot.lane.b32.xlu1 %v3796_v39, %s7426_s6 }
0x110d   : > { %3805 = vrot.lane.b32.xlu1 %v3796_v39, %s7427_s11 }
0x117b   : > { %v3810_v43 = vpop.permute.xlu0 %3809  ;;  %v3799_v44 = vpop.permute.xlu1 %3798 }
0x117c   : > { %3802 = vst.msk [vmem:[#allocation2] sm:$0xff] %vm3801_vm3, %v3799_v44 }
0x117d   : > { %3804 = vst.msk [vmem:[#allocation2 + $0x8] sm:$0xff] %vm3803_vm7, %v3799_v44 }
0x117e   : > { %3813 = vst.msk [vmem:[#allocation2 + $0x8] sm:$0xff] %vm3812_vm8, %v3810_v43 }
0x117f   : > { %v3806_v46 = vpop.permute.xlu1 %3805 }
0x1180   : > { %3808 = vst.msk [vmem:[#allocation2] sm:$0xff] %vm1217_vm2, %v3806_v46 }
0x1185   : > { %v3815_v48 = vld [vmem:[#allocation2 + $0x8] sm:$0xff] }
0x1186   : > { %v3817_v49 = vpack.c.bf16 %v3815_v48, %v3815_v48 }
0x1187   : > { %v3814_v50 = vld [vmem:[#allocation2] sm:$0xff] }
0x1188   : > { %3826 = vrot.lane.b32.xlu0 %v3817_v49, %s7419_s15  ;;  %v3816_v51 = vpack.c.bf16 %v3814_v50, %v3814_v50 }
0x118a   : > { %3824 = vrot.lane.b32.xlu1 %v3816_v51, %s7419_s15 }
0x118c   : > { %3879 = vrot.lane.b32.xlu0 %v3817_v49, %s7428_s12 }
0x118e   : > { %3877 = vrot.lane.b32.xlu1 %v3816_v51, %s7428_s12 }
0x1190   : > { %3933 = vrot.lane.b32.xlu0 %v3817_v49, %s7420_s26 }
0x1192   : > { %3931 = vrot.lane.b32.xlu1 %v3816_v51, %s7420_s26 }
0x1194   : > { %3987 = vperm.xlu0 %6015, %v7086_v56  }
0x1196   : > { %369 = vrot.lane.b32.xlu1 %v7086_v56, %s6268_s14  ;;  %s228_s14 = sand.u32 1, %s6229_s19  }
0x1198   : > { %6018 = vset.pattern.permute.xlu0 %v6269_v55 }
0x1199   : > { %4081 = vperm.xlu0 %6018, %v7086_v56  }
0x11fa   : > { %v3827_v61 = vpop.permute.xlu0 %3826 }
0x11fc   : > { %v3825_v54 = vpop.permute.xlu1 %3824 }
0x11fd   : > { %v3829_v4 = vsel %vm3828_vm9, %v3825_v54, %v3827_v61 }
0x11fe   : > { %v3835_v35 = vsel %vm3833_vm10, %v3829_v4, 0  ;;  %v3880_v22 = vpop.permute.xlu0 %3879 }
0x11ff   : > { %5718 = vmatpush3.bf16.msra.mxu1 %v3835_v35 }
0x1200   : > { %v3878_v24 = vpop.permute.xlu1 %3877  ;;  %5723 = vmatprep.subr.bf16.mxu1 %v6246_v1 }
0x1201   : > { %v3882_v18 = vsel %vm3881_vm11, %v3878_v24, %v3880_v22  ;;  %v4079_v22 = vpack.c.bf16 %v7093_v13, %v7093_v13  ;;  %v5260_v24 = vld [vmem:[%s7377_s2 + $0x260] sm:$0xf]  ;;  %v5262_v13 = vld [vmem:[%s7377_s2 + $0x270] sm:$0xf] }
0x1202   : > { %v3887_v20 = vsel %vm3833_vm10, %v3882_v18, 0  ;;  %5720 = vmatmul.mubr.msk.bf16.vlgmr.msra.gmra.mrb[40].mxu1 %vm3803_vm7, %v5255_v17  ;;  %v3934_v58 = vpop.permute.xlu0 %3933 }
0x1203   : > { %5724 = vmatpush3.bf16.msra.mxu1 %v3887_v20  ;;  %5725 = vmatprep.mubr.msk.bf16.mxu1 %vm6247_vm0, %v6246_v1  ;;  %v4088_v18 = vsel %vm3833_vm10, %v4079_v22, 0 }
0x1204   : > { %v3932_v45 = vpop.permute.xlu1 %3931  ;;  %5735 = vmatprep.subr.bf16.mxu1 %v6246_v1 }
0x1205   : > { %v3936_v7 = vsel %vm3935_vm12, %v3932_v45, %v3934_v58 }
0x1206   : > { %v3941_v60 = vsel %vm3833_vm10, %v3936_v7, 0 }
0x1207   : > { %5730 = vmatpush3.bf16.msra.mxu0 %v3941_v60 }
0x1208   : > { %v370_v53 = vpop.permute.xlu1 %369  ;;  %5747 = vmatprep.subr.bf16.mxu0 %v6246_v1 }
0x1209   : > { %v410_v8 = vadd.f32 %v6434_v26, %v370_v53 }
0x120a   : > { %5726 = vmatmul.mubr.msk.bf16.vlgmr.msra.gmra.mrb[44].mxu1 %vm3803_vm7, %v5254_v2  ;;  %5732 = vmatmul.mubr.msk.bf16.vlgmr.msra.gmra.mrb[48].mxu0 %vm3803_vm7, %v5258_v0 }
0x120b   : > { %3993 = vperm.xlu1 %6016, %v410_v8   ;;  %5737 = vmatprep.mubr.msk.bf16.mxu1 %vm6247_vm0, %v6246_v1 }
0x120c   : > { %5749 = vmatprep.mubr.msk.bf16.mxu0 %vm6247_vm0, %v6246_v1 }
0x120f   : > { %6017 = vset.pattern.permute.xlu1 %v6270_v6 }
0x1210   : > { %4028 = vperm.xlu1 %6017, %v7086_v56  }
0x1213   : > { %v3988_v5 = vpop.permute.xlu0 %3987 }
0x1214   : > { %6020 = vset.pattern.permute.xlu1 %v6255_v19 }
0x1218   : > { %v4082_v20 = vpop.permute.xlu0 %4081 }
0x128a   : > { %v3994_v29 = vpop.permute.xlu1 %3993 }
0x128f   : > { %v4029_v58 = vpop.permute.xlu1 %4028 }
0x1290   : > { %v5827_v45 = vadd.f32 %v4082_v20, %v4029_v58 }
0x12d5   : > { %v3871_v26 = vpop.f32.mrb[40].mxu1 }
0x12d6   : > { %v5721_v57 = vpop.f32.mrb[41].mxu1 }
0x12d7   : > { %v3874_v9 = vpop.f32.mrb[42].mxu1 }
0x12d8   : > { %v5722_v59 = vpop.f32.mrb[43].mxu1 }
0x12dd   : > { %v3923_v15 = vpop.f32.mrb[44].mxu1  ;;  %v3977_v42 = vpop.f32.mrb[48].mxu0 }
0x12de   : > { %v3924_v23 = vadd.f32 %v3923_v15, %v3871_v26  ;;  %v5727_v16 = vpop.f32.mrb[45].mxu1  ;;  %v5733_v25 = vpop.f32.mrb[49].mxu0 }
0x12df   : > { %v3926_v62 = vpop.f32.mrb[46].mxu1  ;;  %v3980_v27 = vpop.f32.mrb[50].mxu0 }
0x12e0   : > { %v3983_v28 = vadd.f32 %v3977_v42, %v3924_v23  ;;  %v5728_v14 = vpop.f32.mrb[47].mxu1  ;;  %v5734_v12 = vpop.f32.mrb[51].mxu0 }
0x12e2   : > { %v3990_v63 = vadd.f32 %v3988_v5, %v3983_v28 }
0x12e4   : > { %v3996_v30 = vadd.f32 %v3994_v29, %v3990_v63 }
0x12e6   : > { %v3997_v33 = vmul.f32 0.70710677, %v3996_v30  ;;  %v4021_v61 = vmul.f32 0.5, %v3996_v30 }
0x12e8   : > { %v4000_v19 = vand.u32 2147483647, %v3997_v33  ;;  %vm3998_vm13 = vcmp.ge.f32.partialorder %v3997_v33, 0.0 }
0x12e9   : > { %v3999_v51 = vsel %vm3998_vm13, 1.0, %v6256_v37  ;;  %vm4309_vm13 = vcmask 957440  }
0x12ea   : > { %v4001_v47 = vmul.f32 0.3275911, %v4000_v19  ;;  %v4014_v36 = vsub.f32 0.0, %v4000_v19 }
0x12ec   : > { %v4002_v31 = vadd.f32 1.0, %v4001_v47  ;;  %v4015_v10 = vmul.f32 %v4014_v36, %v4000_v19 }
0x12ee   : > { %6157 = vrcp.f32 %v4002_v31  ;;  %v4016_v34 = vmul.f32 1.442695, %v4015_v10 }
0x12f0   : > { %6159 = vpow2.f32 %v4016_v34 }
0x12f8   : > { %v6158_v32 = vpop.eup %6157 }
0x12f9   : > { %v4005_v40 = vmul.f32 1.0614054, %v6158_v32 }
0x12fa   : > { %v6160_v48 = vpop.eup %6159 }
0x12fb   : > { %v4006_v41 = vadd.f32 -1.4531521, %v4005_v40 }
0x12fd   : > { %v4007_v3 = vmul.f32 %v6158_v32, %v4006_v41 }
0x12ff   : > { %v4008_v11 = vadd.f32 1.4214138, %v4007_v3 }
0x1301   : > { %v4009_v38 = vmul.f32 %v6158_v32, %v4008_v11 }
0x1303   : > { %v4010_v39 = vadd.f32 -0.28449672, %v4009_v38 }
0x1305   : > { %v4011_v43 = vmul.f32 %v6158_v32, %v4010_v39 }
0x1307   : > { %v4012_v44 = vadd.f32 0.2548296, %v4011_v43 }
0x1309   : > { %v4013_v46 = vmul.f32 %v6158_v32, %v4012_v44  ;;  %v6271_v44 = vmov 16  }
0x130a   : > { %6019 = vset.pattern.permute.xlu0 %v6271_v44 }
0x130b   : > { %v4018_v49 = vmul.f32 %v6160_v48, %v4013_v46 }
0x130d   : > { %v4019_v50 = vsub.f32 1.0, %v4018_v49 }
0x130f   : > { %v4020_v52 = vmul.f32 %v4019_v50, %v3999_v51 }
0x1311   : > { %v4022_v54 = vadd.f32 1.0, %v4020_v52  ;;  %v5265_v52 = vld [vmem:[%s7377_s2 + $0x290] sm:$0xf] }
0x1313   : > { %v4023_v4 = vmul.f32 %v4022_v54, %v4021_v61 }
0x1315   : > { %v4026_v35 = vpack.c.bf16 %v4023_v4, %v4023_v4 }
0x1317   : > { %v4035_v17 = vsel %vm3833_vm10, %v4026_v35, 0 }
0x1318   : > { %5736 = vmatpush3.bf16.msra.mxu1 %v4035_v17 }
0x1319   : > { %5741 = vmatprep.subr.bf16.mxu1 %v6246_v1 }
0x131b   : > { %5738 = vmatmul.mubr.msk.bf16.vlgmr.msra.gmra.mrb[48].mxu1 %vm3803_vm7, %v5260_v24 }
0x131c   : > { %5742 = vmatpush3.bf16.msra.mxu1 %v4088_v18  ;;  %5743 = vmatprep.mubr.msk.bf16.mxu1 %vm6247_vm0, %v6246_v1  ;;  %v5264_v18 = vld [vmem:[%s7377_s2 + $0x280] sm:$0xf] }
0x131d   : > { %5759 = vmatprep.subr.bf16.mxu1 %v6246_v1 }
0x1327   : > { %5744 = vmatmul.mubr.msk.bf16.vlgmr.msra.gmra.mrb[48].mxu1 %vm3803_vm7, %v5262_v13  ;;  %v5268_v13 = vld [vmem:[%s7377_s2 + $0x2a0] sm:$0xf] }
0x1328   : > { %5761 = vmatprep.mubr.msk.bf16.mxu1 %vm6247_vm0, %v6246_v1 }
0x13fa   : > { %v4124_v7 = vpop.f32.mrb[48].mxu1 }
0x13fb   : > { %v7163_v60 = vadd.f32 %v5827_v45, %v4124_v7  ;;  %v5745_v2 = vpop.f32.mrb[49].mxu1  ;;  %v6273_v45 = vmov 19   ;;  %v6274_v7 = vmov 18  }
0x13fc   : > { %v4127_v0 = vpop.f32.mrb[50].mxu1 }
0x13fd   : > { %v4131_v53 = vmul.f32 0.70710677, %v7163_v60  ;;  %v5746_v8 = vpop.f32.mrb[51].mxu1  ;;  %v4155_v19 = vmul.f32 0.5, %v7163_v60 }
0x13ff   : > { %v4134_v55 = vand.u32 2147483647, %v4131_v53  ;;  %vm4132_vm14 = vcmp.ge.f32.partialorder %v4131_v53, 0.0 }
0x1400   : > { %v4133_v30 = vsel %vm4132_vm14, 1.0, %v6256_v37 }
0x1401   : > { %v4135_v6 = vmul.f32 0.3275911, %v4134_v55  ;;  %v4148_v57 = vsub.f32 0.0, %v4134_v55 }
0x1403   : > { %v4136_v26 = vadd.f32 1.0, %v4135_v6  ;;  %v4149_v59 = vmul.f32 %v4148_v57, %v4134_v55 }
0x1405   : > { %6161 = vrcp.f32 %v4136_v26  ;;  %v4150_v42 = vmul.f32 1.442695, %v4149_v59 }
0x1407   : > { %6163 = vpow2.f32 %v4150_v42 }
0x140f   : > { %v6162_v9 = vpop.eup %6161 }
0x1410   : > { %v4139_v5 = vmul.f32 1.0614054, %v6162_v9 }
0x1411   : > { %v6164_v12 = vpop.eup %6163 }
0x1412   : > { %v4140_v15 = vadd.f32 -1.4531521, %v4139_v5 }
0x1414   : > { %v4141_v23 = vmul.f32 %v6162_v9, %v4140_v15 }
0x1416   : > { %v4142_v16 = vadd.f32 1.4214138, %v4141_v23 }
0x1418   : > { %v4143_v25 = vmul.f32 %v6162_v9, %v4142_v16 }
0x141a   : > { %v4144_v62 = vadd.f32 -0.28449672, %v4143_v25 }
0x141c   : > { %v4145_v27 = vmul.f32 %v6162_v9, %v4144_v62 }
0x141e   : > { %v4146_v28 = vadd.f32 0.2548296, %v4145_v27 }
0x1420   : > { %v4147_v14 = vmul.f32 %v6162_v9, %v4146_v28 }
0x1422   : > { %v4152_v63 = vmul.f32 %v6164_v12, %v4147_v14 }
0x1424   : > { %v4153_v29 = vsub.f32 1.0, %v4152_v63 }
0x1426   : > { %v4154_v33 = vmul.f32 %v4153_v29, %v4133_v30 }
0x1428   : > { %v4156_v47 = vadd.f32 1.0, %v4154_v33 }
0x142a   : > { %v4157_v31 = vmul.f32 %v4156_v47, %v4155_v19 }
0x142c   : > { %4168 = vrot.lane.b32.xlu0 %v4157_v31, %s7425_s10  ;;  %4159 = vrot.lane.b32.xlu1 %v4157_v31, %s7426_s6 }
0x1430   : > { %4176 = vrot.lane.b32.xlu0 %v4157_v31, %s7422_s16  ;;  %4164 = vrot.lane.b32.xlu1 %v4157_v31, %s7427_s11 }
0x1434   : > { %4185 = vrot.lane.b32.xlu0 %v4157_v31, %s7424_s13  ;;  %4172 = vrot.lane.b32.xlu1 %v4157_v31, %s7421_s25 }
0x1438   : > { %4181 = vrot.lane.b32.xlu1 %v4157_v31, %s7423_s30 }
0x149e   : > { %v4169_v36 = vpop.permute.xlu0 %4168  ;;  %v4160_v32 = vpop.permute.xlu1 %4159 }
0x149f   : > { %4162 = vst.msk [vmem:[#allocation2] sm:$0xff] %vm3801_vm3, %v4160_v32 }
0x14a0   : > { %4163 = vst.msk [vmem:[#allocation2 + $0x8] sm:$0xff] %vm3803_vm7, %v4160_v32 }
0x14a1   : > { %4171 = vst.msk [vmem:[#allocation2 + $0x8] sm:$0xff] %vm3812_vm8, %v4169_v36 }
0x14a2   : > { %v4177_v10 = vpop.permute.xlu0 %4176  ;;  %v4165_v40 = vpop.permute.xlu1 %4164 }
0x14a3   : > { %4180 = vst.msk [vmem:[#allocation2 + $0x8] sm:$0xff] %vm4179_vm5, %v4177_v10 }
0x14a4   : > { %4167 = vst.msk [vmem:[#allocation2] sm:$0xff] %vm1217_vm2, %v4165_v40 }
0x14a6   : > { %v4186_v41 = vpop.permute.xlu0 %4185  ;;  %v4173_v34 = vpop.permute.xlu1 %4172 }
0x14a7   : > { %4189 = vst.msk [vmem:[#allocation2 + $0x8] sm:$0xff] %vm4188_vm1, %v4186_v41 }
0x14a8   : > { %4175 = vst.msk [vmem:[#allocation2] sm:$0xff] %vm1251_vm4, %v4173_v34 }
0x14aa   : > { %v4182_v3 = vpop.permute.xlu1 %4181 }
0x14ab   : > { %4184 = vst.msk [vmem:[#allocation2] sm:$0xff] %vm1285_vm6, %v4182_v3 }
0x14ae   : > { %v4191_v11 = vld [vmem:[#allocation2 + $0x8] sm:$0xff] }
0x14af   : > { %v4193_v38 = vpack.c.bf16 %v4191_v11, %v4191_v11 }
0x14b1   : > { %4202 = vrot.lane.b32.xlu0 %v4193_v38, %s7419_s15 }
0x14b2   : > { %v4190_v39 = vld [vmem:[#allocation2] sm:$0xff] }
0x14b3   : > { %v4192_v43 = vpack.c.bf16 %v4190_v39, %v4190_v39 }
0x14b5   : > { %4253 = vrot.lane.b32.xlu0 %v4193_v38, %s7416_s8  ;;  %4200 = vrot.lane.b32.xlu1 %v4192_v43, %s7419_s15 }
0x14b9   : > { %4307 = vrot.lane.b32.xlu0 %v4193_v38, %s7418_s17  ;;  %4251 = vrot.lane.b32.xlu1 %v4192_v43, %s7416_s8 }
0x14bd   : > { %4305 = vrot.lane.b32.xlu1 %v4192_v43, %s7418_s17  ;;  %4361 = vperm.xlu0 %6019, %v7086_v56  }
0x14c1   : > { %417 = vrot.lane.b32.xlu1 %v7086_v56, %s6272_s1  ;;  %6022 = vset.pattern.permute.xlu0 %v6273_v45 }
0x14c2   : > { %4455 = vperm.xlu0 %6022, %v7086_v56  }
0x1523   : > { %v4203_v46 = vpop.permute.xlu0 %4202 }
0x1527   : > { %v4201_v48 = vpop.permute.xlu1 %4200  ;;  %v4254_v50 = vpop.permute.xlu0 %4253 }
0x1528   : > { %v4204_v49 = vsel %vm3828_vm9, %v4201_v48, %v4203_v46 }
0x1529   : > { %v4209_v51 = vsel %vm3833_vm10, %v4204_v49, 0  ;;  %v4453_v49 = vpack.c.bf16 %v7163_v60, %v7163_v60  ;;  %v5272_v60 = vld [vmem:[%s7377_s2 + $0x2d0] sm:$0xf] }
0x152a   : > { %5748 = vmatpush3.bf16.msra.mxu0 %v4209_v51  ;;  %v5270_v51 = vld [vmem:[%s7377_s2 + $0x2c0] sm:$0xf] }
0x152b   : > { %v4252_v61 = vpop.permute.xlu1 %4251  ;;  %5753 = vmatprep.subr.bf16.mxu0 %v6246_v1  ;;  %v4308_v35 = vpop.permute.xlu0 %4307 }
0x152c   : > { %v4256_v54 = vsel %vm4255_vm15, %v4252_v61, %v4254_v50 }
0x152d   : > { %v4261_v4 = vsel %vm3833_vm10, %v4256_v54, 0  ;;  %5750 = vmatmul.mubr.msk.bf16.vlgmr.msra.gmra.mrb[52].mxu0 %vm3803_vm7, %v5265_v52  ;;  %v4462_v52 = vsel %vm3833_vm10, %v4453_v49, 0 }
0x152e   : > { %5754 = vmatpush3.bf16.msra.mxu0 %v4261_v4  ;;  %5755 = vmatprep.mubr.msk.bf16.mxu0 %vm6247_vm0, %v6246_v1 }
0x152f   : > { %v4306_v22 = vpop.permute.xlu1 %4305  ;;  %5765 = vmatprep.subr.bf16.mxu0 %v6246_v1 }
0x1530   : > { %v4310_v17 = vsel %vm4309_vm13, %v4306_v22, %v4308_v35 }
0x1531   : > { %v4315_v24 = vsel %vm3833_vm10, %v4310_v17, 0 }
0x1532   : > { %5760 = vmatpush3.bf16.msra.mxu1 %v4315_v24 }
0x1533   : > { %v418_v20 = vpop.permute.xlu1 %417  ;;  %5777 = vmatprep.subr.bf16.mxu1 %v6246_v1 }
0x1534   : > { %v458_v58 = vadd.f32 %v6650_v21, %v418_v20 }
0x1535   : > { %5756 = vmatmul.mubr.msk.bf16.vlgmr.msra.gmra.mrb[56].mxu0 %vm3803_vm7, %v5264_v18  ;;  %5762 = vmatmul.mubr.msk.bf16.vlgmr.msra.gmra.mrb[52].mxu1 %vm3803_vm7, %v5268_v13 }
0x1536   : > { %4367 = vperm.xlu1 %6020, %v458_v58   ;;  %5767 = vmatprep.mubr.msk.bf16.mxu0 %vm6247_vm0, %v6246_v1 }
0x1537   : > { %5779 = vmatprep.mubr.msk.bf16.mxu1 %vm6247_vm0, %v6246_v1 }
0x153a   : > { %6021 = vset.pattern.permute.xlu1 %v6274_v7 }
0x153b   : > { %4402 = vperm.xlu1 %6021, %v7086_v56  }
0x153c   : > { %v4362_v8 = vpop.permute.xlu0 %4361 }
0x1541   : > { %v4456_v61 = vpop.permute.xlu0 %4455 }
0x15b5   : > { %v4368_v25 = vpop.permute.xlu1 %4367 }
0x15ba   : > { %v4403_v54 = vpop.permute.xlu1 %4402 }
0x15bb   : > { %v5829_v4 = vadd.f32 %v4456_v61, %v4403_v54 }
0x1600   : > { %v4245_v21 = vpop.f32.mrb[52].mxu0 }
0x1601   : > { %v5751_v2 = vpop.f32.mrb[53].mxu0 }
0x1602   : > { %v4248_v0 = vpop.f32.mrb[54].mxu0 }
0x1603   : > { %v5752_v53 = vpop.f32.mrb[55].mxu0 }
0x1608   : > { %v4297_v55 = vpop.f32.mrb[56].mxu0  ;;  %v4351_v6 = vpop.f32.mrb[52].mxu1 }
0x1609   : > { %v4298_v26 = vadd.f32 %v4297_v55, %v4245_v21  ;;  %v5757_v57 = vpop.f32.mrb[57].mxu0  ;;  %v5763_v9 = vpop.f32.mrb[53].mxu1 }
0x160a   : > { %v4300_v59 = vpop.f32.mrb[58].mxu0  ;;  %v4354_v5 = vpop.f32.mrb[54].mxu1 }
0x160b   : > { %v4357_v15 = vadd.f32 %v4351_v6, %v4298_v26  ;;  %v5758_v42 = vpop.f32.mrb[59].mxu0  ;;  %v5764_v23 = vpop.f32.mrb[55].mxu1 }
0x160d   : > { %v4364_v16 = vadd.f32 %v4362_v8, %v4357_v15 }
0x160f   : > { %v4370_v62 = vadd.f32 %v4368_v25, %v4364_v16 }
0x1611   : > { %v4371_v27 = vmul.f32 0.70710677, %v4370_v62  ;;  %v4395_v43 = vmul.f32 0.5, %v4370_v62 }
0x1613   : > { %v4374_v56 = vand.u32 2147483647, %v4371_v27  ;;  %vm4372_vm14 = vcmp.ge.f32.partialorder %v4371_v27, 0.0 }
0x1614   : > { %v4373_v38 = vsel %vm4372_vm14, 1.0, %v6256_v37 }
0x1615   : > { %v4375_v28 = vmul.f32 0.3275911, %v4374_v56  ;;  %v4388_v12 = vsub.f32 0.0, %v4374_v56 }
0x1617   : > { %v4376_v14 = vadd.f32 1.0, %v4375_v28  ;;  %v4389_v29 = vmul.f32 %v4388_v12, %v4374_v56 }
0x1619   : > { %6165 = vrcp.f32 %v4376_v14  ;;  %v4390_v19 = vmul.f32 1.442695, %v4389_v29 }
0x161b   : > { %6167 = vpow2.f32 %v4390_v19 }
0x1623   : > { %v6166_v63 = vpop.eup %6165 }
0x1624   : > { %v4379_v30 = vmul.f32 1.0614054, %v6166_v63 }
0x1625   : > { %v6168_v34 = vpop.eup %6167 }
0x1626   : > { %v4380_v33 = vadd.f32 -1.4531521, %v4379_v30 }
0x1628   : > { %v4381_v47 = vmul.f32 %v6166_v63, %v4380_v33 }
0x162a   : > { %v4382_v31 = vadd.f32 1.4214138, %v4381_v47 }
0x162c   : > { %v4383_v36 = vmul.f32 %v6166_v63, %v4382_v31 }
0x162e   : > { %v4384_v32 = vadd.f32 -0.28449672, %v4383_v36  ;;  %v6275_v36 = vmov 20  }
0x162f   : > { %6023 = vset.pattern.permute.xlu1 %v6275_v36  ;;  %6024 = vset.pattern.permute.xlu0 %v6275_v36 }
0x1630   : > { %v4385_v10 = vmul.f32 %v6166_v63, %v4384_v32  ;;  %v4946_v32 = vld [vmem:[%s7378_s3] sm:$0x1] }
0x1632   : > { %v4386_v40 = vadd.f32 0.2548296, %v4385_v10 }
0x1634   : > { %v4387_v41 = vmul.f32 %v6166_v63, %v4386_v40 }
0x1636   : > { %v4392_v3 = vmul.f32 %v6168_v34, %v4387_v41 }
0x1638   : > { %v4393_v11 = vsub.f32 1.0, %v4392_v3 }
0x163a   : > { %v4394_v39 = vmul.f32 %v4393_v11, %v4373_v38  ;;  %v5275_v11 = vld [vmem:[%s7377_s2 + $0x2f0] sm:$0xf] }
0x163c   : > { %v4396_v44 = vadd.f32 1.0, %v4394_v39 }
0x163e   : > { %v4397_v46 = vmul.f32 %v4396_v44, %v4395_v43 }
0x1640   : > { %v4400_v48 = vpack.c.bf16 %v4397_v46, %v4397_v46 }
0x1642   : > { %v4409_v50 = vsel %vm3833_vm10, %v4400_v48, 0 }
0x1643   : > { %5766 = vmatpush3.bf16.msra.mxu0 %v4409_v50 }
0x1644   : > { %5771 = vmatprep.subr.bf16.mxu0 %v6246_v1 }
0x1646   : > { %5768 = vmatmul.mubr.msk.bf16.vlgmr.msra.gmra.mrb[60].mxu0 %vm3803_vm7, %v5270_v51  ;;  %v5274_v51 = vld [vmem:[%s7377_s2 + $0x2e0] sm:$0xf] }
0x1647   : > { %5772 = vmatpush3.bf16.msra.mxu0 %v4462_v52  ;;  %5773 = vmatprep.mubr.msk.bf16.mxu0 %vm6247_vm0, %v6246_v1  ;;  %v5278_v52 = vld [vmem:[%s7377_s2 + $0x300] sm:$0xf] }
0x1648   : > { %5789 = vmatprep.subr.bf16.mxu0 %v6246_v1 }
0x1652   : > { %5774 = vmatmul.mubr.msk.bf16.vlgmr.msra.gmra.mrb[60].mxu0 %vm3803_vm7, %v5272_v60 }
0x1653   : > { %5791 = vmatprep.mubr.msk.bf16.mxu0 %vm6247_vm0, %v6246_v1 }
0x1725   : > { %v4498_v35 = vpop.f32.mrb[60].mxu0 }
0x1726   : > { %v5830_v22 = vadd.f32 %v5829_v4, %v4498_v35  ;;  %v5775_v17 = vpop.f32.mrb[61].mxu0 }
0x1727   : > { %v4501_v24 = vpop.f32.mrb[62].mxu0 }
0x1728   : > { %v4505_v18 = vmul.f32 0.70710677, %v5830_v22  ;;  %v5776_v13 = vpop.f32.mrb[63].mxu0  ;;  %v4529_v62 = vmul.f32 0.5, %v5830_v22 }
0x1729   : > { %v5282_v13 = vld [vmem:[%s7377_s2 + $0x320] sm:$0xf] }
0x172a   : > { %v4508_v20 = vand.u32 2147483647, %v4505_v18  ;;  %vm4506_vm14 = vcmp.ge.f32.partialorder %v4505_v18, 0.0  ;;  %v5280_v18 = vld [vmem:[%s7377_s2 + $0x310] sm:$0xf] }
0x172b   : > { %v4507_v16 = vsel %vm4506_vm14, 1.0, %v6256_v37 }
0x172c   : > { %v4509_v58 = vmul.f32 0.3275911, %v4508_v20  ;;  %v4522_v7 = vsub.f32 0.0, %v4508_v20 }
0x172e   : > { %v4510_v45 = vadd.f32 1.0, %v4509_v58  ;;  %v4523_v2 = vmul.f32 %v4522_v7, %v4508_v20 }
0x1730   : > { %6169 = vrcp.f32 %v4510_v45  ;;  %v4524_v8 = vmul.f32 1.442695, %v4523_v2 }
0x1732   : > { %6171 = vpow2.f32 %v4524_v8  ;;  %v5286_v8 = vld [vmem:[%s7377_s2 + $0x340] sm:$0xf] }
0x173a   : > { %v6170_v21 = vpop.eup %6169 }
0x173b   : > { %v4513_v0 = vmul.f32 1.0614054, %v6170_v21 }
0x173c   : > { %v6172_v15 = vpop.eup %6171 }
0x173d   : > { %v4514_v53 = vadd.f32 -1.4531521, %v4513_v0 }
0x173f   : > { %v4515_v55 = vmul.f32 %v6170_v21, %v4514_v53  ;;  %v5284_v53 = vld [vmem:[%s7377_s2 + $0x330] sm:$0xf] }
0x1741   : > { %v4516_v6 = vadd.f32 1.4214138, %v4515_v55 }
0x1743   : > { %v4517_v26 = vmul.f32 %v6170_v21, %v4516_v6 }
0x1745   : > { %v4518_v57 = vadd.f32 -0.28449672, %v4517_v26 }
0x1747   : > { %v4519_v9 = vmul.f32 %v6170_v21, %v4518_v57 }
0x1749   : > { %v4520_v59 = vadd.f32 0.2548296, %v4519_v9 }
0x174b   : > { %v4521_v5 = vmul.f32 %v6170_v21, %v4520_v59 }
0x174d   : > { %v4526_v42 = vmul.f32 %v6172_v15, %v4521_v5 }
0x174f   : > { %v4527_v23 = vsub.f32 1.0, %v4526_v42 }
0x1751   : > { %v4528_v25 = vmul.f32 %v4527_v23, %v4507_v16 }
0x1753   : > { %v4530_v27 = vadd.f32 1.0, %v4528_v25 }
0x1755   : > { %v4531_v56 = vmul.f32 %v4530_v27, %v4529_v62 }
0x1757   : > { %4542 = vrot.lane.b32.xlu0 %v4531_v56, %s7425_s10  ;;  %4533 = vrot.lane.b32.xlu1 %v4531_v56, %s7426_s6 }
0x175b   : > { %4550 = vrot.lane.b32.xlu0 %v4531_v56, %s7422_s16  ;;  %4538 = vrot.lane.b32.xlu1 %v4531_v56, %s7427_s11  ;;  %s6179_s16 = sshll.u32 %s6276_s22, 4  ;;  %s6180_s16 = int_to_ptr.vmem [resolvable:$false] %s6179_s16 }
0x175f   : > { %4558 = vrot.lane.b32.xlu0 %v4531_v56, %s7424_s13  ;;  %4546 = vrot.lane.b32.xlu1 %v4531_v56, %s7421_s25 }
0x1763   : > { %4554 = vrot.lane.b32.xlu1 %v4531_v56, %s7423_s30  ;;  %s6181_s30 = scalar_lea.vmem %s6180_s16, 32 }
0x17c9   : > { %v4543_v28 = vpop.permute.xlu0 %4542  ;;  %v4534_v37 = vpop.permute.xlu1 %4533 }
0x17ca   : > { %4536 = vst.msk [vmem:[#allocation2] sm:$0xff] %vm3801_vm3, %v4534_v37 }
0x17cb   : > { %4537 = vst.msk [vmem:[#allocation2 + $0x8] sm:$0xff] %vm3803_vm7, %v4534_v37 }
0x17cc   : > { %4545 = vst.msk [vmem:[#allocation2 + $0x8] sm:$0xff] %vm3812_vm8, %v4543_v28 }
0x17cd   : > { %v4551_v14 = vpop.permute.xlu0 %4550  ;;  %v4539_v12 = vpop.permute.xlu1 %4538 }
0x17ce   : > { %4553 = vst.msk [vmem:[#allocation2 + $0x8] sm:$0xff] %vm4179_vm5, %v4551_v14 }
0x17cf   : > { %4541 = vst.msk [vmem:[#allocation2] sm:$0xff] %vm1217_vm2, %v4539_v12  ;;  %vm4576_vm2 = vcmask 998400  }
0x17d1   : > { %v4559_v63 = vpop.permute.xlu0 %4558  ;;  %v4547_v29 = vpop.permute.xlu1 %4546 }
0x17d2   : > { %4561 = vst.msk [vmem:[#allocation2 + $0x8] sm:$0xff] %vm4188_vm1, %v4559_v63 }
0x17d3   : > { %4549 = vst.msk [vmem:[#allocation2] sm:$0xff] %vm1251_vm4, %v4547_v29  ;;  %vm4843_vm4 = vcmask 965632  }
0x17d5   : > { %v4555_v30 = vpop.permute.xlu1 %4554 }
0x17d6   : > { %4557 = vst.msk [vmem:[#allocation2] sm:$0xff] %vm1285_vm6, %v4555_v30 }
0x17d9   : > { %v4563_v33 = vld [vmem:[#allocation2 + $0x8] sm:$0xff] }
0x17da   : > { %v4565_v19 = vpack.c.bf16 %v4563_v33, %v4563_v33 }
0x17dc   : > { %4574 = vrot.lane.b32.xlu0 %v4565_v19, %s7415_s7 }
0x17dd   : > { %v4562_v47 = vld [vmem:[#allocation2] sm:$0xff] }
0x17de   : > { %v4564_v31 = vpack.c.bf16 %v4562_v47, %v4562_v47 }
0x17e0   : > { %4626 = vrot.lane.b32.xlu0 %v4565_v19, %s7416_s8  ;;  %4572 = vrot.lane.b32.xlu1 %v4564_v31, %s7415_s7  ;;  %s229_s7 = scalar_lea.vmem [#allocation3], %s228_s14 }
0x17e4   : > { %4679 = vrot.lane.b32.xlu0 %v4565_v19, %s7428_s12  ;;  %4624 = vrot.lane.b32.xlu1 %v4564_v31, %s7416_s8  ;;  %s4968_s8 = sshll.u32 %s229_s7, 4  ;;  %s7335_s8 = int_to_ptr.vmem [resolvable:$true] %s4968_s8 }
0x17e5   : > { %s6175_s25 = scalar_lea.vmem %s7335_s8, 16  ;;  %p6182_p0 = scmp.lt.s32.totalorder %s7335_s8, %s6180_s16 }
0x17e6   : > { %p6176_p11 = scmp.ne.s32.totalorder %s7335_s8, %s6175_s25  ;;  %p6183_p1 = scmp.lt.s32.totalorder %s6181_s30, %s6175_s25 }
0x17e8   : > { %4733 = vrot.lane.b32.xlu0 %v4565_v19, %s7419_s15  ;;  %4677 = vrot.lane.b32.xlu1 %v4564_v31, %s7428_s12  ;;  %p6177_p12 = pnand %p6176_p11, %p6345_p5  ;;  %p6184_p2 = por %p6183_p1, %p6182_p0 }
0x17ea   : > { %p6178_p13 = pneg %p6177_p12 }
0x17ec   : > { %4787 = vrot.lane.b32.xlu0 %v4565_v19, %s7420_s26  ;;  %4731 = vrot.lane.b32.xlu1 %v4564_v31, %s7419_s15  ;;  %p6185_p3 = pnand %p6184_p2, %p6178_p13 }
0x17f0   : > { %4841 = vrot.lane.b32.xlu0 %v4565_v19, %s7417_s9  ;;  %4785 = vrot.lane.b32.xlu1 %v4564_v31, %s7420_s26 }
0x17f4   : > { %4896 = vrot.lane.b32.xlu0 %v4565_v19, %s7418_s17  ;;  %4839 = vrot.lane.b32.xlu1 %v4564_v31, %s7417_s9  ;;  %s7333_s9 = scalar_lea.hbm %s7380_s5, %s5288_s23 }
0x17f8   : > { %4894 = vrot.lane.b32.xlu1 %v4564_v31, %s7418_s17  ;;  %s4956_s17 = scalar_lea.sflag [#allocation4], %s228_s14 }
0x17fc   : > { %4949 = vperm.xlu1 %6023, %v4946_v32  }
0x184e   : > { %v4575_v10 = vpop.permute.xlu0 %4574 }
0x1852   : > { %v4627_v40 = vpop.permute.xlu0 %4626  ;;  %v4573_v41 = vpop.permute.xlu1 %4572 }
0x1853   : > { %v4577_v34 = vsel %vm4576_vm2, %v4573_v41, %v4575_v10 }
0x1854   : > { %v4582_v3 = vsel %vm3833_vm10, %v4577_v34, 0 }
0x1855   : > { %5778 = vmatpush3.bf16.msra.mxu1 %v4582_v3 }
0x1856   : > { %v4680_v38 = vpop.permute.xlu0 %4679  ;;  %v4625_v39 = vpop.permute.xlu1 %4624  ;;  %5783 = vmatprep.subr.bf16.mxu1 %v6246_v1 }
0x1857   : > { %v4628_v43 = vsel %vm4255_vm15, %v4625_v39, %v4627_v40 }
0x1858   : > { %v4633_v44 = vsel %vm3833_vm10, %v4628_v43, 0  ;;  %5780 = vmatmul.mubr.msk.bf16.vlgmr.msra.gmra.mrb[56].mxu1 %vm3803_vm7, %v5275_v11 }
0x1859   : > { %5784 = vmatpush3.bf16.msra.mxu1 %v4633_v44  ;;  %5785 = vmatprep.mubr.msk.bf16.mxu1 %vm6247_vm0, %v6246_v1 }
0x185a   : > { %v4734_v46 = vpop.permute.xlu0 %4733  ;;  %v4678_v48 = vpop.permute.xlu1 %4677  ;;  %5795 = vmatprep.subr.bf16.mxu1 %v6246_v1 }
0x185b   : > { %v4681_v49 = vsel %vm3881_vm11, %v4678_v48, %v4680_v38 }
0x185c   : > { %v4686_v50 = vsel %vm3833_vm10, %v4681_v49, 0 }
0x185d   : > { %5790 = vmatpush3.bf16.msra.mxu0 %v4686_v50 }
0x185e   : > { %v4788_v60 = vpop.permute.xlu0 %4787  ;;  %v4732_v61 = vpop.permute.xlu1 %4731  ;;  %5801 = vmatprep.subr.bf16.mxu0 %v6246_v1 }
0x185f   : > { %v4735_v54 = vsel %vm3828_vm9, %v4732_v61, %v4734_v46 }
0x1860   : > { %v4740_v4 = vsel %vm3833_vm10, %v4735_v54, 0  ;;  %5786 = vmatmul.mubr.msk.bf16.vlgmr.msra.gmra.mrb[60].mxu1 %vm3803_vm7, %v5274_v51  ;;  %5792 = vmatmul.mubr.msk.bf16.vlgmr.msra.gmra.mrb[64].mxu0 %vm3803_vm7, %v5278_v52 }
0x1861   : > { %5796 = vmatpush3.bf16.msra.mxu1 %v4740_v4  ;;  %5797 = vmatprep.mubr.msk.bf16.mxu1 %vm6247_vm0, %v6246_v1 }
0x1862   : > { %v4786_v35 = vpop.permute.xlu1 %4785  ;;  %5807 = vmatprep.subr.bf16.mxu1 %v6246_v1  ;;  %5803 = vmatprep.mubr.msk.bf16.mxu0 %vm6247_vm0, %v6246_v1  ;;  %v4842_v17 = vpop.permute.xlu0 %4841 }
0x1863   : > { %v4789_v22 = vsel %vm3935_vm12, %v4786_v35, %v4788_v60 }
0x1864   : > { %v4794_v24 = vsel %vm3833_vm10, %v4789_v22, 0 }
0x1865   : > { %5802 = vmatpush3.bf16.msra.mxu0 %v4794_v24 }
0x1866   : > { %v4840_v20 = vpop.permute.xlu1 %4839  ;;  %5813 = vmatprep.subr.bf16.mxu0 %v6246_v1  ;;  %v4897_v7 = vpop.permute.xlu0 %4896 }
0x1867   : > { %v4844_v58 = vsel %vm4843_vm4, %v4840_v20, %v4842_v17 }
0x1868   : > { %v4849_v45 = vsel %vm3833_vm10, %v4844_v58, 0  ;;  %5798 = vmatmul.mubr.msk.bf16.vlgmr.msra.gmra.mrb[64].mxu1 %vm3803_vm7, %v5280_v18  ;;  %5804 = vmatmul.mubr.msk.bf16.vlgmr.msra.gmra.mrb[68].mxu0 %vm3803_vm7, %v5282_v13 }
0x1869   : > { %5808 = vmatpush3.bf16.msra.mxu1 %v4849_v45  ;;  %5809 = vmatprep.mubr.msk.bf16.mxu1 %vm6247_vm0, %v6246_v1 }
0x186a   : > { %v4895_v21 = vpop.permute.xlu1 %4894  ;;  %5815 = vmatprep.mubr.msk.bf16.mxu0 %vm6247_vm0, %v6246_v1 }
0x186b   : > { %v4898_v2 = vsel %vm4309_vm13, %v4895_v21, %v4897_v7 }
0x186c   : > { %v4903_v0 = vsel %vm3833_vm10, %v4898_v2, 0 }
0x186d   : > { %5814 = vmatpush3.bf16.msra.mxu0 %v4903_v0 }
0x1870   : > { %5810 = vmatmul.mubr.msk.bf16.vlgmr.msra.gmra.mrb[68].mxu1 %vm3803_vm7, %v5284_v53  ;;  %5816 = vmatmul.mubr.msk.bf16.vlgmr.msra.gmra.mrb[72].mxu0 %vm3803_vm7, %v5286_v8 }
0x187b   : > { %v4950_v19 = vpop.permute.xlu1 %4949 }
0x192b   : > { %v4618_v55 = vpop.f32.mrb[56].mxu1 }
0x192c   : > { %v5781_v6 = vpop.f32.mrb[57].mxu1 }
0x192d   : > { %v4621_v1 = vpop.f32.mrb[58].mxu1 }
0x192e   : > { %v5782_v26 = vpop.f32.mrb[59].mxu1 }
0x1933   : > { %v4669_v57 = vpop.f32.mrb[60].mxu1  ;;  %v4722_v9 = vpop.f32.mrb[64].mxu0 }
0x1934   : > { %v4670_v59 = vadd.f32 %v4669_v57, %v4618_v55  ;;  %v5787_v5 = vpop.f32.mrb[61].mxu1  ;;  %v5793_v15 = vpop.f32.mrb[65].mxu0 }
0x1935   : > { %v4672_v42 = vpop.f32.mrb[62].mxu1  ;;  %v4725_v23 = vpop.f32.mrb[66].mxu0 }
0x1936   : > { %v4728_v16 = vadd.f32 %v4722_v9, %v4670_v59  ;;  %v5788_v25 = vpop.f32.mrb[63].mxu1  ;;  %v5794_v62 = vpop.f32.mrb[67].mxu0 }
0x193b   : > { %v4776_v27 = vpop.f32.mrb[64].mxu1  ;;  %v4830_v56 = vpop.f32.mrb[68].mxu0 }
0x193c   : > { %v4782_v28 = vadd.f32 %v4776_v27, %v4728_v16  ;;  %v5799_v37 = vpop.f32.mrb[65].mxu1  ;;  %v5805_v14 = vpop.f32.mrb[69].mxu0 }
0x193d   : > { %v4779_v12 = vpop.f32.mrb[66].mxu1  ;;  %v4833_v63 = vpop.f32.mrb[70].mxu0 }
0x193e   : > { %v4836_v29 = vadd.f32 %v4830_v56, %v4782_v28  ;;  %v5800_v30 = vpop.f32.mrb[67].mxu1  ;;  %v5806_v33 = vpop.f32.mrb[71].mxu0 }
0x1943   : > { %v4885_v47 = vpop.f32.mrb[68].mxu1  ;;  %v4939_v31 = vpop.f32.mrb[72].mxu0 }
0x1944   : > { %v4891_v36 = vadd.f32 %v4885_v47, %v4836_v29  ;;  %v5811_v32 = vpop.f32.mrb[69].mxu1  ;;  %v5817_v10 = vpop.f32.mrb[73].mxu0 }
0x1945   : > { %v4888_v40 = vpop.f32.mrb[70].mxu1  ;;  %v4942_v41 = vpop.f32.mrb[74].mxu0 }
0x1946   : > { %v4945_v34 = vadd.f32 %v4939_v31, %v4891_v36  ;;  %v5812_v3 = vpop.f32.mrb[71].mxu1  ;;  %v5818_v11 = vpop.f32.mrb[75].mxu0 }
0x1948   : > { %v4952_v38 = vadd.f32 %v4950_v19, %v4945_v34 }
0x194a   : > { %6173 = vtanh.f32 %v4952_v38 }
0x1954   : > { %v6174_v39 = vpop.eup %6173 }
0x1955   : > { %4954 = vst [vmem:[%s229_s7] sm:$0x1] %v6174_v39 }
0x1956   : > { %6188 = shalt.err (!%p6185_p3)
}
0x1957   : > { %s6189_s13 = scalar_lea.hbm %s7333_s9, 16  ;;  %s6193_s11 = scalar_lea.hbm %s7380_s5, 32 }
0x1958   : > { %p6190_p4 = scmp.ne.s32.totalorder %s7333_s9, %s6189_s13  ;;  %p6194_p9 = scmp.lt.u32.totalorder %s7333_s9, %s7380_s5 }
0x1959   : > { %p6195_p10 = scmp.lt.u32.totalorder %s6193_s11, %s6189_s13  ;;  %p6197_p12 = scmp.lt.u32.totalorder %s6189_s13, %s7333_s9 }
0x195a   : > { %p6191_p7 = pnand %p6190_p4, %p6345_p5 }
0x195b   : > { %p6196_p11 = por %p6195_p10, %p6194_p9 }
0x195c   : > { %p6192_p8 = pneg %p6191_p7 }
0x195d   : > { %p6198_p13 = por %p6197_p12, %p6196_p11 }
0x195f   : > { %p6199_p0 = pnand %p6198_p13, %p6192_p8 }
0x1961   : > { %6202 = shalt.err (!%p6199_p0)
}
0x1962   : > { %5918 = dma.vmem_to_hbm [thread:$0]  (%p6345_p5), %s7335_s8, 16, %s7333_s9, %s4956_s17  }
0x1963 PF: > { %p5924_p1 = scmp.ge.s32.totalorder %s6237_s21, 2  ;;  %s4980_s1 = sand.u32 1, %s6225_s18  }
0x1964   : > { %s4981_s14 = scalar_lea.sflag [#allocation4], %s4980_s1 }
0x1965   : > { %p5921_p2 = pnand %p5924_p1, %p6349_p6 }
0x1967   : > { %6220 = dma.done.wait (!%p5921_p2), %s4981_s14, 16  }
0x1968   : > { %6222 = vsyncadd (!%p5921_p2), %s4981_s14, 4294967280  ;;  %p15_p3 = scmp.ge.s32.totalorder %s6332_s24, 4   ;;  %s7429_s18 = smov %s6229_s19 }
0x1969   : > { %s7430_s19 = smov %s6233_s20  ;;  %s7431_s20 = smov %s6343_s27 }
0x196a   : > { %s7432_s21 = smov %s6332_s24  ;;  %17 = sbr.rel (!%p15_p3) target bundleno = 6 (0x6), region = 131 }
0x1971   :  { %4985 = vsyncpa [#allocation4], 1 }
0x1972   :  { %4987 = vsyncpa [#allocation4 + $0x1], 1 }

</bundles_post_ra>
